<compile_context>
chip_gen: v6e
topology: v6e:2x2x1
jax: 0.10.0
libtpu: 0.0.40
codegen_flags: <defaults>
</compile_context>

<pallas_src>
import functools
import math

import numpy as np
import jax
import jax.numpy as jnp
from jax.experimental import pallas as pl
from jax.experimental.pallas import tpu as pltpu  # noqa: F401  (TPU backend)

NODE_TYPES = ["movie", "director", "actor"]
EDGE_TYPES = [
    ("movie", "to", "director"),
    ("movie", "to", "actor"),
    ("director", "to", "movie"),
    ("actor", "to", "movie"),
]
NODE_IDX = {nt: i for i, nt in enumerate(NODE_TYPES)}

HIDDEN = 32
HEADS = 2
HEAD_DIM = HIDDEN // HEADS
OUT_CHANNELS = 3
NUM_LAYERS = 2
NUM_NODES = {"movie": 12, "director": 8, "actor": 16}
IN_DIMS = {"movie": 24, "director": 20, "actor": 28}

SKIP_ALPHA = 1.0 / (1.0 + math.exp(-1.0))   # PyG initializes the skip param to 1.0
NEG_INF = -1e30
OUT_PAD = 128                                # lane-dense classifier / store width


def _round_up(x, m):
    return ((x + m - 1) // m) * m


NPAD = _round_up(max(NUM_NODES.values()), 8)    # 16: common padded row count
IN_PAD = _round_up(max(IN_DIMS.values()), 8)    # 32: common padded input width


# ---------------------------------------------------------------------------
# In-kernel helpers (elementwise; exp goes to the EUP).
# ---------------------------------------------------------------------------
def _erf(x):
    # TODO(synk): exact torch erf-GELU has no Pallas primitive; Abramowitz &
    # Stegun 7.1.26 polynomial (max abs err ~1.5e-7) is used instead.
    a1, a2, a3, a4, a5 = (0.254829592, -0.284496736, 1.421413741,
                          -1.453152027, 1.061405429)
    p = 0.3275911
    ax = jnp.abs(x)
    t = 1.0 / (1.0 + p * ax)
    poly = ((((a5 * t + a4) * t + a3) * t + a2) * t + a1) * t
    y = 1.0 - poly * jnp.exp(-ax * ax)
    return jnp.where(x >= 0.0, y, -y)


def _gelu(x):
    return 0.5 * x * (1.0 + _erf(x * (1.0 / math.sqrt(2.0))))


# ---------------------------------------------------------------------------
# The single fused kernel.
# ---------------------------------------------------------------------------
def _hgt_fused_kernel(x_ref, w_in_ref, b_in_ref,
                      wq_ref, bq_ref, wk_ref, bk_ref, wv_ref, bv_ref,
                      wa_ref, ba_ref,
                      bias_m_ref, bias_d_ref, bias_a_ref,
                      g4_ref, g2_ref, w_out_ref, b_out_ref,
                      o_ref,
                      *, heads, num_layers, npad, skip_alpha):
    f32 = jnp.float32
    n_types = len(NODE_TYPES)
    n_rels = len(EDGE_TYPES)

    # ---- initial per-type Linear + ReLU: one block-diag matmul for all types.
    h_all = jnp.dot(x_ref[...], w_in_ref[...], preferred_element_type=f32)
    h_all = jnp.maximum(h_all + b_in_ref[...], 0.0)            # (3*NPAD, hidden)
    h = [h_all[t * npad:(t + 1) * npad, :] for t in range(n_types)]

    # Precomputed additive attention biases / segment-sum matrices (graph data).
    bias_blocks = [bias_m_ref[...], bias_d_ref[...], bias_a_ref[...]]
    seg_sum = [g4_ref[...], g2_ref[...], g2_ref[...]]

    for l in range(num_layers):
        # Only 'movie' feeds the classifier; last layer skips unused updates.
        dsts = list(range(n_types)) if l < num_layers - 1 else [NODE_IDX["movie"]]
        h_new = list(h)
        for d in dsts:
            ti = l * n_types + d
            # q from the folded q_lin weight (no slab slicing / selectors).
            q = jnp.dot(h[d], wq_ref[ti], preferred_element_type=f32) + bq_ref[ti]

            # Head-split K / V for every incoming relation, row-stacked so the
            # score block and the aggregation are each ONE matmul.
            k_parts, v_parts = [], []
            for r, et in enumerate(EDGE_TYPES):
                if NODE_IDX[et[2]] != d:
                    continue
                s = NODE_IDX[et[0]]
                for hh in range(heads):
                    wi = (l * n_rels + r) * heads + hh
                    k_parts.append(jnp.dot(h[s], wk_ref[wi],
                                           preferred_element_type=f32) + bk_ref[wi])
                    v_parts.append(jnp.dot(h[s], wv_ref[wi],
                                           preferred_element_type=f32) + bv_ref[wi])
            k_stack = jnp.concatenate(k_parts, axis=0)     # (nseg*NPAD, hidden)
            v_stack = jnp.concatenate(v_parts, axis=0)     # (nseg*NPAD, hidden)

            # Lane-dense score block: head restriction is implicit because each
            # K row-segment is zero outside its head's channel block.
            scores = jax.lax.dot_general(
                q, k_stack, (((1,), (1,)), ((), ())),
                preferred_element_type=f32) + bias_blocks[d]   # (NPAD, nseg*NPAD)

            # Per-(edge-type, head) softmax (group='sum' semantics): a shared
            # per-row max keeps exp stable and is softmax-invariant within each
            # segment; segment denominators come from one MXU matmul with a
            # block-diagonal ones matrix.  Fully masked segments/rows -> 0.
            m_row = jnp.maximum(jnp.max(scores, axis=-1, keepdims=True), -1e20)
            p = jnp.exp(scores - m_row)
            den = jnp.dot(p, seg_sum[d], preferred_element_type=f32)
            attn = p * pl.reciprocal(jnp.maximum(den, 1e-30), approx=True)

            # One matmul aggregates over sources, sums over edge types and
            # merges heads (V segments are zero outside their head's columns).
            msg = jnp.dot(attn, v_stack, preferred_element_type=f32)  # (NPAD, hidden)

            out = jnp.dot(_gelu(msg), wa_ref[ti],
                          preferred_element_type=f32) + ba_ref[ti]
            h_new[d] = skip_alpha * out + (1.0 - skip_alpha) * h[d]
        h = h_new

    # Final classifier on 'movie', zero-padded to 128 lanes: one unmasked store.
    logits = jnp.dot(h[NODE_IDX["movie"]], w_out_ref[...],
                     preferred_element_type=f32) + b_out_ref[...]
    o_ref[...] = logits.astype(o_ref.dtype)


@jax.jit
def hgt_forward(x_bd, prep):
    kernel = functools.partial(
        _hgt_fused_kernel, heads=HEADS, num_layers=NUM_LAYERS, npad=NPAD,
        skip_alpha=float(SKIP_ALPHA))
    return pl.pallas_call(
        kernel,
        out_shape=jax.ShapeDtypeStruct((NPAD, OUT_PAD), jnp.float32),
    )(x_bd, prep["w_in"], prep["b_in"],
      prep["wq"], prep["bq"], prep["wk"], prep["bk"], prep["wv"], prep["bv"],
      prep["wa"], prep["ba"],
      prep["bias_movie"], prep["bias_director"], prep["bias_actor"],
      prep["g4"], prep["g2"], prep["w_out"], prep["b_out"])


# ---------------------------------------------------------------------------
# Parameters: PyG-style init + one-time folding into kernel-ready matrices.
# ---------------------------------------------------------------------------
def init_params(key, in_dims, hidden, out_dim, heads, num_layers):
    d = hidden // heads
    state = {"key": key}

    def next_key():
        state["key"], sub = jax.random.split(state["key"])
        return sub

    def lin_init(fan_in, fan_out):
        s = 1.0 / math.sqrt(fan_in)
        w = jax.random.uniform(next_key(), (fan_in, fan_out), jnp.float32, -s, s)
        b = jax.random.uniform(next_key(), (fan_out,), jnp.float32, -s, s)
        return {"w": w, "b": b}

    params = {"lin_dict": {}, "convs": [], "lin": None}
    for nt in NODE_TYPES:
        params["lin_dict"][nt] = lin_init(in_dims[nt], hidden)

    for _ in range(num_layers):
        layer = {"k_lin": {}, "q_lin": {}, "v_lin": {}, "a_lin": {},
                 "a_rel": {}, "m_rel": {}, "p_rel": {}}
        for nt in NODE_TYPES:
            layer["k_lin"][nt] = lin_init(hidden, hidden)
            layer["q_lin"][nt] = lin_init(hidden, hidden)
            layer["v_lin"][nt] = lin_init(hidden, hidden)
            layer["a_lin"][nt] = lin_init(hidden, hidden)
        for et in EDGE_TYPES:
            ek = "__".join(et)
            s = 1.0 / math.sqrt(d)
            layer["a_rel"][ek] = jax.random.uniform(next_key(), (heads, d, d),
                                                    jnp.float32, -s, s)
            layer["m_rel"][ek] = jax.random.uniform(next_key(), (heads, d, d),
                                                    jnp.float32, -s, s)
            layer["p_rel"][ek] = jnp.ones((heads,), jnp.float32)  # PyG inits ones
        params["convs"].append(layer)

    params["lin"] = lin_init(hidden, out_dim)
    return params


def preprocess_params(params, heads, in_pad):
    """Fold everything into kernel-ready matrices (runs once, on host)."""
    hidden = params["lin"]["w"].shape[0]
    d = hidden // heads
    T, R, L = len(NODE_TYPES), len(EDGE_TYPES), len(params["convs"])

    # Initial projection: per-type weights stacked along rows (block-diag x),
    # per-type bias broadcast over that type's padded row block.
    w_in = np.zeros((T * in_pad, hidden), np.float32)
    b_in = np.zeros((T * NPAD, hidden), np.float32)
    for t, nt in enumerate(NODE_TYPES):
        w = np.asarray(params["lin_dict"][nt]["w"])
        w_in[t * in_pad:t * in_pad + w.shape[0], :] = w
        b_in[t * NPAD:(t + 1) * NPAD, :] = np.asarray(
            params["lin_dict"][nt]["b"])[None, :]

    wq = np.zeros((L * T, hidden, hidden), np.float32)
    bq = np.zeros((L * T, 1, hidden), np.float32)
    wa = np.zeros((L * T, hidden, hidden), np.float32)
    ba = np.zeros((L * T, 1, hidden), np.float32)
    wk = np.zeros((L * R * heads, hidden, hidden), np.float32)
    bk = np.zeros((L * R * heads, 1, hidden), np.float32)
    wv = np.zeros_like(wk)
    bv = np.zeros_like(bk)

    for l, layer in enumerate(params["convs"]):
        for t, nt in enumerate(NODE_TYPES):
            wq[l * T + t] = np.asarray(layer["q_lin"][nt]["w"])
            bq[l * T + t, 0] = np.asarray(layer["q_lin"][nt]["b"])
            wa[l * T + t] = np.asarray(layer["a_lin"][nt]["w"])
            ba[l * T + t, 0] = np.asarray(layer["a_lin"][nt]["b"])
        for r, et in enumerate(EDGE_TYPES):
            ek = "__".join(et)
            src = et[0]
            a_rel = np.asarray(layer["a_rel"][ek])
            m_rel = np.asarray(layer["m_rel"][ek])
            p_rel = np.asarray(layer["p_rel"][ek])
            kw = np.asarray(layer["k_lin"][src]["w"])
            kb = np.asarray(layer["k_lin"][src]["b"])
            vw = np.asarray(layer["v_lin"][src]["w"])
            vb = np.asarray(layer["v_lin"][src]["b"])
            for hh in range(heads):
                idx = (l * R + r) * heads + hh
                sl = slice(hh * d, (hh + 1) * d)
                a_h = a_rel[hh] * (p_rel[hh] / math.sqrt(d))   # score scale folded in
                wk[idx][:, sl] = kw[:, sl] @ a_h               # head-split: other
                bk[idx, 0, sl] = kb[sl] @ a_h                  # head's block stays 0
                wv[idx][:, sl] = vw[:, sl] @ m_rel[hh]
                bv[idx, 0, sl] = vb[sl] @ m_rel[hh]

    # Classifier, zero-padded to 128 lanes for an unmasked store.
    w_out = np.zeros((hidden, OUT_PAD), np.float32)
    w_out[:, :OUT_CHANNELS] = np.asarray(params["lin"]["w"])
    b_out = np.zeros((1, OUT_PAD), np.float32)
    b_out[0, :OUT_CHANNELS] = np.asarray(params["lin"]["b"])

    return {k: jnp.asarray(v) for k, v in dict(
        w_in=w_in, b_in=b_in, wq=wq, bq=bq, wk=wk, bk=bk, wv=wv, bv=bv,
        wa=wa, ba=ba, w_out=w_out, b_out=b_out).items()}


def build_graph_inputs(dense_adj):
    """Additive attention bias blocks (0 on edges, -1e30 off / padded), tiled
    per head in the same (relation, head) segment order the kernel uses, plus
    the block-diagonal ones matrices for the segment-wise softmax sums."""
    def bias_for(et):
        adj = dense_adj[et]
        b = np.full((NPAD, NPAD), NEG_INF, np.float32)
        b[:adj.shape[0], :adj.shape[1]] = np.where(adj, 0.0, NEG_INF)
        return b

    blocks = {}
    for nt in NODE_TYPES:
        segs = []
        for et in EDGE_TYPES:
            if et[2] != nt:
                continue
            b = bias_for(et)
            for _ in range(HEADS):
                segs.append(b)
        blocks[nt] = np.concatenate(segs, axis=1)

    def seg_ones(n_seg):
        g = np.zeros((n_seg * NPAD, n_seg * NPAD), np.float32)
        for i in range(n_seg):
            g[i * NPAD:(i + 1) * NPAD, i * NPAD:(i + 1) * NPAD] = 1.0
        return g

    return {
        "bias_movie": jnp.asarray(blocks["movie"]),        # (16, 64)
        "bias_director": jnp.asarray(blocks["director"]),  # (16, 32)
        "bias_actor": jnp.asarray(blocks["actor"]),        # (16, 32)
        "g4": jnp.asarray(seg_ones(2 * HEADS)),             # movie: 2 rels x 2 heads
        "g2": jnp.asarray(seg_ones(HEADS)),                  # director/actor
    }


def pack_features(x_dict):
    """Block-diagonal (3*NPAD, 3*IN_PAD) feature slab: one matmul projects all
    node types with their own weights."""
    x_bd = np.zeros((len(NODE_TYPES) * NPAD, len(NODE_TYPES) * IN_PAD), np.float32)
    for t, nt in enumerate(NODE_TYPES):
        xt = np.asarray(x_dict[nt])
        x_bd[t * NPAD:t * NPAD + xt.shape[0],
             t * IN_PAD:t * IN_PAD + xt.shape[1]] = xt
    return jnp.asarray(x_bd)


# ---------------------------------------------------------------------------
# Main
# ---------------------------------------------------------------------------
if __name__ == "__main__":
    key = jax.random.PRNGKey(0)

    # Node features.
    x_dict = {}
    for nt in NODE_TYPES:
        key, sub = jax.random.split(key)
        x_dict[nt] = jax.random.normal(sub, (NUM_NODES[nt], IN_DIMS[nt]),
                                       jnp.float32)

    # Edge sets (edge_index_dict equivalent) as deterministic dense Bernoulli
    # adjacencies [dst, src]; converted to additive attention biases.
    dense_adj = {}
    for et in EDGE_TYPES:
        src, _, dst = et
        key, sub = jax.random.split(key)
        dense_adj[et] = np.array(jax.random.bernoulli(
            sub, 0.35, (NUM_NODES[dst], NUM_NODES[src])))

    key, sub = jax.random.split(key)
    params = init_params(sub, IN_DIMS, HIDDEN, OUT_CHANNELS, HEADS, NUM_LAYERS)

    prep = preprocess_params(params, HEADS, IN_PAD)
    prep.update(build_graph_inputs(dense_adj))
    x_bd = pack_features(x_dict)

    out_pad = hgt_forward(x_bd, prep)
    out_pad = jax.block_until_ready(out_pad)
    out = out_pad[:NUM_NODES["movie"], :OUT_CHANNELS]

    assert out.shape == (NUM_NODES["movie"], OUT_CHANNELS)
    assert bool(jnp.all(jnp.isfinite(out)))
    print("KERNEL_OK")
</pallas_src>

<mosaic_0001>
module attributes {stable_mosaic.version = 11 : i64} {
  func.func @_hgt_fused_kernel(%arg0: memref<48x96xf32, #tpu.memory_space<vmem>>, %arg1: memref<96x32xf32, #tpu.memory_space<vmem>>, %arg2: memref<48x32xf32, #tpu.memory_space<vmem>>, %arg3: memref<6x32x32xf32, #tpu.memory_space<vmem>>, %arg4: memref<6x1x32xf32, #tpu.memory_space<vmem>>, %arg5: memref<16x32x32xf32, #tpu.memory_space<vmem>>, %arg6: memref<16x1x32xf32, #tpu.memory_space<vmem>>, %arg7: memref<16x32x32xf32, #tpu.memory_space<vmem>>, %arg8: memref<16x1x32xf32, #tpu.memory_space<vmem>>, %arg9: memref<6x32x32xf32, #tpu.memory_space<vmem>>, %arg10: memref<6x1x32xf32, #tpu.memory_space<vmem>>, %arg11: memref<16x64xf32, #tpu.memory_space<vmem>>, %arg12: memref<16x32xf32, #tpu.memory_space<vmem>>, %arg13: memref<16x32xf32, #tpu.memory_space<vmem>>, %arg14: memref<64x64xf32, #tpu.memory_space<vmem>>, %arg15: memref<32x32xf32, #tpu.memory_space<vmem>>, %arg16: memref<32x128xf32, #tpu.memory_space<vmem>>, %arg17: memref<1x128xf32, #tpu.memory_space<vmem>>, %arg18: memref<16x128xf32, #tpu.memory_space<vmem>>) attributes {dimension_semantics = [], scalar_prefetch = 0 : i64, scratch_operands = 0 : i64, tpu.core_type = #tpu.core_type<tc>} {
    %c0 = arith.constant 0 : index
    %c0_0 = arith.constant 0 : index
    %0 = vector.load %arg0[%c0, %c0_0] : memref<48x96xf32, #tpu.memory_space<vmem>>, vector<48x96xf32>
    %c0_1 = arith.constant 0 : index
    %c0_2 = arith.constant 0 : index
    %1 = vector.load %arg1[%c0_1, %c0_2] : memref<96x32xf32, #tpu.memory_space<vmem>>, vector<96x32xf32>
    %cst = arith.constant dense<0.000000e+00> : vector<48x32xf32>
    %2 = tpu.matmul %0, %1, %cst {dimension_numbers = #tpu.dot_dimension_numbers<[1], [0], [0], [1], [0, 0, 1, 1], [], []>} : vector<48x96xf32>, vector<96x32xf32>, vector<48x32xf32> -> vector<48x32xf32>
    %c0_3 = arith.constant 0 : index
    %c0_4 = arith.constant 0 : index
    %3 = vector.load %arg2[%c0_3, %c0_4] : memref<48x32xf32, #tpu.memory_space<vmem>>, vector<48x32xf32>
    %4 = arith.addf %2, %3 : vector<48x32xf32>
    %cst_5 = arith.constant 0.000000e+00 : f32
    %5 = vector.broadcast %cst_5 : f32 to vector<48x32xf32>
    %6 = arith.maximumf %4, %5 : vector<48x32xf32>
    %7 = vector.extract_strided_slice %6 {offsets = [0, 0], sizes = [16, 32], strides = [1, 1]} : vector<48x32xf32> to vector<16x32xf32>
    %8 = vector.extract_strided_slice %6 {offsets = [16, 0], sizes = [16, 32], strides = [1, 1]} : vector<48x32xf32> to vector<16x32xf32>
    %9 = vector.extract_strided_slice %6 {offsets = [32, 0], sizes = [16, 32], strides = [1, 1]} : vector<48x32xf32> to vector<16x32xf32>
    %c0_6 = arith.constant 0 : index
    %c0_7 = arith.constant 0 : index
    %10 = vector.load %arg11[%c0_6, %c0_7] : memref<16x64xf32, #tpu.memory_space<vmem>>, vector<16x64xf32>
    %c0_8 = arith.constant 0 : index
    %c0_9 = arith.constant 0 : index
    %11 = vector.load %arg12[%c0_8, %c0_9] : memref<16x32xf32, #tpu.memory_space<vmem>>, vector<16x32xf32>
    %c0_10 = arith.constant 0 : index
    %c0_11 = arith.constant 0 : index
    %12 = vector.load %arg13[%c0_10, %c0_11] : memref<16x32xf32, #tpu.memory_space<vmem>>, vector<16x32xf32>
    %c0_12 = arith.constant 0 : index
    %c0_13 = arith.constant 0 : index
    %13 = vector.load %arg14[%c0_12, %c0_13] : memref<64x64xf32, #tpu.memory_space<vmem>>, vector<64x64xf32>
    %c0_14 = arith.constant 0 : index
    %c0_15 = arith.constant 0 : index
    %14 = vector.load %arg15[%c0_14, %c0_15] : memref<32x32xf32, #tpu.memory_space<vmem>>, vector<32x32xf32>
    %c0_16 = arith.constant 0 : index
    %c0_17 = arith.constant 0 : index
    %15 = vector.load %arg15[%c0_16, %c0_17] : memref<32x32xf32, #tpu.memory_space<vmem>>, vector<32x32xf32>
    %c0_18 = arith.constant 0 : index
    %c0_19 = arith.constant 0 : index
    %c0_20 = arith.constant 0 : index
    %16 = vector.load %arg3[%c0_18, %c0_19, %c0_20] : memref<6x32x32xf32, #tpu.memory_space<vmem>>, vector<1x32x32xf32>
    %17 = vector.shape_cast %16 : vector<1x32x32xf32> to vector<32x32xf32>
    %cst_21 = arith.constant dense<0.000000e+00> : vector<16x32xf32>
    %18 = tpu.matmul %7, %17, %cst_21 {dimension_numbers = #tpu.dot_dimension_numbers<[1], [0], [0], [1], [0, 0, 1, 1], [], []>} : vector<16x32xf32>, vector<32x32xf32>, vector<16x32xf32> -> vector<16x32xf32>
    %c0_22 = arith.constant 0 : index
    %c0_23 = arith.constant 0 : index
    %c0_24 = arith.constant 0 : index
    %19 = vector.load %arg4[%c0_22, %c0_23, %c0_24] : memref<6x1x32xf32, #tpu.memory_space<vmem>>, vector<1x1x32xf32>
    %20 = vector.shape_cast %19 : vector<1x1x32xf32> to vector<1x32xf32>
    %21 = vector.broadcast %20 : vector<1x32xf32> to vector<16x32xf32>
    %22 = arith.addf %18, %21 : vector<16x32xf32>
    %c4 = arith.constant 4 : index
    %c0_25 = arith.constant 0 : index
    %c0_26 = arith.constant 0 : index
    %23 = vector.load %arg5[%c4, %c0_25, %c0_26] : memref<16x32x32xf32, #tpu.memory_space<vmem>>, vector<1x32x32xf32>
    %24 = vector.shape_cast %23 : vector<1x32x32xf32> to vector<32x32xf32>
    %cst_27 = arith.constant dense<0.000000e+00> : vector<16x32xf32>
    %25 = tpu.matmul %8, %24, %cst_27 {dimension_numbers = #tpu.dot_dimension_numbers<[1], [0], [0], [1], [0, 0, 1, 1], [], []>} : vector<16x32xf32>, vector<32x32xf32>, vector<16x32xf32> -> vector<16x32xf32>
    %c4_28 = arith.constant 4 : index
    %c0_29 = arith.constant 0 : index
    %c0_30 = arith.constant 0 : index
    %26 = vector.load %arg6[%c4_28, %c0_29, %c0_30] : memref<16x1x32xf32, #tpu.memory_space<vmem>>, vector<1x1x32xf32>
    %27 = vector.shape_cast %26 : vector<1x1x32xf32> to vector<1x32xf32>
    %28 = vector.broadcast %27 : vector<1x32xf32> to vector<16x32xf32>
    %29 = arith.addf %25, %28 : vector<16x32xf32>
    %c4_31 = arith.constant 4 : index
    %c0_32 = arith.constant 0 : index
    %c0_33 = arith.constant 0 : index
    %30 = vector.load %arg7[%c4_31, %c0_32, %c0_33] : memref<16x32x32xf32, #tpu.memory_space<vmem>>, vector<1x32x32xf32>
    %31 = vector.shape_cast %30 : vector<1x32x32xf32> to vector<32x32xf32>
    %cst_34 = arith.constant dense<0.000000e+00> : vector<16x32xf32>
    %32 = tpu.matmul %8, %31, %cst_34 {dimension_numbers = #tpu.dot_dimension_numbers<[1], [0], [0], [1], [0, 0, 1, 1], [], []>} : vector<16x32xf32>, vector<32x32xf32>, vector<16x32xf32> -> vector<16x32xf32>
    %c4_35 = arith.constant 4 : index
    %c0_36 = arith.constant 0 : index
    %c0_37 = arith.constant 0 : index
    %33 = vector.load %arg8[%c4_35, %c0_36, %c0_37] : memref<16x1x32xf32, #tpu.memory_space<vmem>>, vector<1x1x32xf32>
    %34 = vector.shape_cast %33 : vector<1x1x32xf32> to vector<1x32xf32>
    %35 = vector.broadcast %34 : vector<1x32xf32> to vector<16x32xf32>
    %36 = arith.addf %32, %35 : vector<16x32xf32>
    %c5 = arith.constant 5 : index
    %c0_38 = arith.constant 0 : index
    %c0_39 = arith.constant 0 : index
    %37 = vector.load %arg5[%c5, %c0_38, %c0_39] : memref<16x32x32xf32, #tpu.memory_space<vmem>>, vector<1x32x32xf32>
    %38 = vector.shape_cast %37 : vector<1x32x32xf32> to vector<32x32xf32>
    %cst_40 = arith.constant dense<0.000000e+00> : vector<16x32xf32>
    %39 = tpu.matmul %8, %38, %cst_40 {dimension_numbers = #tpu.dot_dimension_numbers<[1], [0], [0], [1], [0, 0, 1, 1], [], []>} : vector<16x32xf32>, vector<32x32xf32>, vector<16x32xf32> -> vector<16x32xf32>
    %c5_41 = arith.constant 5 : index
    %c0_42 = arith.constant 0 : index
    %c0_43 = arith.constant 0 : index
    %40 = vector.load %arg6[%c5_41, %c0_42, %c0_43] : memref<16x1x32xf32, #tpu.memory_space<vmem>>, vector<1x1x32xf32>
    %41 = vector.shape_cast %40 : vector<1x1x32xf32> to vector<1x32xf32>
    %42 = vector.broadcast %41 : vector<1x32xf32> to vector<16x32xf32>
    %43 = arith.addf %39, %42 : vector<16x32xf32>
    %c5_44 = arith.constant 5 : index
    %c0_45 = arith.constant 0 : index
    %c0_46 = arith.constant 0 : index
    %44 = vector.load %arg7[%c5_44, %c0_45, %c0_46] : memref<16x32x32xf32, #tpu.memory_space<vmem>>, vector<1x32x32xf32>
    %45 = vector.shape_cast %44 : vector<1x32x32xf32> to vector<32x32xf32>
    %cst_47 = arith.constant dense<0.000000e+00> : vector<16x32xf32>
    %46 = tpu.matmul %8, %45, %cst_47 {dimension_numbers = #tpu.dot_dimension_numbers<[1], [0], [0], [1], [0, 0, 1, 1], [], []>} : vector<16x32xf32>, vector<32x32xf32>, vector<16x32xf32> -> vector<16x32xf32>
    %c5_48 = arith.constant 5 : index
    %c0_49 = arith.constant 0 : index
    %c0_50 = arith.constant 0 : index
    %47 = vector.load %arg8[%c5_48, %c0_49, %c0_50] : memref<16x1x32xf32, #tpu.memory_space<vmem>>, vector<1x1x32xf32>
    %48 = vector.shape_cast %47 : vector<1x1x32xf32> to vector<1x32xf32>
    %49 = vector.broadcast %48 : vector<1x32xf32> to vector<16x32xf32>
    %50 = arith.addf %46, %49 : vector<16x32xf32>
    %c6 = arith.constant 6 : index
    %c0_51 = arith.constant 0 : index
    %c0_52 = arith.constant 0 : index
    %51 = vector.load %arg5[%c6, %c0_51, %c0_52] : memref<16x32x32xf32, #tpu.memory_space<vmem>>, vector<1x32x32xf32>
    %52 = vector.shape_cast %51 : vector<1x32x32xf32> to vector<32x32xf32>
    %cst_53 = arith.constant dense<0.000000e+00> : vector<16x32xf32>
    %53 = tpu.matmul %9, %52, %cst_53 {dimension_numbers = #tpu.dot_dimension_numbers<[1], [0], [0], [1], [0, 0, 1, 1], [], []>} : vector<16x32xf32>, vector<32x32xf32>, vector<16x32xf32> -> vector<16x32xf32>
    %c6_54 = arith.constant 6 : index
    %c0_55 = arith.constant 0 : index
    %c0_56 = arith.constant 0 : index
    %54 = vector.load %arg6[%c6_54, %c0_55, %c0_56] : memref<16x1x32xf32, #tpu.memory_space<vmem>>, vector<1x1x32xf32>
    %55 = vector.shape_cast %54 : vector<1x1x32xf32> to vector<1x32xf32>
    %56 = vector.broadcast %55 : vector<1x32xf32> to vector<16x32xf32>
    %57 = arith.addf %53, %56 : vector<16x32xf32>
    %c6_57 = arith.constant 6 : index
    %c0_58 = arith.constant 0 : index
    %c0_59 = arith.constant 0 : index
    %58 = vector.load %arg7[%c6_57, %c0_58, %c0_59] : memref<16x32x32xf32, #tpu.memory_space<vmem>>, vector<1x32x32xf32>
    %59 = vector.shape_cast %58 : vector<1x32x32xf32> to vector<32x32xf32>
    %cst_60 = arith.constant dense<0.000000e+00> : vector<16x32xf32>
    %60 = tpu.matmul %9, %59, %cst_60 {dimension_numbers = #tpu.dot_dimension_numbers<[1], [0], [0], [1], [0, 0, 1, 1], [], []>} : vector<16x32xf32>, vector<32x32xf32>, vector<16x32xf32> -> vector<16x32xf32>
    %c6_61 = arith.constant 6 : index
    %c0_62 = arith.constant 0 : index
    %c0_63 = arith.constant 0 : index
    %61 = vector.load %arg8[%c6_61, %c0_62, %c0_63] : memref<16x1x32xf32, #tpu.memory_space<vmem>>, vector<1x1x32xf32>
    %62 = vector.shape_cast %61 : vector<1x1x32xf32> to vector<1x32xf32>
    %63 = vector.broadcast %62 : vector<1x32xf32> to vector<16x32xf32>
    %64 = arith.addf %60, %63 : vector<16x32xf32>
    %c7 = arith.constant 7 : index
    %c0_64 = arith.constant 0 : index
    %c0_65 = arith.constant 0 : index
    %65 = vector.load %arg5[%c7, %c0_64, %c0_65] : memref<16x32x32xf32, #tpu.memory_space<vmem>>, vector<1x32x32xf32>
    %66 = vector.shape_cast %65 : vector<1x32x32xf32> to vector<32x32xf32>
    %cst_66 = arith.constant dense<0.000000e+00> : vector<16x32xf32>
    %67 = tpu.matmul %9, %66, %cst_66 {dimension_numbers = #tpu.dot_dimension_numbers<[1], [0], [0], [1], [0, 0, 1, 1], [], []>} : vector<16x32xf32>, vector<32x32xf32>, vector<16x32xf32> -> vector<16x32xf32>
    %c7_67 = arith.constant 7 : index
    %c0_68 = arith.constant 0 : index
    %c0_69 = arith.constant 0 : index
    %68 = vector.load %arg6[%c7_67, %c0_68, %c0_69] : memref<16x1x32xf32, #tpu.memory_space<vmem>>, vector<1x1x32xf32>
    %69 = vector.shape_cast %68 : vector<1x1x32xf32> to vector<1x32xf32>
    %70 = vector.broadcast %69 : vector<1x32xf32> to vector<16x32xf32>
    %71 = arith.addf %67, %70 : vector<16x32xf32>
    %c7_70 = arith.constant 7 : index
    %c0_71 = arith.constant 0 : index
    %c0_72 = arith.constant 0 : index
    %72 = vector.load %arg7[%c7_70, %c0_71, %c0_72] : memref<16x32x32xf32, #tpu.memory_space<vmem>>, vector<1x32x32xf32>
    %73 = vector.shape_cast %72 : vector<1x32x32xf32> to vector<32x32xf32>
    %cst_73 = arith.constant dense<0.000000e+00> : vector<16x32xf32>
    %74 = tpu.matmul %9, %73, %cst_73 {dimension_numbers = #tpu.dot_dimension_numbers<[1], [0], [0], [1], [0, 0, 1, 1], [], []>} : vector<16x32xf32>, vector<32x32xf32>, vector<16x32xf32> -> vector<16x32xf32>
    %c7_74 = arith.constant 7 : index
    %c0_75 = arith.constant 0 : index
    %c0_76 = arith.constant 0 : index
    %75 = vector.load %arg8[%c7_74, %c0_75, %c0_76] : memref<16x1x32xf32, #tpu.memory_space<vmem>>, vector<1x1x32xf32>
    %76 = vector.shape_cast %75 : vector<1x1x32xf32> to vector<1x32xf32>
    %77 = vector.broadcast %76 : vector<1x32xf32> to vector<16x32xf32>
    %78 = arith.addf %74, %77 : vector<16x32xf32>
    %79 = tpu.concatenate %29, %43, %57, %71 in 0 : vector<16x32xf32>, vector<16x32xf32>, vector<16x32xf32>, vector<16x32xf32> -> vector<64x32xf32>
    %80 = tpu.concatenate %36, %50, %64, %78 in 0 : vector<16x32xf32>, vector<16x32xf32>, vector<16x32xf32>, vector<16x32xf32> -> vector<64x32xf32>
    %cst_77 = arith.constant dense<0.000000e+00> : vector<16x64xf32>
    %81 = tpu.matmul %22, %79, %cst_77 {dimension_numbers = #tpu.dot_dimension_numbers<[1], [1], [0], [0], [0, 0, 1, 0], [], []>} : vector<16x32xf32>, vector<64x32xf32>, vector<16x64xf32> -> vector<16x64xf32>
    %82 = arith.addf %81, %10 : vector<16x64xf32>
    %cst_78 = arith.constant dense<0xFF800000> : vector<16xf32>
    %83 = vector.multi_reduction <maximumf>, %82, %cst_78 [1] : vector<16x64xf32> to vector<16xf32>
    %84 = vector.shape_cast %83 : vector<16xf32> to vector<16x1xf32>
    %cst_79 = arith.constant -1.000000e+20 : f32
    %85 = vector.broadcast %cst_79 : f32 to vector<16x1xf32>
    %86 = arith.maximumf %84, %85 : vector<16x1xf32>
    %87 = vector.broadcast %86 : vector<16x1xf32> to vector<16x64xf32>
    %88 = arith.subf %82, %87 : vector<16x64xf32>
    %89 = math.exp %88 : vector<16x64xf32>
    %cst_80 = arith.constant dense<0.000000e+00> : vector<16x64xf32>
    %90 = tpu.matmul %89, %13, %cst_80 {dimension_numbers = #tpu.dot_dimension_numbers<[1], [0], [0], [1], [0, 0, 1, 1], [], []>} : vector<16x64xf32>, vector<64x64xf32>, vector<16x64xf32> -> vector<16x64xf32>
    %cst_81 = arith.constant 1.000000e-30 : f32
    %91 = vector.broadcast %cst_81 : f32 to vector<16x64xf32>
    %92 = arith.maximumf %90, %91 : vector<16x64xf32>
    %93 = tpu.reciprocal %92 {approx = true} : vector<16x64xf32> -> vector<16x64xf32>
    %94 = arith.mulf %89, %93 : vector<16x64xf32>
    %cst_82 = arith.constant dense<0.000000e+00> : vector<16x32xf32>
    %95 = tpu.matmul %94, %80, %cst_82 {dimension_numbers = #tpu.dot_dimension_numbers<[1], [0], [0], [1], [0, 0, 1, 1], [], []>} : vector<16x64xf32>, vector<64x32xf32>, vector<16x32xf32> -> vector<16x32xf32>
    %cst_83 = arith.constant 5.000000e-01 : f32
    %96 = vector.broadcast %cst_83 : f32 to vector<16x32xf32>
    %97 = arith.mulf %96, %95 : vector<16x32xf32>
    %cst_84 = arith.constant 0.707106769 : f32
    %98 = vector.broadcast %cst_84 : f32 to vector<16x32xf32>
    %99 = arith.mulf %95, %98 : vector<16x32xf32>
    %100 = math.absf %99 : vector<16x32xf32>
    %cst_85 = arith.constant 0.327591091 : f32
    %101 = vector.broadcast %cst_85 : f32 to vector<16x32xf32>
    %102 = arith.mulf %101, %100 : vector<16x32xf32>
    %cst_86 = arith.constant 1.000000e+00 : f32
    %103 = vector.broadcast %cst_86 : f32 to vector<16x32xf32>
    %104 = arith.addf %103, %102 : vector<16x32xf32>
    %cst_87 = arith.constant 1.000000e+00 : f32
    %105 = vector.broadcast %cst_87 : f32 to vector<16x32xf32>
    %106 = arith.divf %105, %104 : vector<16x32xf32>
    %cst_88 = arith.constant 1.06140542 : f32
    %107 = vector.broadcast %cst_88 : f32 to vector<16x32xf32>
    %108 = arith.mulf %107, %106 : vector<16x32xf32>
    %cst_89 = arith.constant -1.45315206 : f32
    %109 = vector.broadcast %cst_89 : f32 to vector<16x32xf32>
    %110 = arith.addf %108, %109 : vector<16x32xf32>
    %111 = arith.mulf %110, %106 : vector<16x32xf32>
    %cst_90 = arith.constant 1.42141378 : f32
    %112 = vector.broadcast %cst_90 : f32 to vector<16x32xf32>
    %113 = arith.addf %111, %112 : vector<16x32xf32>
    %114 = arith.mulf %113, %106 : vector<16x32xf32>
    %cst_91 = arith.constant -0.284496725 : f32
    %115 = vector.broadcast %cst_91 : f32 to vector<16x32xf32>
    %116 = arith.addf %114, %115 : vector<16x32xf32>
    %117 = arith.mulf %116, %106 : vector<16x32xf32>
    %cst_92 = arith.constant 0.254829586 : f32
    %118 = vector.broadcast %cst_92 : f32 to vector<16x32xf32>
    %119 = arith.addf %117, %118 : vector<16x32xf32>
    %120 = arith.mulf %119, %106 : vector<16x32xf32>
    %cst_93 = arith.constant 0.000000e+00 : f32
    %121 = vector.broadcast %cst_93 : f32 to vector<16x32xf32>
    %122 = arith.subf %121, %100 : vector<16x32xf32>
    %123 = arith.mulf %122, %100 : vector<16x32xf32>
    %124 = math.exp %123 : vector<16x32xf32>
    %125 = arith.mulf %120, %124 : vector<16x32xf32>
    %cst_94 = arith.constant 1.000000e+00 : f32
    %126 = vector.broadcast %cst_94 : f32 to vector<16x32xf32>
    %127 = arith.subf %126, %125 : vector<16x32xf32>
    %cst_95 = arith.constant 0.000000e+00 : f32
    %128 = vector.broadcast %cst_95 : f32 to vector<16x32xf32>
    %129 = arith.cmpf oge, %99, %128 : vector<16x32xf32>
    %cst_96 = arith.constant 0.000000e+00 : f32
    %130 = vector.broadcast %cst_96 : f32 to vector<16x32xf32>
    %131 = arith.subf %130, %127 : vector<16x32xf32>
    %132 = arith.select %129, %127, %131 : vector<16x32xi1>, vector<16x32xf32>
    %cst_97 = arith.constant 1.000000e+00 : f32
    %133 = vector.broadcast %cst_97 : f32 to vector<16x32xf32>
    %134 = arith.addf %133, %132 : vector<16x32xf32>
    %135 = arith.mulf %97, %134 : vector<16x32xf32>
    %c0_98 = arith.constant 0 : index
    %c0_99 = arith.constant 0 : index
    %c0_100 = arith.constant 0 : index
    %136 = vector.load %arg9[%c0_98, %c0_99, %c0_100] : memref<6x32x32xf32, #tpu.memory_space<vmem>>, vector<1x32x32xf32>
    %137 = vector.shape_cast %136 : vector<1x32x32xf32> to vector<32x32xf32>
    %cst_101 = arith.constant dense<0.000000e+00> : vector<16x32xf32>
    %138 = tpu.matmul %135, %137, %cst_101 {dimension_numbers = #tpu.dot_dimension_numbers<[1], [0], [0], [1], [0, 0, 1, 1], [], []>} : vector<16x32xf32>, vector<32x32xf32>, vector<16x32xf32> -> vector<16x32xf32>
    %c0_102 = arith.constant 0 : index
    %c0_103 = arith.constant 0 : index
    %c0_104 = arith.constant 0 : index
    %139 = vector.load %arg10[%c0_102, %c0_103, %c0_104] : memref<6x1x32xf32, #tpu.memory_space<vmem>>, vector<1x1x32xf32>
    %140 = vector.shape_cast %139 : vector<1x1x32xf32> to vector<1x32xf32>
    %141 = vector.broadcast %140 : vector<1x32xf32> to vector<16x32xf32>
    %142 = arith.addf %138, %141 : vector<16x32xf32>
    %cst_105 = arith.constant 0.731058597 : f32
    %143 = vector.broadcast %cst_105 : f32 to vector<16x32xf32>
    %144 = arith.mulf %143, %142 : vector<16x32xf32>
    %cst_106 = arith.constant 0.268941432 : f32
    %145 = vector.broadcast %cst_106 : f32 to vector<16x32xf32>
    %146 = arith.mulf %145, %7 : vector<16x32xf32>
    %147 = arith.addf %144, %146 : vector<16x32xf32>
    %c1 = arith.constant 1 : index
    %c0_107 = arith.constant 0 : index
    %c0_108 = arith.constant 0 : index
    %148 = vector.load %arg3[%c1, %c0_107, %c0_108] : memref<6x32x32xf32, #tpu.memory_space<vmem>>, vector<1x32x32xf32>
    %149 = vector.shape_cast %148 : vector<1x32x32xf32> to vector<32x32xf32>
    %cst_109 = arith.constant dense<0.000000e+00> : vector<16x32xf32>
    %150 = tpu.matmul %8, %149, %cst_109 {dimension_numbers = #tpu.dot_dimension_numbers<[1], [0], [0], [1], [0, 0, 1, 1], [], []>} : vector<16x32xf32>, vector<32x32xf32>, vector<16x32xf32> -> vector<16x32xf32>
    %c1_110 = arith.constant 1 : index
    %c0_111 = arith.constant 0 : index
    %c0_112 = arith.constant 0 : index
    %151 = vector.load %arg4[%c1_110, %c0_111, %c0_112] : memref<6x1x32xf32, #tpu.memory_space<vmem>>, vector<1x1x32xf32>
    %152 = vector.shape_cast %151 : vector<1x1x32xf32> to vector<1x32xf32>
    %153 = vector.broadcast %152 : vector<1x32xf32> to vector<16x32xf32>
    %154 = arith.addf %150, %153 : vector<16x32xf32>
    %c0_113 = arith.constant 0 : index
    %c0_114 = arith.constant 0 : index
    %c0_115 = arith.constant 0 : index
    %155 = vector.load %arg5[%c0_113, %c0_114, %c0_115] : memref<16x32x32xf32, #tpu.memory_space<vmem>>, vector<1x32x32xf32>
    %156 = vector.shape_cast %155 : vector<1x32x32xf32> to vector<32x32xf32>
    %cst_116 = arith.constant dense<0.000000e+00> : vector<16x32xf32>
    %157 = tpu.matmul %7, %156, %cst_116 {dimension_numbers = #tpu.dot_dimension_numbers<[1], [0], [0], [1], [0, 0, 1, 1], [], []>} : vector<16x32xf32>, vector<32x32xf32>, vector<16x32xf32> -> vector<16x32xf32>
    %c0_117 = arith.constant 0 : index
    %c0_118 = arith.constant 0 : index
    %c0_119 = arith.constant 0 : index
    %158 = vector.load %arg6[%c0_117, %c0_118, %c0_119] : memref<16x1x32xf32, #tpu.memory_space<vmem>>, vector<1x1x32xf32>
    %159 = vector.shape_cast %158 : vector<1x1x32xf32> to vector<1x32xf32>
    %160 = vector.broadcast %159 : vector<1x32xf32> to vector<16x32xf32>
    %161 = arith.addf %157, %160 : vector<16x32xf32>
    %c0_120 = arith.constant 0 : index
    %c0_121 = arith.constant 0 : index
    %c0_122 = arith.constant 0 : index
    %162 = vector.load %arg7[%c0_120, %c0_121, %c0_122] : memref<16x32x32xf32, #tpu.memory_space<vmem>>, vector<1x32x32xf32>
    %163 = vector.shape_cast %162 : vector<1x32x32xf32> to vector<32x32xf32>
    %cst_123 = arith.constant dense<0.000000e+00> : vector<16x32xf32>
    %164 = tpu.matmul %7, %163, %cst_123 {dimension_numbers = #tpu.dot_dimension_numbers<[1], [0], [0], [1], [0, 0, 1, 1], [], []>} : vector<16x32xf32>, vector<32x32xf32>, vector<16x32xf32> -> vector<16x32xf32>
    %c0_124 = arith.constant 0 : index
    %c0_125 = arith.constant 0 : index
    %c0_126 = arith.constant 0 : index
    %165 = vector.load %arg8[%c0_124, %c0_125, %c0_126] : memref<16x1x32xf32, #tpu.memory_space<vmem>>, vector<1x1x32xf32>
    %166 = vector.shape_cast %165 : vector<1x1x32xf32> to vector<1x32xf32>
    %167 = vector.broadcast %166 : vector<1x32xf32> to vector<16x32xf32>
    %168 = arith.addf %164, %167 : vector<16x32xf32>
    %c1_127 = arith.constant 1 : index
    %c0_128 = arith.constant 0 : index
    %c0_129 = arith.constant 0 : index
    %169 = vector.load %arg5[%c1_127, %c0_128, %c0_129] : memref<16x32x32xf32, #tpu.memory_space<vmem>>, vector<1x32x32xf32>
    %170 = vector.shape_cast %169 : vector<1x32x32xf32> to vector<32x32xf32>
    %cst_130 = arith.constant dense<0.000000e+00> : vector<16x32xf32>
    %171 = tpu.matmul %7, %170, %cst_130 {dimension_numbers = #tpu.dot_dimension_numbers<[1], [0], [0], [1], [0, 0, 1, 1], [], []>} : vector<16x32xf32>, vector<32x32xf32>, vector<16x32xf32> -> vector<16x32xf32>
    %c1_131 = arith.constant 1 : index
    %c0_132 = arith.constant 0 : index
    %c0_133 = arith.constant 0 : index
    %172 = vector.load %arg6[%c1_131, %c0_132, %c0_133] : memref<16x1x32xf32, #tpu.memory_space<vmem>>, vector<1x1x32xf32>
    %173 = vector.shape_cast %172 : vector<1x1x32xf32> to vector<1x32xf32>
    %174 = vector.broadcast %173 : vector<1x32xf32> to vector<16x32xf32>
    %175 = arith.addf %171, %174 : vector<16x32xf32>
    %c1_134 = arith.constant 1 : index
    %c0_135 = arith.constant 0 : index
    %c0_136 = arith.constant 0 : index
    %176 = vector.load %arg7[%c1_134, %c0_135, %c0_136] : memref<16x32x32xf32, #tpu.memory_space<vmem>>, vector<1x32x32xf32>
    %177 = vector.shape_cast %176 : vector<1x32x32xf32> to vector<32x32xf32>
    %cst_137 = arith.constant dense<0.000000e+00> : vector<16x32xf32>
    %178 = tpu.matmul %7, %177, %cst_137 {dimension_numbers = #tpu.dot_dimension_numbers<[1], [0], [0], [1], [0, 0, 1, 1], [], []>} : vector<16x32xf32>, vector<32x32xf32>, vector<16x32xf32> -> vector<16x32xf32>
    %c1_138 = arith.constant 1 : index
    %c0_139 = arith.constant 0 : index
    %c0_140 = arith.constant 0 : index
    %179 = vector.load %arg8[%c1_138, %c0_139, %c0_140] : memref<16x1x32xf32, #tpu.memory_space<vmem>>, vector<1x1x32xf32>
    %180 = vector.shape_cast %179 : vector<1x1x32xf32> to vector<1x32xf32>
    %181 = vector.broadcast %180 : vector<1x32xf32> to vector<16x32xf32>
    %182 = arith.addf %178, %181 : vector<16x32xf32>
    %183 = tpu.concatenate %161, %175 in 0 : vector<16x32xf32>, vector<16x32xf32> -> vector<32x32xf32>
    %184 = tpu.concatenate %168, %182 in 0 : vector<16x32xf32>, vector<16x32xf32> -> vector<32x32xf32>
    %cst_141 = arith.constant dense<0.000000e+00> : vector<16x32xf32>
    %185 = tpu.matmul %154, %183, %cst_141 {dimension_numbers = #tpu.dot_dimension_numbers<[1], [1], [0], [0], [0, 0, 1, 0], [], []>} : vector<16x32xf32>, vector<32x32xf32>, vector<16x32xf32> -> vector<16x32xf32>
    %186 = arith.addf %185, %11 : vector<16x32xf32>
    %cst_142 = arith.constant dense<0xFF800000> : vector<16xf32>
    %187 = vector.multi_reduction <maximumf>, %186, %cst_142 [1] : vector<16x32xf32> to vector<16xf32>
    %188 = vector.shape_cast %187 : vector<16xf32> to vector<16x1xf32>
    %cst_143 = arith.constant -1.000000e+20 : f32
    %189 = vector.broadcast %cst_143 : f32 to vector<16x1xf32>
    %190 = arith.maximumf %188, %189 : vector<16x1xf32>
    %191 = vector.broadcast %190 : vector<16x1xf32> to vector<16x32xf32>
    %192 = arith.subf %186, %191 : vector<16x32xf32>
    %193 = math.exp %192 : vector<16x32xf32>
    %cst_144 = arith.constant dense<0.000000e+00> : vector<16x32xf32>
    %194 = tpu.matmul %193, %14, %cst_144 {dimension_numbers = #tpu.dot_dimension_numbers<[1], [0], [0], [1], [0, 0, 1, 1], [], []>} : vector<16x32xf32>, vector<32x32xf32>, vector<16x32xf32> -> vector<16x32xf32>
    %cst_145 = arith.constant 1.000000e-30 : f32
    %195 = vector.broadcast %cst_145 : f32 to vector<16x32xf32>
    %196 = arith.maximumf %194, %195 : vector<16x32xf32>
    %197 = tpu.reciprocal %196 {approx = true} : vector<16x32xf32> -> vector<16x32xf32>
    %198 = arith.mulf %193, %197 : vector<16x32xf32>
    %cst_146 = arith.constant dense<0.000000e+00> : vector<16x32xf32>
    %199 = tpu.matmul %198, %184, %cst_146 {dimension_numbers = #tpu.dot_dimension_numbers<[1], [0], [0], [1], [0, 0, 1, 1], [], []>} : vector<16x32xf32>, vector<32x32xf32>, vector<16x32xf32> -> vector<16x32xf32>
    %cst_147 = arith.constant 5.000000e-01 : f32
    %200 = vector.broadcast %cst_147 : f32 to vector<16x32xf32>
    %201 = arith.mulf %200, %199 : vector<16x32xf32>
    %cst_148 = arith.constant 0.707106769 : f32
    %202 = vector.broadcast %cst_148 : f32 to vector<16x32xf32>
    %203 = arith.mulf %199, %202 : vector<16x32xf32>
    %204 = math.absf %203 : vector<16x32xf32>
    %cst_149 = arith.constant 0.327591091 : f32
    %205 = vector.broadcast %cst_149 : f32 to vector<16x32xf32>
    %206 = arith.mulf %205, %204 : vector<16x32xf32>
    %cst_150 = arith.constant 1.000000e+00 : f32
    %207 = vector.broadcast %cst_150 : f32 to vector<16x32xf32>
    %208 = arith.addf %207, %206 : vector<16x32xf32>
    %cst_151 = arith.constant 1.000000e+00 : f32
    %209 = vector.broadcast %cst_151 : f32 to vector<16x32xf32>
    %210 = arith.divf %209, %208 : vector<16x32xf32>
    %cst_152 = arith.constant 1.06140542 : f32
    %211 = vector.broadcast %cst_152 : f32 to vector<16x32xf32>
    %212 = arith.mulf %211, %210 : vector<16x32xf32>
    %cst_153 = arith.constant -1.45315206 : f32
    %213 = vector.broadcast %cst_153 : f32 to vector<16x32xf32>
    %214 = arith.addf %212, %213 : vector<16x32xf32>
    %215 = arith.mulf %214, %210 : vector<16x32xf32>
    %cst_154 = arith.constant 1.42141378 : f32
    %216 = vector.broadcast %cst_154 : f32 to vector<16x32xf32>
    %217 = arith.addf %215, %216 : vector<16x32xf32>
    %218 = arith.mulf %217, %210 : vector<16x32xf32>
    %cst_155 = arith.constant -0.284496725 : f32
    %219 = vector.broadcast %cst_155 : f32 to vector<16x32xf32>
    %220 = arith.addf %218, %219 : vector<16x32xf32>
    %221 = arith.mulf %220, %210 : vector<16x32xf32>
    %cst_156 = arith.constant 0.254829586 : f32
    %222 = vector.broadcast %cst_156 : f32 to vector<16x32xf32>
    %223 = arith.addf %221, %222 : vector<16x32xf32>
    %224 = arith.mulf %223, %210 : vector<16x32xf32>
    %cst_157 = arith.constant 0.000000e+00 : f32
    %225 = vector.broadcast %cst_157 : f32 to vector<16x32xf32>
    %226 = arith.subf %225, %204 : vector<16x32xf32>
    %227 = arith.mulf %226, %204 : vector<16x32xf32>
    %228 = math.exp %227 : vector<16x32xf32>
    %229 = arith.mulf %224, %228 : vector<16x32xf32>
    %cst_158 = arith.constant 1.000000e+00 : f32
    %230 = vector.broadcast %cst_158 : f32 to vector<16x32xf32>
    %231 = arith.subf %230, %229 : vector<16x32xf32>
    %cst_159 = arith.constant 0.000000e+00 : f32
    %232 = vector.broadcast %cst_159 : f32 to vector<16x32xf32>
    %233 = arith.cmpf oge, %203, %232 : vector<16x32xf32>
    %cst_160 = arith.constant 0.000000e+00 : f32
    %234 = vector.broadcast %cst_160 : f32 to vector<16x32xf32>
    %235 = arith.subf %234, %231 : vector<16x32xf32>
    %236 = arith.select %233, %231, %235 : vector<16x32xi1>, vector<16x32xf32>
    %cst_161 = arith.constant 1.000000e+00 : f32
    %237 = vector.broadcast %cst_161 : f32 to vector<16x32xf32>
    %238 = arith.addf %237, %236 : vector<16x32xf32>
    %239 = arith.mulf %201, %238 : vector<16x32xf32>
    %c1_162 = arith.constant 1 : index
    %c0_163 = arith.constant 0 : index
    %c0_164 = arith.constant 0 : index
    %240 = vector.load %arg9[%c1_162, %c0_163, %c0_164] : memref<6x32x32xf32, #tpu.memory_space<vmem>>, vector<1x32x32xf32>
    %241 = vector.shape_cast %240 : vector<1x32x32xf32> to vector<32x32xf32>
    %cst_165 = arith.constant dense<0.000000e+00> : vector<16x32xf32>
    %242 = tpu.matmul %239, %241, %cst_165 {dimension_numbers = #tpu.dot_dimension_numbers<[1], [0], [0], [1], [0, 0, 1, 1], [], []>} : vector<16x32xf32>, vector<32x32xf32>, vector<16x32xf32> -> vector<16x32xf32>
    %c1_166 = arith.constant 1 : index
    %c0_167 = arith.constant 0 : index
    %c0_168 = arith.constant 0 : index
    %243 = vector.load %arg10[%c1_166, %c0_167, %c0_168] : memref<6x1x32xf32, #tpu.memory_space<vmem>>, vector<1x1x32xf32>
    %244 = vector.shape_cast %243 : vector<1x1x32xf32> to vector<1x32xf32>
    %245 = vector.broadcast %244 : vector<1x32xf32> to vector<16x32xf32>
    %246 = arith.addf %242, %245 : vector<16x32xf32>
    %cst_169 = arith.constant 0.731058597 : f32
    %247 = vector.broadcast %cst_169 : f32 to vector<16x32xf32>
    %248 = arith.mulf %247, %246 : vector<16x32xf32>
    %cst_170 = arith.constant 0.268941432 : f32
    %249 = vector.broadcast %cst_170 : f32 to vector<16x32xf32>
    %250 = arith.mulf %249, %8 : vector<16x32xf32>
    %251 = arith.addf %248, %250 : vector<16x32xf32>
    %c2 = arith.constant 2 : index
    %c0_171 = arith.constant 0 : index
    %c0_172 = arith.constant 0 : index
    %252 = vector.load %arg3[%c2, %c0_171, %c0_172] : memref<6x32x32xf32, #tpu.memory_space<vmem>>, vector<1x32x32xf32>
    %253 = vector.shape_cast %252 : vector<1x32x32xf32> to vector<32x32xf32>
    %cst_173 = arith.constant dense<0.000000e+00> : vector<16x32xf32>
    %254 = tpu.matmul %9, %253, %cst_173 {dimension_numbers = #tpu.dot_dimension_numbers<[1], [0], [0], [1], [0, 0, 1, 1], [], []>} : vector<16x32xf32>, vector<32x32xf32>, vector<16x32xf32> -> vector<16x32xf32>
    %c2_174 = arith.constant 2 : index
    %c0_175 = arith.constant 0 : index
    %c0_176 = arith.constant 0 : index
    %255 = vector.load %arg4[%c2_174, %c0_175, %c0_176] : memref<6x1x32xf32, #tpu.memory_space<vmem>>, vector<1x1x32xf32>
    %256 = vector.shape_cast %255 : vector<1x1x32xf32> to vector<1x32xf32>
    %257 = vector.broadcast %256 : vector<1x32xf32> to vector<16x32xf32>
    %258 = arith.addf %254, %257 : vector<16x32xf32>
    %c2_177 = arith.constant 2 : index
    %c0_178 = arith.constant 0 : index
    %c0_179 = arith.constant 0 : index
    %259 = vector.load %arg5[%c2_177, %c0_178, %c0_179] : memref<16x32x32xf32, #tpu.memory_space<vmem>>, vector<1x32x32xf32>
    %260 = vector.shape_cast %259 : vector<1x32x32xf32> to vector<32x32xf32>
    %cst_180 = arith.constant dense<0.000000e+00> : vector<16x32xf32>
    %261 = tpu.matmul %7, %260, %cst_180 {dimension_numbers = #tpu.dot_dimension_numbers<[1], [0], [0], [1], [0, 0, 1, 1], [], []>} : vector<16x32xf32>, vector<32x32xf32>, vector<16x32xf32> -> vector<16x32xf32>
    %c2_181 = arith.constant 2 : index
    %c0_182 = arith.constant 0 : index
    %c0_183 = arith.constant 0 : index
    %262 = vector.load %arg6[%c2_181, %c0_182, %c0_183] : memref<16x1x32xf32, #tpu.memory_space<vmem>>, vector<1x1x32xf32>
    %263 = vector.shape_cast %262 : vector<1x1x32xf32> to vector<1x32xf32>
    %264 = vector.broadcast %263 : vector<1x32xf32> to vector<16x32xf32>
    %265 = arith.addf %261, %264 : vector<16x32xf32>
    %c2_184 = arith.constant 2 : index
    %c0_185 = arith.constant 0 : index
    %c0_186 = arith.constant 0 : index
    %266 = vector.load %arg7[%c2_184, %c0_185, %c0_186] : memref<16x32x32xf32, #tpu.memory_space<vmem>>, vector<1x32x32xf32>
    %267 = vector.shape_cast %266 : vector<1x32x32xf32> to vector<32x32xf32>
    %cst_187 = arith.constant dense<0.000000e+00> : vector<16x32xf32>
    %268 = tpu.matmul %7, %267, %cst_187 {dimension_numbers = #tpu.dot_dimension_numbers<[1], [0], [0], [1], [0, 0, 1, 1], [], []>} : vector<16x32xf32>, vector<32x32xf32>, vector<16x32xf32> -> vector<16x32xf32>
    %c2_188 = arith.constant 2 : index
    %c0_189 = arith.constant 0 : index
    %c0_190 = arith.constant 0 : index
    %269 = vector.load %arg8[%c2_188, %c0_189, %c0_190] : memref<16x1x32xf32, #tpu.memory_space<vmem>>, vector<1x1x32xf32>
    %270 = vector.shape_cast %269 : vector<1x1x32xf32> to vector<1x32xf32>
    %271 = vector.broadcast %270 : vector<1x32xf32> to vector<16x32xf32>
    %272 = arith.addf %268, %271 : vector<16x32xf32>
    %c3 = arith.constant 3 : index
    %c0_191 = arith.constant 0 : index
    %c0_192 = arith.constant 0 : index
    %273 = vector.load %arg5[%c3, %c0_191, %c0_192] : memref<16x32x32xf32, #tpu.memory_space<vmem>>, vector<1x32x32xf32>
    %274 = vector.shape_cast %273 : vector<1x32x32xf32> to vector<32x32xf32>
    %cst_193 = arith.constant dense<0.000000e+00> : vector<16x32xf32>
    %275 = tpu.matmul %7, %274, %cst_193 {dimension_numbers = #tpu.dot_dimension_numbers<[1], [0], [0], [1], [0, 0, 1, 1], [], []>} : vector<16x32xf32>, vector<32x32xf32>, vector<16x32xf32> -> vector<16x32xf32>
    %c3_194 = arith.constant 3 : index
    %c0_195 = arith.constant 0 : index
    %c0_196 = arith.constant 0 : index
    %276 = vector.load %arg6[%c3_194, %c0_195, %c0_196] : memref<16x1x32xf32, #tpu.memory_space<vmem>>, vector<1x1x32xf32>
    %277 = vector.shape_cast %276 : vector<1x1x32xf32> to vector<1x32xf32>
    %278 = vector.broadcast %277 : vector<1x32xf32> to vector<16x32xf32>
    %279 = arith.addf %275, %278 : vector<16x32xf32>
    %c3_197 = arith.constant 3 : index
    %c0_198 = arith.constant 0 : index
    %c0_199 = arith.constant 0 : index
    %280 = vector.load %arg7[%c3_197, %c0_198, %c0_199] : memref<16x32x32xf32, #tpu.memory_space<vmem>>, vector<1x32x32xf32>
    %281 = vector.shape_cast %280 : vector<1x32x32xf32> to vector<32x32xf32>
    %cst_200 = arith.constant dense<0.000000e+00> : vector<16x32xf32>
    %282 = tpu.matmul %7, %281, %cst_200 {dimension_numbers = #tpu.dot_dimension_numbers<[1], [0], [0], [1], [0, 0, 1, 1], [], []>} : vector<16x32xf32>, vector<32x32xf32>, vector<16x32xf32> -> vector<16x32xf32>
    %c3_201 = arith.constant 3 : index
    %c0_202 = arith.constant 0 : index
    %c0_203 = arith.constant 0 : index
    %283 = vector.load %arg8[%c3_201, %c0_202, %c0_203] : memref<16x1x32xf32, #tpu.memory_space<vmem>>, vector<1x1x32xf32>
    %284 = vector.shape_cast %283 : vector<1x1x32xf32> to vector<1x32xf32>
    %285 = vector.broadcast %284 : vector<1x32xf32> to vector<16x32xf32>
    %286 = arith.addf %282, %285 : vector<16x32xf32>
    %287 = tpu.concatenate %265, %279 in 0 : vector<16x32xf32>, vector<16x32xf32> -> vector<32x32xf32>
    %288 = tpu.concatenate %272, %286 in 0 : vector<16x32xf32>, vector<16x32xf32> -> vector<32x32xf32>
    %cst_204 = arith.constant dense<0.000000e+00> : vector<16x32xf32>
    %289 = tpu.matmul %258, %287, %cst_204 {dimension_numbers = #tpu.dot_dimension_numbers<[1], [1], [0], [0], [0, 0, 1, 0], [], []>} : vector<16x32xf32>, vector<32x32xf32>, vector<16x32xf32> -> vector<16x32xf32>
    %290 = arith.addf %289, %12 : vector<16x32xf32>
    %cst_205 = arith.constant dense<0xFF800000> : vector<16xf32>
    %291 = vector.multi_reduction <maximumf>, %290, %cst_205 [1] : vector<16x32xf32> to vector<16xf32>
    %292 = vector.shape_cast %291 : vector<16xf32> to vector<16x1xf32>
    %cst_206 = arith.constant -1.000000e+20 : f32
    %293 = vector.broadcast %cst_206 : f32 to vector<16x1xf32>
    %294 = arith.maximumf %292, %293 : vector<16x1xf32>
    %295 = vector.broadcast %294 : vector<16x1xf32> to vector<16x32xf32>
    %296 = arith.subf %290, %295 : vector<16x32xf32>
    %297 = math.exp %296 : vector<16x32xf32>
    %cst_207 = arith.constant dense<0.000000e+00> : vector<16x32xf32>
    %298 = tpu.matmul %297, %15, %cst_207 {dimension_numbers = #tpu.dot_dimension_numbers<[1], [0], [0], [1], [0, 0, 1, 1], [], []>} : vector<16x32xf32>, vector<32x32xf32>, vector<16x32xf32> -> vector<16x32xf32>
    %cst_208 = arith.constant 1.000000e-30 : f32
    %299 = vector.broadcast %cst_208 : f32 to vector<16x32xf32>
    %300 = arith.maximumf %298, %299 : vector<16x32xf32>
    %301 = tpu.reciprocal %300 {approx = true} : vector<16x32xf32> -> vector<16x32xf32>
    %302 = arith.mulf %297, %301 : vector<16x32xf32>
    %cst_209 = arith.constant dense<0.000000e+00> : vector<16x32xf32>
    %303 = tpu.matmul %302, %288, %cst_209 {dimension_numbers = #tpu.dot_dimension_numbers<[1], [0], [0], [1], [0, 0, 1, 1], [], []>} : vector<16x32xf32>, vector<32x32xf32>, vector<16x32xf32> -> vector<16x32xf32>
    %cst_210 = arith.constant 5.000000e-01 : f32
    %304 = vector.broadcast %cst_210 : f32 to vector<16x32xf32>
    %305 = arith.mulf %304, %303 : vector<16x32xf32>
    %cst_211 = arith.constant 0.707106769 : f32
    %306 = vector.broadcast %cst_211 : f32 to vector<16x32xf32>
    %307 = arith.mulf %303, %306 : vector<16x32xf32>
    %308 = math.absf %307 : vector<16x32xf32>
    %cst_212 = arith.constant 0.327591091 : f32
    %309 = vector.broadcast %cst_212 : f32 to vector<16x32xf32>
    %310 = arith.mulf %309, %308 : vector<16x32xf32>
    %cst_213 = arith.constant 1.000000e+00 : f32
    %311 = vector.broadcast %cst_213 : f32 to vector<16x32xf32>
    %312 = arith.addf %311, %310 : vector<16x32xf32>
    %cst_214 = arith.constant 1.000000e+00 : f32
    %313 = vector.broadcast %cst_214 : f32 to vector<16x32xf32>
    %314 = arith.divf %313, %312 : vector<16x32xf32>
    %cst_215 = arith.constant 1.06140542 : f32
    %315 = vector.broadcast %cst_215 : f32 to vector<16x32xf32>
    %316 = arith.mulf %315, %314 : vector<16x32xf32>
    %cst_216 = arith.constant -1.45315206 : f32
    %317 = vector.broadcast %cst_216 : f32 to vector<16x32xf32>
    %318 = arith.addf %316, %317 : vector<16x32xf32>
    %319 = arith.mulf %318, %314 : vector<16x32xf32>
    %cst_217 = arith.constant 1.42141378 : f32
    %320 = vector.broadcast %cst_217 : f32 to vector<16x32xf32>
    %321 = arith.addf %319, %320 : vector<16x32xf32>
    %322 = arith.mulf %321, %314 : vector<16x32xf32>
    %cst_218 = arith.constant -0.284496725 : f32
    %323 = vector.broadcast %cst_218 : f32 to vector<16x32xf32>
    %324 = arith.addf %322, %323 : vector<16x32xf32>
    %325 = arith.mulf %324, %314 : vector<16x32xf32>
    %cst_219 = arith.constant 0.254829586 : f32
    %326 = vector.broadcast %cst_219 : f32 to vector<16x32xf32>
    %327 = arith.addf %325, %326 : vector<16x32xf32>
    %328 = arith.mulf %327, %314 : vector<16x32xf32>
    %cst_220 = arith.constant 0.000000e+00 : f32
    %329 = vector.broadcast %cst_220 : f32 to vector<16x32xf32>
    %330 = arith.subf %329, %308 : vector<16x32xf32>
    %331 = arith.mulf %330, %308 : vector<16x32xf32>
    %332 = math.exp %331 : vector<16x32xf32>
    %333 = arith.mulf %328, %332 : vector<16x32xf32>
    %cst_221 = arith.constant 1.000000e+00 : f32
    %334 = vector.broadcast %cst_221 : f32 to vector<16x32xf32>
    %335 = arith.subf %334, %333 : vector<16x32xf32>
    %cst_222 = arith.constant 0.000000e+00 : f32
    %336 = vector.broadcast %cst_222 : f32 to vector<16x32xf32>
    %337 = arith.cmpf oge, %307, %336 : vector<16x32xf32>
    %cst_223 = arith.constant 0.000000e+00 : f32
    %338 = vector.broadcast %cst_223 : f32 to vector<16x32xf32>
    %339 = arith.subf %338, %335 : vector<16x32xf32>
    %340 = arith.select %337, %335, %339 : vector<16x32xi1>, vector<16x32xf32>
    %cst_224 = arith.constant 1.000000e+00 : f32
    %341 = vector.broadcast %cst_224 : f32 to vector<16x32xf32>
    %342 = arith.addf %341, %340 : vector<16x32xf32>
    %343 = arith.mulf %305, %342 : vector<16x32xf32>
    %c2_225 = arith.constant 2 : index
    %c0_226 = arith.constant 0 : index
    %c0_227 = arith.constant 0 : index
    %344 = vector.load %arg9[%c2_225, %c0_226, %c0_227] : memref<6x32x32xf32, #tpu.memory_space<vmem>>, vector<1x32x32xf32>
    %345 = vector.shape_cast %344 : vector<1x32x32xf32> to vector<32x32xf32>
    %cst_228 = arith.constant dense<0.000000e+00> : vector<16x32xf32>
    %346 = tpu.matmul %343, %345, %cst_228 {dimension_numbers = #tpu.dot_dimension_numbers<[1], [0], [0], [1], [0, 0, 1, 1], [], []>} : vector<16x32xf32>, vector<32x32xf32>, vector<16x32xf32> -> vector<16x32xf32>
    %c2_229 = arith.constant 2 : index
    %c0_230 = arith.constant 0 : index
    %c0_231 = arith.constant 0 : index
    %347 = vector.load %arg10[%c2_229, %c0_230, %c0_231] : memref<6x1x32xf32, #tpu.memory_space<vmem>>, vector<1x1x32xf32>
    %348 = vector.shape_cast %347 : vector<1x1x32xf32> to vector<1x32xf32>
    %349 = vector.broadcast %348 : vector<1x32xf32> to vector<16x32xf32>
    %350 = arith.addf %346, %349 : vector<16x32xf32>
    %cst_232 = arith.constant 0.731058597 : f32
    %351 = vector.broadcast %cst_232 : f32 to vector<16x32xf32>
    %352 = arith.mulf %351, %350 : vector<16x32xf32>
    %cst_233 = arith.constant 0.268941432 : f32
    %353 = vector.broadcast %cst_233 : f32 to vector<16x32xf32>
    %354 = arith.mulf %353, %9 : vector<16x32xf32>
    %355 = arith.addf %352, %354 : vector<16x32xf32>
    %c3_234 = arith.constant 3 : index
    %c0_235 = arith.constant 0 : index
    %c0_236 = arith.constant 0 : index
    %356 = vector.load %arg3[%c3_234, %c0_235, %c0_236] : memref<6x32x32xf32, #tpu.memory_space<vmem>>, vector<1x32x32xf32>
    %357 = vector.shape_cast %356 : vector<1x32x32xf32> to vector<32x32xf32>
    %cst_237 = arith.constant dense<0.000000e+00> : vector<16x32xf32>
    %358 = tpu.matmul %147, %357, %cst_237 {dimension_numbers = #tpu.dot_dimension_numbers<[1], [0], [0], [1], [0, 0, 1, 1], [], []>} : vector<16x32xf32>, vector<32x32xf32>, vector<16x32xf32> -> vector<16x32xf32>
    %c3_238 = arith.constant 3 : index
    %c0_239 = arith.constant 0 : index
    %c0_240 = arith.constant 0 : index
    %359 = vector.load %arg4[%c3_238, %c0_239, %c0_240] : memref<6x1x32xf32, #tpu.memory_space<vmem>>, vector<1x1x32xf32>
    %360 = vector.shape_cast %359 : vector<1x1x32xf32> to vector<1x32xf32>
    %361 = vector.broadcast %360 : vector<1x32xf32> to vector<16x32xf32>
    %362 = arith.addf %358, %361 : vector<16x32xf32>
    %c12 = arith.constant 12 : index
    %c0_241 = arith.constant 0 : index
    %c0_242 = arith.constant 0 : index
    %363 = vector.load %arg5[%c12, %c0_241, %c0_242] : memref<16x32x32xf32, #tpu.memory_space<vmem>>, vector<1x32x32xf32>
    %364 = vector.shape_cast %363 : vector<1x32x32xf32> to vector<32x32xf32>
    %cst_243 = arith.constant dense<0.000000e+00> : vector<16x32xf32>
    %365 = tpu.matmul %251, %364, %cst_243 {dimension_numbers = #tpu.dot_dimension_numbers<[1], [0], [0], [1], [0, 0, 1, 1], [], []>} : vector<16x32xf32>, vector<32x32xf32>, vector<16x32xf32> -> vector<16x32xf32>
    %c12_244 = arith.constant 12 : index
    %c0_245 = arith.constant 0 : index
    %c0_246 = arith.constant 0 : index
    %366 = vector.load %arg6[%c12_244, %c0_245, %c0_246] : memref<16x1x32xf32, #tpu.memory_space<vmem>>, vector<1x1x32xf32>
    %367 = vector.shape_cast %366 : vector<1x1x32xf32> to vector<1x32xf32>
    %368 = vector.broadcast %367 : vector<1x32xf32> to vector<16x32xf32>
    %369 = arith.addf %365, %368 : vector<16x32xf32>
    %c12_247 = arith.constant 12 : index
    %c0_248 = arith.constant 0 : index
    %c0_249 = arith.constant 0 : index
    %370 = vector.load %arg7[%c12_247, %c0_248, %c0_249] : memref<16x32x32xf32, #tpu.memory_space<vmem>>, vector<1x32x32xf32>
    %371 = vector.shape_cast %370 : vector<1x32x32xf32> to vector<32x32xf32>
    %cst_250 = arith.constant dense<0.000000e+00> : vector<16x32xf32>
    %372 = tpu.matmul %251, %371, %cst_250 {dimension_numbers = #tpu.dot_dimension_numbers<[1], [0], [0], [1], [0, 0, 1, 1], [], []>} : vector<16x32xf32>, vector<32x32xf32>, vector<16x32xf32> -> vector<16x32xf32>
    %c12_251 = arith.constant 12 : index
    %c0_252 = arith.constant 0 : index
    %c0_253 = arith.constant 0 : index
    %373 = vector.load %arg8[%c12_251, %c0_252, %c0_253] : memref<16x1x32xf32, #tpu.memory_space<vmem>>, vector<1x1x32xf32>
    %374 = vector.shape_cast %373 : vector<1x1x32xf32> to vector<1x32xf32>
    %375 = vector.broadcast %374 : vector<1x32xf32> to vector<16x32xf32>
    %376 = arith.addf %372, %375 : vector<16x32xf32>
    %c13 = arith.constant 13 : index
    %c0_254 = arith.constant 0 : index
    %c0_255 = arith.constant 0 : index
    %377 = vector.load %arg5[%c13, %c0_254, %c0_255] : memref<16x32x32xf32, #tpu.memory_space<vmem>>, vector<1x32x32xf32>
    %378 = vector.shape_cast %377 : vector<1x32x32xf32> to vector<32x32xf32>
    %cst_256 = arith.constant dense<0.000000e+00> : vector<16x32xf32>
    %379 = tpu.matmul %251, %378, %cst_256 {dimension_numbers = #tpu.dot_dimension_numbers<[1], [0], [0], [1], [0, 0, 1, 1], [], []>} : vector<16x32xf32>, vector<32x32xf32>, vector<16x32xf32> -> vector<16x32xf32>
    %c13_257 = arith.constant 13 : index
    %c0_258 = arith.constant 0 : index
    %c0_259 = arith.constant 0 : index
    %380 = vector.load %arg6[%c13_257, %c0_258, %c0_259] : memref<16x1x32xf32, #tpu.memory_space<vmem>>, vector<1x1x32xf32>
    %381 = vector.shape_cast %380 : vector<1x1x32xf32> to vector<1x32xf32>
    %382 = vector.broadcast %381 : vector<1x32xf32> to vector<16x32xf32>
    %383 = arith.addf %379, %382 : vector<16x32xf32>
    %c13_260 = arith.constant 13 : index
    %c0_261 = arith.constant 0 : index
    %c0_262 = arith.constant 0 : index
    %384 = vector.load %arg7[%c13_260, %c0_261, %c0_262] : memref<16x32x32xf32, #tpu.memory_space<vmem>>, vector<1x32x32xf32>
    %385 = vector.shape_cast %384 : vector<1x32x32xf32> to vector<32x32xf32>
    %cst_263 = arith.constant dense<0.000000e+00> : vector<16x32xf32>
    %386 = tpu.matmul %251, %385, %cst_263 {dimension_numbers = #tpu.dot_dimension_numbers<[1], [0], [0], [1], [0, 0, 1, 1], [], []>} : vector<16x32xf32>, vector<32x32xf32>, vector<16x32xf32> -> vector<16x32xf32>
    %c13_264 = arith.constant 13 : index
    %c0_265 = arith.constant 0 : index
    %c0_266 = arith.constant 0 : index
    %387 = vector.load %arg8[%c13_264, %c0_265, %c0_266] : memref<16x1x32xf32, #tpu.memory_space<vmem>>, vector<1x1x32xf32>
    %388 = vector.shape_cast %387 : vector<1x1x32xf32> to vector<1x32xf32>
    %389 = vector.broadcast %388 : vector<1x32xf32> to vector<16x32xf32>
    %390 = arith.addf %386, %389 : vector<16x32xf32>
    %c14 = arith.constant 14 : index
    %c0_267 = arith.constant 0 : index
    %c0_268 = arith.constant 0 : index
    %391 = vector.load %arg5[%c14, %c0_267, %c0_268] : memref<16x32x32xf32, #tpu.memory_space<vmem>>, vector<1x32x32xf32>
    %392 = vector.shape_cast %391 : vector<1x32x32xf32> to vector<32x32xf32>
    %cst_269 = arith.constant dense<0.000000e+00> : vector<16x32xf32>
    %393 = tpu.matmul %355, %392, %cst_269 {dimension_numbers = #tpu.dot_dimension_numbers<[1], [0], [0], [1], [0, 0, 1, 1], [], []>} : vector<16x32xf32>, vector<32x32xf32>, vector<16x32xf32> -> vector<16x32xf32>
    %c14_270 = arith.constant 14 : index
    %c0_271 = arith.constant 0 : index
    %c0_272 = arith.constant 0 : index
    %394 = vector.load %arg6[%c14_270, %c0_271, %c0_272] : memref<16x1x32xf32, #tpu.memory_space<vmem>>, vector<1x1x32xf32>
    %395 = vector.shape_cast %394 : vector<1x1x32xf32> to vector<1x32xf32>
    %396 = vector.broadcast %395 : vector<1x32xf32> to vector<16x32xf32>
    %397 = arith.addf %393, %396 : vector<16x32xf32>
    %c14_273 = arith.constant 14 : index
    %c0_274 = arith.constant 0 : index
    %c0_275 = arith.constant 0 : index
    %398 = vector.load %arg7[%c14_273, %c0_274, %c0_275] : memref<16x32x32xf32, #tpu.memory_space<vmem>>, vector<1x32x32xf32>
    %399 = vector.shape_cast %398 : vector<1x32x32xf32> to vector<32x32xf32>
    %cst_276 = arith.constant dense<0.000000e+00> : vector<16x32xf32>
    %400 = tpu.matmul %355, %399, %cst_276 {dimension_numbers = #tpu.dot_dimension_numbers<[1], [0], [0], [1], [0, 0, 1, 1], [], []>} : vector<16x32xf32>, vector<32x32xf32>, vector<16x32xf32> -> vector<16x32xf32>
    %c14_277 = arith.constant 14 : index
    %c0_278 = arith.constant 0 : index
    %c0_279 = arith.constant 0 : index
    %401 = vector.load %arg8[%c14_277, %c0_278, %c0_279] : memref<16x1x32xf32, #tpu.memory_space<vmem>>, vector<1x1x32xf32>
    %402 = vector.shape_cast %401 : vector<1x1x32xf32> to vector<1x32xf32>
    %403 = vector.broadcast %402 : vector<1x32xf32> to vector<16x32xf32>
    %404 = arith.addf %400, %403 : vector<16x32xf32>
    %c15 = arith.constant 15 : index
    %c0_280 = arith.constant 0 : index
    %c0_281 = arith.constant 0 : index
    %405 = vector.load %arg5[%c15, %c0_280, %c0_281] : memref<16x32x32xf32, #tpu.memory_space<vmem>>, vector<1x32x32xf32>
    %406 = vector.shape_cast %405 : vector<1x32x32xf32> to vector<32x32xf32>
    %cst_282 = arith.constant dense<0.000000e+00> : vector<16x32xf32>
    %407 = tpu.matmul %355, %406, %cst_282 {dimension_numbers = #tpu.dot_dimension_numbers<[1], [0], [0], [1], [0, 0, 1, 1], [], []>} : vector<16x32xf32>, vector<32x32xf32>, vector<16x32xf32> -> vector<16x32xf32>
    %c15_283 = arith.constant 15 : index
    %c0_284 = arith.constant 0 : index
    %c0_285 = arith.constant 0 : index
    %408 = vector.load %arg6[%c15_283, %c0_284, %c0_285] : memref<16x1x32xf32, #tpu.memory_space<vmem>>, vector<1x1x32xf32>
    %409 = vector.shape_cast %408 : vector<1x1x32xf32> to vector<1x32xf32>
    %410 = vector.broadcast %409 : vector<1x32xf32> to vector<16x32xf32>
    %411 = arith.addf %407, %410 : vector<16x32xf32>
    %c15_286 = arith.constant 15 : index
    %c0_287 = arith.constant 0 : index
    %c0_288 = arith.constant 0 : index
    %412 = vector.load %arg7[%c15_286, %c0_287, %c0_288] : memref<16x32x32xf32, #tpu.memory_space<vmem>>, vector<1x32x32xf32>
    %413 = vector.shape_cast %412 : vector<1x32x32xf32> to vector<32x32xf32>
    %cst_289 = arith.constant dense<0.000000e+00> : vector<16x32xf32>
    %414 = tpu.matmul %355, %413, %cst_289 {dimension_numbers = #tpu.dot_dimension_numbers<[1], [0], [0], [1], [0, 0, 1, 1], [], []>} : vector<16x32xf32>, vector<32x32xf32>, vector<16x32xf32> -> vector<16x32xf32>
    %c15_290 = arith.constant 15 : index
    %c0_291 = arith.constant 0 : index
    %c0_292 = arith.constant 0 : index
    %415 = vector.load %arg8[%c15_290, %c0_291, %c0_292] : memref<16x1x32xf32, #tpu.memory_space<vmem>>, vector<1x1x32xf32>
    %416 = vector.shape_cast %415 : vector<1x1x32xf32> to vector<1x32xf32>
    %417 = vector.broadcast %416 : vector<1x32xf32> to vector<16x32xf32>
    %418 = arith.addf %414, %417 : vector<16x32xf32>
    %419 = tpu.concatenate %369, %383, %397, %411 in 0 : vector<16x32xf32>, vector<16x32xf32>, vector<16x32xf32>, vector<16x32xf32> -> vector<64x32xf32>
    %420 = tpu.concatenate %376, %390, %404, %418 in 0 : vector<16x32xf32>, vector<16x32xf32>, vector<16x32xf32>, vector<16x32xf32> -> vector<64x32xf32>
    %cst_293 = arith.constant dense<0.000000e+00> : vector<16x64xf32>
    %421 = tpu.matmul %362, %419, %cst_293 {dimension_numbers = #tpu.dot_dimension_numbers<[1], [1], [0], [0], [0, 0, 1, 0], [], []>} : vector<16x32xf32>, vector<64x32xf32>, vector<16x64xf32> -> vector<16x64xf32>
    %422 = arith.addf %421, %10 : vector<16x64xf32>
    %cst_294 = arith.constant dense<0xFF800000> : vector<16xf32>
    %423 = vector.multi_reduction <maximumf>, %422, %cst_294 [1] : vector<16x64xf32> to vector<16xf32>
    %424 = vector.shape_cast %423 : vector<16xf32> to vector<16x1xf32>
    %cst_295 = arith.constant -1.000000e+20 : f32
    %425 = vector.broadcast %cst_295 : f32 to vector<16x1xf32>
    %426 = arith.maximumf %424, %425 : vector<16x1xf32>
    %427 = vector.broadcast %426 : vector<16x1xf32> to vector<16x64xf32>
    %428 = arith.subf %422, %427 : vector<16x64xf32>
    %429 = math.exp %428 : vector<16x64xf32>
    %cst_296 = arith.constant dense<0.000000e+00> : vector<16x64xf32>
    %430 = tpu.matmul %429, %13, %cst_296 {dimension_numbers = #tpu.dot_dimension_numbers<[1], [0], [0], [1], [0, 0, 1, 1], [], []>} : vector<16x64xf32>, vector<64x64xf32>, vector<16x64xf32> -> vector<16x64xf32>
    %cst_297 = arith.constant 1.000000e-30 : f32
    %431 = vector.broadcast %cst_297 : f32 to vector<16x64xf32>
    %432 = arith.maximumf %430, %431 : vector<16x64xf32>
    %433 = tpu.reciprocal %432 {approx = true} : vector<16x64xf32> -> vector<16x64xf32>
    %434 = arith.mulf %429, %433 : vector<16x64xf32>
    %cst_298 = arith.constant dense<0.000000e+00> : vector<16x32xf32>
    %435 = tpu.matmul %434, %420, %cst_298 {dimension_numbers = #tpu.dot_dimension_numbers<[1], [0], [0], [1], [0, 0, 1, 1], [], []>} : vector<16x64xf32>, vector<64x32xf32>, vector<16x32xf32> -> vector<16x32xf32>
    %cst_299 = arith.constant 5.000000e-01 : f32
    %436 = vector.broadcast %cst_299 : f32 to vector<16x32xf32>
    %437 = arith.mulf %436, %435 : vector<16x32xf32>
    %cst_300 = arith.constant 0.707106769 : f32
    %438 = vector.broadcast %cst_300 : f32 to vector<16x32xf32>
    %439 = arith.mulf %435, %438 : vector<16x32xf32>
    %440 = math.absf %439 : vector<16x32xf32>
    %cst_301 = arith.constant 0.327591091 : f32
    %441 = vector.broadcast %cst_301 : f32 to vector<16x32xf32>
    %442 = arith.mulf %441, %440 : vector<16x32xf32>
    %cst_302 = arith.constant 1.000000e+00 : f32
    %443 = vector.broadcast %cst_302 : f32 to vector<16x32xf32>
    %444 = arith.addf %443, %442 : vector<16x32xf32>
    %cst_303 = arith.constant 1.000000e+00 : f32
    %445 = vector.broadcast %cst_303 : f32 to vector<16x32xf32>
    %446 = arith.divf %445, %444 : vector<16x32xf32>
    %cst_304 = arith.constant 1.06140542 : f32
    %447 = vector.broadcast %cst_304 : f32 to vector<16x32xf32>
    %448 = arith.mulf %447, %446 : vector<16x32xf32>
    %cst_305 = arith.constant -1.45315206 : f32
    %449 = vector.broadcast %cst_305 : f32 to vector<16x32xf32>
    %450 = arith.addf %448, %449 : vector<16x32xf32>
    %451 = arith.mulf %450, %446 : vector<16x32xf32>
    %cst_306 = arith.constant 1.42141378 : f32
    %452 = vector.broadcast %cst_306 : f32 to vector<16x32xf32>
    %453 = arith.addf %451, %452 : vector<16x32xf32>
    %454 = arith.mulf %453, %446 : vector<16x32xf32>
    %cst_307 = arith.constant -0.284496725 : f32
    %455 = vector.broadcast %cst_307 : f32 to vector<16x32xf32>
    %456 = arith.addf %454, %455 : vector<16x32xf32>
    %457 = arith.mulf %456, %446 : vector<16x32xf32>
    %cst_308 = arith.constant 0.254829586 : f32
    %458 = vector.broadcast %cst_308 : f32 to vector<16x32xf32>
    %459 = arith.addf %457, %458 : vector<16x32xf32>
    %460 = arith.mulf %459, %446 : vector<16x32xf32>
    %cst_309 = arith.constant 0.000000e+00 : f32
    %461 = vector.broadcast %cst_309 : f32 to vector<16x32xf32>
    %462 = arith.subf %461, %440 : vector<16x32xf32>
    %463 = arith.mulf %462, %440 : vector<16x32xf32>
    %464 = math.exp %463 : vector<16x32xf32>
    %465 = arith.mulf %460, %464 : vector<16x32xf32>
    %cst_310 = arith.constant 1.000000e+00 : f32
    %466 = vector.broadcast %cst_310 : f32 to vector<16x32xf32>
    %467 = arith.subf %466, %465 : vector<16x32xf32>
    %cst_311 = arith.constant 0.000000e+00 : f32
    %468 = vector.broadcast %cst_311 : f32 to vector<16x32xf32>
    %469 = arith.cmpf oge, %439, %468 : vector<16x32xf32>
    %cst_312 = arith.constant 0.000000e+00 : f32
    %470 = vector.broadcast %cst_312 : f32 to vector<16x32xf32>
    %471 = arith.subf %470, %467 : vector<16x32xf32>
    %472 = arith.select %469, %467, %471 : vector<16x32xi1>, vector<16x32xf32>
    %cst_313 = arith.constant 1.000000e+00 : f32
    %473 = vector.broadcast %cst_313 : f32 to vector<16x32xf32>
    %474 = arith.addf %473, %472 : vector<16x32xf32>
    %475 = arith.mulf %437, %474 : vector<16x32xf32>
    %c3_314 = arith.constant 3 : index
    %c0_315 = arith.constant 0 : index
    %c0_316 = arith.constant 0 : index
    %476 = vector.load %arg9[%c3_314, %c0_315, %c0_316] : memref<6x32x32xf32, #tpu.memory_space<vmem>>, vector<1x32x32xf32>
    %477 = vector.shape_cast %476 : vector<1x32x32xf32> to vector<32x32xf32>
    %cst_317 = arith.constant dense<0.000000e+00> : vector<16x32xf32>
    %478 = tpu.matmul %475, %477, %cst_317 {dimension_numbers = #tpu.dot_dimension_numbers<[1], [0], [0], [1], [0, 0, 1, 1], [], []>} : vector<16x32xf32>, vector<32x32xf32>, vector<16x32xf32> -> vector<16x32xf32>
    %c3_318 = arith.constant 3 : index
    %c0_319 = arith.constant 0 : index
    %c0_320 = arith.constant 0 : index
    %479 = vector.load %arg10[%c3_318, %c0_319, %c0_320] : memref<6x1x32xf32, #tpu.memory_space<vmem>>, vector<1x1x32xf32>
    %480 = vector.shape_cast %479 : vector<1x1x32xf32> to vector<1x32xf32>
    %481 = vector.broadcast %480 : vector<1x32xf32> to vector<16x32xf32>
    %482 = arith.addf %478, %481 : vector<16x32xf32>
    %cst_321 = arith.constant 0.731058597 : f32
    %483 = vector.broadcast %cst_321 : f32 to vector<16x32xf32>
    %484 = arith.mulf %483, %482 : vector<16x32xf32>
    %cst_322 = arith.constant 0.268941432 : f32
    %485 = vector.broadcast %cst_322 : f32 to vector<16x32xf32>
    %486 = arith.mulf %485, %147 : vector<16x32xf32>
    %487 = arith.addf %484, %486 : vector<16x32xf32>
    %c0_323 = arith.constant 0 : index
    %c0_324 = arith.constant 0 : index
    %488 = vector.load %arg16[%c0_323, %c0_324] : memref<32x128xf32, #tpu.memory_space<vmem>>, vector<32x128xf32>
    %cst_325 = arith.constant dense<0.000000e+00> : vector<16x128xf32>
    %489 = tpu.matmul %487, %488, %cst_325 {dimension_numbers = #tpu.dot_dimension_numbers<[1], [0], [0], [1], [0, 0, 1, 1], [], []>} : vector<16x32xf32>, vector<32x128xf32>, vector<16x128xf32> -> vector<16x128xf32>
    %c0_326 = arith.constant 0 : index
    %c0_327 = arith.constant 0 : index
    %490 = vector.load %arg17[%c0_326, %c0_327] : memref<1x128xf32, #tpu.memory_space<vmem>>, vector<1x128xf32>
    %491 = vector.broadcast %490 : vector<1x128xf32> to vector<16x128xf32>
    %492 = arith.addf %489, %491 : vector<16x128xf32>
    %c0_328 = arith.constant 0 : index
    %c0_329 = arith.constant 0 : index
    %493 = vector.load %arg18[%c0_328, %c0_329] : memref<16x128xf32, #tpu.memory_space<vmem>>, vector<16x128xf32>
    tpu.vector_store %arg18[%c0_328, %c0_329], %492 {strides = array<i32>} : memref<16x128xf32, #tpu.memory_space<vmem>>, vector<16x128xf32>,
    return
  }
}

</mosaic_0001>

<bundles_post_ra>
// kernel: hgt_forward.1
= control target key start
LH: loop header
LB: loop body
LE: loop exit
PB: predicated region body
PF: predicated region fallthrough
CT: control target
= control target key end

     0   :  { %s6825_s0 = inlined_call_operand.hbm [shape: f32[48,96], index: 0, kind: input, shape index: {}]   ;;  %s6826_s1 = inlined_call_operand.vmem [shape: f32[96,32], index: 1, kind: input, shape index: {}]   ;;  %s6827_s2 = inlined_call_operand.vmem [shape: f32[48,32], index: 2, kind: input, shape index: {}]   ;;  %s6828_s3 = inlined_call_operand.vmem [shape: f32[6,32,32], index: 3, kind: input, shape index: {}]   ;;  %s6829_s4 = inlined_call_operand.vmem [shape: f32[6,1,32], index: 4, kind: input, shape index: {}]   ;;  %s6830_s5 = inlined_call_operand.hbm [shape: f32[16,32,32], index: 5, kind: input, shape index: {}]   ;;  %s6831_s6 = inlined_call_operand.hbm [shape: f32[16,1,32], index: 6, kind: input, shape index: {}]   ;;  %s6832_s7 = inlined_call_operand.hbm [shape: f32[16,32,32], index: 7, kind: input, shape index: {}]   ;;  %s6833_s8 = inlined_call_operand.hbm [shape: f32[16,1,32], index: 8, kind: input, shape index: {}]   ;;  %s6834_s9 = inlined_call_operand.hbm [shape: f32[6,32,32], index: 9, kind: input, shape index: {}]   ;;  %s6835_s10 = inlined_call_operand.vmem [shape: f32[6,1,32], index: 10, kind: input, shape index: {}]   ;;  %s6836_s11 = inlined_call_operand.hbm [shape: f32[16,64], index: 11, kind: input, shape index: {}]   ;;  %s6837_s12 = inlined_call_operand.hbm [shape: f32[16,32], index: 12, kind: input, shape index: {}]   ;;  %s6838_s13 = inlined_call_operand.hbm [shape: f32[16,32], index: 13, kind: input, shape index: {}]   ;;  %s6839_s14 = inlined_call_operand.hbm [shape: f32[64,64], index: 14, kind: input, shape index: {}]   ;;  %s6840_s15 = inlined_call_operand.vmem [shape: f32[32,32], index: 15, kind: input, shape index: {}]   ;;  %s6841_s16 = inlined_call_operand.hbm [shape: f32[32,128], index: 16, kind: input, shape index: {}]   ;;  %s6842_s17 = inlined_call_operand.vmem [shape: f32[1,128], index: 17, kind: input, shape index: {}]   ;;  %s6843_s18 = inlined_call_operand.hbm [shape: f32[16,128], index: 18, kind: output, shape index: {}]  }
   0x1   :  { %6846 = sst [smem:[#allocation28_spill]] %s6825_s0 }
   0x2   :  { %6847 = sst [smem:[#allocation29_spill]] %s6826_s1 }
   0x3   :  { %6848 = sst [smem:[#allocation30_spill]] %s6827_s2 }
   0x4   :  { %23 = vsyncpa [#allocation3], 0 }
   0x5   :  { %24 = vsyncpa [#allocation6], 0 }
   0x6   :  { %25 = vsyncpa [#allocation9], 0 }
   0x7   :  { %26 = vsyncpa [#allocation12], 0 }
   0x8   :  { %27 = vsyncpa [#allocation15], 0 }
   0x9   :  { %28 = vsyncpa [#allocation18], 0 }
   0xa   :  { %29 = vsyncpa [#allocation4], 0  ;;  %s6124_s27 = smov [#allocation5]   ;;  %s6125_s29 = smov [#allocation8]  }
   0xb   :  { %s55_s28 = sshll.u32 %s6124_s27, 4  ;;  %s79_s30 = sshll.u32 %s6125_s29, 4  ;;  %s56_s28 = int_to_ptr.vmem [resolvable:$true] %s55_s28  ;;  %s80_s30 = int_to_ptr.vmem [resolvable:$true] %s79_s30 }
   0xc   :  { %s5878_s0 = scalar_lea.vmem %s56_s28, 8192  ;;  %p5883_p1 = scmp.lt.s32.totalorder %s56_s28, %s56_s28 }
   0xd   :  { %p5879_p0 = scmp.ne.s32.totalorder %s56_s28, %s5878_s0  ;;  %p5884_p2 = scmp.lt.s32.totalorder %s5878_s0, %s5878_s0 }
   0xf   :  { %p5885_p3 = por %p5884_p2, %p5883_p1 }
  0x11   :  { %p5886_p4 = pnand %p5885_p3, %p5879_p0 }
  0x13   :  { %5889 = shalt.err (!%p5886_p4)
}
  0x14   :  { %s6126_s19 = smov 128   ;;  %s6127_s1 = smov 8  }
  0x15   :  { %61 = dma.hbm_to_vmem [thread:$0]  %s6830_s5, 8192, %s56_s28, [#allocation6], %s6126_s19, %s6126_s19, %s6127_s1  }
  0x16   :  { %s5898_s22 = scalar_lea.vmem %s80_s30, 8192  ;;  %p5903_p6 = scmp.lt.s32.totalorder %s80_s30, %s80_s30 }
  0x17   :  { %p5899_p5 = scmp.ne.s32.totalorder %s80_s30, %s5898_s22  ;;  %p5904_p7 = scmp.lt.s32.totalorder %s5898_s22, %s5898_s22 }
  0x19   :  { %p5905_p8 = por %p5904_p7, %p5903_p6 }
  0x1b   :  { %p5906_p9 = pnand %p5905_p8, %p5899_p5 }
  0x1d   :  { %5909 = shalt.err (!%p5906_p9)
}
  0x1e   :  { %85 = dma.hbm_to_vmem [thread:$0]  %s6832_s7, 8192, %s80_s30, [#allocation9], %s6126_s19, %s6126_s19, %s6127_s1  }
  0x1f   :  { %s6128_s24 = smov [#allocation11]   ;;  %s6129_s26 = smov [#allocation14]  }
  0x20   :  { %s103_s25 = sshll.u32 %s6128_s24, 4  ;;  %s129_s27 = sshll.u32 %s6129_s26, 4  ;;  %s104_s25 = int_to_ptr.vmem [resolvable:$true] %s103_s25  ;;  %s130_s27 = int_to_ptr.vmem [resolvable:$true] %s129_s27 }
  0x21   :  { %s5918_s5 = scalar_lea.vmem %s104_s25, 3072  ;;  %p5923_p11 = scmp.lt.s32.totalorder %s104_s25, %s104_s25 }
  0x22   :  { %p5919_p10 = scmp.ne.s32.totalorder %s104_s25, %s5918_s5  ;;  %p5924_p12 = scmp.lt.s32.totalorder %s5918_s5, %s5918_s5 }
  0x24   :  { %p5925_p13 = por %p5924_p12, %p5923_p11 }
  0x26   :  { %p5926_p0 = pnand %p5925_p13, %p5919_p10 }
  0x28   :  { %5929 = shalt.err (!%p5926_p0)
}
  0x29   :  { %109 = dma.hbm_to_vmem [thread:$0]  %s6834_s9, 3072, %s104_s25, [#allocation12], %s6126_s19, %s6126_s19, %s6127_s1  }
  0x2a   :  { %s5938_s7 = scalar_lea.vmem %s130_s27, 256  ;;  %p5943_p2 = scmp.lt.s32.totalorder %s130_s27, %s130_s27 }
  0x2b   :  { %p5939_p1 = scmp.ne.s32.totalorder %s130_s27, %s5938_s7  ;;  %p5944_p3 = scmp.lt.s32.totalorder %s5938_s7, %s5938_s7 }
  0x2d   :  { %p5945_p4 = por %p5944_p3, %p5943_p2 }
  0x2f   :  { %p5946_p5 = pnand %p5945_p4, %p5939_p1 }
  0x31   :  { %5949 = shalt.err (!%p5946_p5)
}
  0x32   :  { %135 = dma.hbm_to_vmem [thread:$0]  %s6837_s12, 256, %s130_s27, [#allocation15], %s6126_s19, %s6126_s19, %s6127_s1  }
  0x33   :  { %s6130_s20 = smov [#allocation17]   ;;  %s6131_s22 = smov [#allocation2]  }
  0x34   :  { %s153_s21 = sshll.u32 %s6130_s20, 4  ;;  %s35_s2 = sshll.u32 %s6131_s22, 4  ;;  %s154_s21 = int_to_ptr.vmem [resolvable:$true] %s153_s21  ;;  %s36_s2 = int_to_ptr.vmem [resolvable:$true] %s35_s2 }
  0x35   :  { %s5958_s9 = scalar_lea.vmem %s154_s21, 1024  ;;  %p5963_p7 = scmp.lt.s32.totalorder %s154_s21, %s154_s21 }
  0x36   :  { %p5959_p6 = scmp.ne.s32.totalorder %s154_s21, %s5958_s9  ;;  %p5964_p8 = scmp.lt.s32.totalorder %s5958_s9, %s5958_s9 }
  0x38   :  { %p5965_p9 = por %p5964_p8, %p5963_p7 }
  0x3a   :  { %p5966_p10 = pnand %p5965_p9, %p5959_p6 }
  0x3c   :  { %5969 = shalt.err (!%p5966_p10)
}
  0x3d   :  { %159 = dma.hbm_to_vmem [thread:$0]  %s6839_s14, 1024, %s154_s21, [#allocation18], %s6126_s19, %s6126_s19, %s6127_s1  }
  0x3e   :  { %s5978_s12 = scalar_lea.vmem %s36_s2, 768  ;;  %p5983_p12 = scmp.lt.s32.totalorder %s36_s2, %s36_s2 }
  0x3f   :  { %p5979_p11 = scmp.ne.s32.totalorder %s36_s2, %s5978_s12  ;;  %p5984_p13 = scmp.lt.s32.totalorder %s5978_s12, %s5978_s12 }
  0x41   :  { %p5985_p0 = por %p5984_p13, %p5983_p12 }
  0x43   :  { %p5986_p1 = pnand %p5985_p0, %p5979_p11 }
  0x45   :  { %5989 = shalt.err (!%p5986_p1)
}
  0x46   :  { %s6849_s27 = sld [smem:[#allocation28_spill]]  ;;  %s6132_s5 = smov [#allocation7]  }
  0x47   :  { %s67_s28 = sshll.u32 %s6132_s5, 4  ;;  %s68_s28 = int_to_ptr.vmem [resolvable:$true] %s67_s28 }
  0x48   :  { %s5998_s29 = scalar_lea.vmem %s68_s28, 256  ;;  %p6003_p3 = scmp.lt.s32.totalorder %s68_s28, %s68_s28 }
  0x49   :  { %p5999_p2 = scmp.ne.s32.totalorder %s68_s28, %s5998_s29  ;;  %p6004_p4 = scmp.lt.s32.totalorder %s5998_s29, %s5998_s29 }
  0x4b   :  { %p6005_p5 = por %p6004_p4, %p6003_p3 }
  0x4c   :  { %41 = dma.hbm_to_vmem [thread:$0]  %s6849_s27, 768, %s36_s2, [#allocation3], %s6126_s19, %s6126_s19, %s6127_s1  }
  0x4d   :  { %p6006_p6 = pnand %p6005_p5, %p5999_p2 }
  0x4f   :  { %6009 = shalt.err (!%p6006_p6)
}
  0x50   :  { %s6133_s14 = smov 16   ;;  %s6134_s7 = smov 1  }
  0x51   :  { %73 = dma.hbm_to_vmem [thread:$0]  %s6831_s6, 256, %s68_s28, [#allocation6], %s6133_s14, %s6133_s14, %s6134_s7  }
  0x52   :  { %s6135_s20 = smov [#allocation10]   ;;  %s6136_s22 = smov [#allocation13]  }
  0x53   :  { %s91_s21 = sshll.u32 %s6135_s20, 4  ;;  %s117_s2 = sshll.u32 %s6136_s22, 4  ;;  %s92_s21 = int_to_ptr.vmem [resolvable:$true] %s91_s21  ;;  %s118_s2 = int_to_ptr.vmem [resolvable:$true] %s117_s2 }
  0x54   :  { %s6018_s9 = scalar_lea.vmem %s92_s21, 256  ;;  %p6023_p8 = scmp.lt.s32.totalorder %s92_s21, %s92_s21 }
  0x55   :  { %p6019_p7 = scmp.ne.s32.totalorder %s92_s21, %s6018_s9  ;;  %p6024_p9 = scmp.lt.s32.totalorder %s6018_s9, %s6018_s9 }
  0x57   :  { %p6025_p10 = por %p6024_p9, %p6023_p8 }
  0x59   :  { %p6026_p11 = pnand %p6025_p10, %p6019_p7 }
  0x5b   :  { %6029 = shalt.err (!%p6026_p11)
}
  0x5c   :  { %97 = dma.hbm_to_vmem [thread:$0]  %s6833_s8, 256, %s92_s21, [#allocation9], %s6133_s14, %s6133_s14, %s6134_s7  }
  0x5d   :  { %s6038_s12 = scalar_lea.vmem %s118_s2, 256  ;;  %p6043_p13 = scmp.lt.s32.totalorder %s118_s2, %s118_s2 }
  0x5e   :  { %p6039_p12 = scmp.ne.s32.totalorder %s118_s2, %s6038_s12  ;;  %p6044_p0 = scmp.lt.s32.totalorder %s6038_s12, %s6038_s12 }
  0x60   :  { %p6045_p1 = por %p6044_p0, %p6043_p13 }
  0x62   :  { %p6046_p2 = pnand %p6045_p1, %p6039_p12 }
  0x64   :  { %6049 = shalt.err (!%p6046_p2)
}
  0x65   :  { %123 = dma.hbm_to_vmem [thread:$0]  %s6836_s11, 256, %s118_s2, [#allocation12], %s6126_s19, %s6126_s19, %s6127_s1  }
  0x66   :  { %s6137_s26 = smov [#allocation16]   ;;  %s6138_s5 = smov [#allocation19]  }
  0x67   :  { %s141_s27 = sshll.u32 %s6137_s26, 4  ;;  %s167_s8 = sshll.u32 %s6138_s5, 4  ;;  %s142_s27 = int_to_ptr.vmem [resolvable:$true] %s141_s27  ;;  %s168_s8 = int_to_ptr.vmem [resolvable:$true] %s167_s8 }
  0x68   :  { %s6058_s28 = scalar_lea.vmem %s142_s27, 256  ;;  %p6063_p4 = scmp.lt.s32.totalorder %s142_s27, %s142_s27 }
  0x69   :  { %p6059_p3 = scmp.ne.s32.totalorder %s142_s27, %s6058_s28  ;;  %p6064_p5 = scmp.lt.s32.totalorder %s6058_s28, %s6058_s28 }
  0x6b   :  { %p6065_p6 = por %p6064_p5, %p6063_p4 }
  0x6d   :  { %p6066_p7 = pnand %p6065_p6, %p6059_p3 }
  0x6f   :  { %6069 = shalt.err (!%p6066_p7)
}
  0x70   :  { %147 = dma.hbm_to_vmem [thread:$0]  %s6838_s13, 256, %s142_s27, [#allocation15], %s6126_s19, %s6126_s19, %s6127_s1  }
  0x71   :  { %s6078_s11 = scalar_lea.vmem %s168_s8, 512  ;;  %p6083_p9 = scmp.lt.s32.totalorder %s168_s8, %s168_s8 }
  0x72   :  { %p6079_p8 = scmp.ne.s32.totalorder %s168_s8, %s6078_s11  ;;  %p6084_p10 = scmp.lt.s32.totalorder %s6078_s11, %s6078_s11 }
  0x74   :  { %p6085_p11 = por %p6084_p10, %p6083_p9 }
  0x76   :  { %p6086_p12 = pnand %p6085_p11, %p6079_p8 }
  0x78   :  { %6089 = shalt.err (!%p6086_p12)
}
  0x79   :  { %173 = dma.hbm_to_vmem [thread:$0]  %s6841_s16, 512, %s168_s8, [#allocation18], %s6126_s19, %s6126_s19, %s6127_s1  }
  0x7a   :  { %6110 = dma.done.wait [#allocation3], 768  }
  0x7b   :  { %6111 = vsyncadd [#allocation3], 4294966528 }
  0x7c   :  { %6112 = dma.done.wait [#allocation6], 8448  }
  0x7d   :  { %6113 = vsyncadd [#allocation6], 4294958848 }
  0x7e   :  { %6114 = dma.done.wait [#allocation9], 8448  }
  0x7f   :  { %6115 = vsyncadd [#allocation9], 4294958848 }
  0x80   :  { %6116 = dma.done.wait [#allocation12], 3328  }
  0x81   :  { %6117 = vsyncadd [#allocation12], 4294963968 }
  0x82   :  { %6118 = dma.done.wait [#allocation15], 512  }
  0x83   :  { %6119 = vsyncadd [#allocation15], 4294966784 }
  0x84   :  { %6120 = dma.done.wait [#allocation18], 1536  }
  0x85   :  { %6121 = vsyncadd [#allocation18], 4294965760  ;;  %s6850_s20 = sld [smem:[#allocation29_spill]]  ;;  %vm233_vm0 = vcmask 785408   ;;  %v209_v4 = vld [vmem:[#allocation2] sm:$0xff]  ;;  %v374_v6 = vld [vmem:[%s6828_s3 + $0x18] sm:$0xff] }
  0x86   :  { %5228 = vmatprep.mubr.msk.f32.mxu0 %vm233_vm0, %v209_v4  ;;  %5237 = vmatprep.subr.mxu1 %v374_v6  ;;  %v210_v14 = vld [vmem:[#allocation2 + $0x8] sm:$0xff]  ;;  %v211_v15 = vld [vmem:[#allocation2 + $0x10] sm:$0xff]  ;;  %v212_v16 = vld [vmem:[#allocation2 + $0x18] sm:$0xff]  ;;  %s6851_s25 = sld [smem:[#allocation30_spill]]  ;;  %vm382_vm1 = vcmask 261120   ;;  %vm1285_vm2 = vcmask 523264  }
  0x87   :  { %5238 = vmatpush3.msra.mxu1 %v374_v6  ;;  %v213_v17 = vld [vmem:[#allocation2 + $0x20] sm:$0xff]  ;;  %v214_v18 = vld [vmem:[#allocation2 + $0x28] sm:$0xff]  ;;  %v373_v19 = vld [vmem:[%s6828_s3 + $0x10] sm:$0xff] }
  0x88   :  { %5239 = vmatprep.subr.mxu1 %v373_v19  ;;  %v372_v20 = vld [vmem:[%s6828_s3 + $0x8] sm:$0xff]  ;;  %v738_v21 = vld [vmem:[#allocation8 + $0xb8] sm:$0xff]  ;;  %v371_v22 = vld [vmem:[%s6828_s3] sm:$0xff] }
  0x89   :  { %5240 = vmatpush3.msra.mxu1 %v373_v19  ;;  %v737_v23 = vld [vmem:[#allocation8 + $0xb0] sm:$0xff]  ;;  %v468_v24 = vld [vmem:[#allocation5 + $0x98] sm:$0xff]  ;;  %v735_v26 = vld [vmem:[#allocation8 + $0xa0] sm:$0xff] }
  0x8a   :  { %5241 = vmatprep.subr.mxu1 %v372_v20  ;;  %v736_v25 = vld [vmem:[#allocation8 + $0xa8] sm:$0xff]  ;;  %v920_v27 = vld [vmem:[#allocation8 + $0xd8] sm:$0xff]  ;;  %v467_v42 = vld [vmem:[#allocation5 + $0x90] sm:$0xff] }
  0x8b   :  { %v226_v0 = vld [vmem:[%s6850_s20 + $0x58] sm:$0xff]  ;;  %v225_v1 = vld [vmem:[%s6850_s20 + $0x50] sm:$0xff]  ;;  %v224_v2 = vld [vmem:[%s6850_s20 + $0x48] sm:$0xff]  ;;  %5242 = vmatpush3.msra.mxu1 %v372_v20 }
  0x8c   :  { %5204 = vmatprep.subr.mxu0 %v226_v0  ;;  %v223_v3 = vld [vmem:[%s6850_s20 + $0x40] sm:$0xff]  ;;  %v222_v5 = vld [vmem:[%s6850_s20 + $0x38] sm:$0xff]  ;;  %v221_v7 = vld [vmem:[%s6850_s20 + $0x30] sm:$0xff]  ;;  %5243 = vmatprep.subr.mxu1 %v371_v22 }
  0x8d   :  { %5205 = vmatpush3.msra.mxu0 %v226_v0  ;;  %v220_v8 = vld [vmem:[%s6850_s20 + $0x28] sm:$0xff]  ;;  %v219_v9 = vld [vmem:[%s6850_s20 + $0x20] sm:$0xff]  ;;  %v218_v10 = vld [vmem:[%s6850_s20 + $0x18] sm:$0xff]  ;;  %5244 = vmatpush3.msra.mxu1 %v371_v22 }
  0x8e   :  { %5206 = vmatprep.subr.mxu0 %v225_v1  ;;  %v217_v11 = vld [vmem:[%s6850_s20 + $0x10] sm:$0xff]  ;;  %v216_v12 = vld [vmem:[%s6850_s20 + $0x8] sm:$0xff]  ;;  %v215_v13 = vld [vmem:[%s6850_s20] sm:$0xff]  ;;  %5248 = vmatprep.subr.mxu1 %v468_v24 }
  0x8f   :  { %5207 = vmatpush3.msra.mxu0 %v225_v1  ;;  %v228_v28 = vld [vmem:[%s6851_s25 + $0x8] sm:$0xff]  ;;  %v227_v30 = vld [vmem:[%s6851_s25] sm:$0xff]  ;;  %v230_v33 = vld [vmem:[%s6851_s25 + $0x18] sm:$0xff] }
  0x90   :  { %5208 = vmatprep.subr.mxu0 %v224_v2  ;;  %v229_v36 = vld [vmem:[%s6851_s25 + $0x10] sm:$0xff]  ;;  %v466_v46 = vld [vmem:[#allocation5 + $0x88] sm:$0xff]  ;;  %v231_v50 = vld [vmem:[%s6851_s25 + $0x20] sm:$0xff] }
  0x91   :  { %5209 = vmatpush3.msra.mxu0 %v224_v2  ;;  %v465_v47 = vld [vmem:[#allocation5 + $0x80] sm:$0xff]  ;;  %v562_v51 = vld [vmem:[#allocation8 + $0x98] sm:$0xff]  ;;  %v232_v54 = vld [vmem:[%s6851_s25 + $0x28] sm:$0xff] }
  0x92   :  { %5210 = vmatprep.subr.mxu0 %v223_v3  ;;  %v919_v48 = vld [vmem:[#allocation8 + $0xd0] sm:$0xff]  ;;  %v918_v55 = vld [vmem:[#allocation8 + $0xc8] sm:$0xff]  ;;  %v917_v57 = vld [vmem:[#allocation8 + $0xc0] sm:$0xff] }
  0x93   :  { %5211 = vmatpush3.msra.mxu0 %v223_v3  ;;  %v561_v52 = vld [vmem:[#allocation8 + $0x90] sm:$0xff]  ;;  %v560_v56 = vld [vmem:[#allocation8 + $0x88] sm:$0xff]  ;;  %v559_v59 = vld [vmem:[#allocation8 + $0x80] sm:$0xff] }
  0x94   :  { %5212 = vmatprep.subr.mxu0 %v222_v5  ;;  %v650_v61 = vld [vmem:[#allocation5 + $0xb8] sm:$0xff]  ;;  %v649_v63 = vld [vmem:[#allocation5 + $0xb0] sm:$0xff]  ;;  %v1096_v0 = vld [vmem:[#allocation8 + $0xf8] sm:$0xff] }
  0x95   :  { %5213 = vmatpush3.msra.mxu0 %v222_v5  ;;  %v648_v1 = vld [vmem:[#allocation5 + $0xa8] sm:$0xff]  ;;  %v1095_v2 = vld [vmem:[#allocation8 + $0xf0] sm:$0xff]  ;;  %v1094_v4 = vld [vmem:[#allocation8 + $0xe8] sm:$0xff] }
  0x96   :  { %5214 = vmatprep.subr.mxu0 %v221_v7  ;;  %v647_v3 = vld [vmem:[#allocation5 + $0xa0] sm:$0xff]  ;;  %v826_v5 = vld [vmem:[#allocation5 + $0xd8] sm:$0xff]  ;;  %v825_v6 = vld [vmem:[#allocation5 + $0xd0] sm:$0xff] }
  0x97   :  { %5215 = vmatpush3.msra.mxu0 %v221_v7  ;;  %v1093_v7 = vld [vmem:[#allocation8 + $0xe0] sm:$0xff]  ;;  %v361_v19 = vld [vmem:[#allocation17 + $0x10] sm:$0xff]  ;;  %v360_v20 = vld [vmem:[#allocation17 + $0x8] sm:$0xff] }
  0x98   :  { %5216 = vmatprep.subr.mxu0 %v220_v8  ;;  %v4727_v22 = vld [vmem:[%s6829_s4] ss:$0 sm:$0xff] }
  0x99   :  { %5217 = vmatpush3.msra.mxu0 %v220_v8  ;;  %v824_v8 = vld [vmem:[#allocation5 + $0xc8] sm:$0xff] }
  0x9a   :  { %5218 = vmatprep.subr.mxu0 %v219_v9 }
  0x9b   :  { %5219 = vmatpush3.msra.mxu0 %v219_v9  ;;  %v823_v9 = vld [vmem:[#allocation5 + $0xc0] sm:$0xff] }
  0x9c   :  { %5220 = vmatprep.subr.mxu0 %v218_v10 }
  0x9d   :  { %5221 = vmatpush3.msra.mxu0 %v218_v10  ;;  %v1008_v10 = vld [vmem:[#allocation5 + $0xf8] sm:$0xff] }
  0x9e   :  { %5222 = vmatprep.subr.mxu0 %v217_v11 }
  0x9f   :  { %5223 = vmatpush3.msra.mxu0 %v217_v11  ;;  %v1007_v11 = vld [vmem:[#allocation5 + $0xf0] sm:$0xff] }
  0xa0   :  { %5224 = vmatprep.subr.mxu0 %v216_v12 }
  0xa1   :  { %5225 = vmatpush3.msra.mxu0 %v216_v12  ;;  %v1006_v12 = vld [vmem:[#allocation5 + $0xe8] sm:$0xff] }
  0xa2   :  { %5226 = vmatprep.subr.mxu0 %v215_v13 }
  0xa3   :  { %5227 = vmatpush3.msra.mxu0 %v215_v13  ;;  %v1005_v13 = vld [vmem:[#allocation5 + $0xe0] sm:$0xff] }
  0xa4   :  { %5229 = vmatmul.mubr.msk.f32.vlgmr.msra.gmra.mxu0 %vm233_vm0, %v210_v14  ;;  %5281 = vmatprep.subr.mxu0 %v738_v21  ;;  %v366_v14 = vld [vmem:[#allocation17 + $0x38] sm:$0xff] }
  0xa5   :  { %5231 = vmatprep.mubr.msk.f32.mxu0 %vm233_vm0, %v211_v15  ;;  %5282 = vmatpush3.msra.mxu0 %v738_v21  ;;  %v365_v15 = vld [vmem:[#allocation17 + $0x30] sm:$0xff]  ;;  %v359_v21 = vld [vmem:[#allocation17] sm:$0xff] }
  0xa6   :  { %5283 = vmatprep.subr.mxu0 %v737_v23 }
  0xa7   :  { %5284 = vmatpush3.msra.mxu0 %v737_v23 }
  0xa8   :  { %5232 = vmatmul.mubr.msk.f32.gmra.mxu0 %vm233_vm0, %v212_v16  ;;  %5285 = vmatprep.subr.mxu0 %v736_v25  ;;  %v364_v16 = vld [vmem:[#allocation17 + $0x28] sm:$0xff] }
  0xa9   :  { %5234 = vmatprep.mubr.msk.f32.mxu0 %vm233_vm0, %v213_v17  ;;  %5286 = vmatpush3.msra.mxu0 %v736_v25  ;;  %v363_v17 = vld [vmem:[#allocation17 + $0x20] sm:$0xff] }
  0xaa   :  { %5287 = vmatprep.subr.mxu0 %v735_v26 }
  0xab   :  { %5288 = vmatpush3.msra.mxu0 %v735_v26 }
  0xac   :  { %5235 = vmatmul.mubr.msk.f32.gmra.mxu0 %vm233_vm0, %v214_v18  ;;  %5303 = vmatprep.subr.mxu0 %v920_v27  ;;  %v362_v18 = vld [vmem:[#allocation17 + $0x18] sm:$0xff] }
 0x164   :  { %v5230_v29 = vpop.f32.mrf.mxu0 }
 0x165   :  { %v324_v31 = vadd.f32 %v5230_v29, %v228_v28 }
 0x166   :  { %v318_v32 = vpop.f32.mrf.mxu0 }
 0x167   :  { %v319_v34 = vadd.f32 %v318_v32, %v227_v30  ;;  %v6363_v39 = vmax.f32 %v324_v31, 0.0 }
 0x168   :  { %v5233_v35 = vpop.f32.mrf.mxu0 }
 0x169   :  { %v6361_v37 = vmax.f32 %v319_v34, 0.0  ;;  %v334_v38 = vadd.f32 %v5233_v35, %v230_v33  ;;  %v6431_v35 = vld [vmem:[#allocation10 + $0x7] ss:$0 sm:$0xff] }
 0x16a   :  { %v328_v40 = vpop.f32.mrf.mxu0 }
 0x16b   :  { %v329_v41 = vadd.f32 %v328_v40, %v229_v36  ;;  %5245 = vmatprep.mubr.msk.f32.mxu1 %vm382_vm1, %v6361_v37  ;;  %v6367_v43 = vmax.f32 %v334_v38, 0.0 }
 0x16c   :  { %5246 = vmatmul.mubr.msk.f32.vlgmr.msra.gmra.mxu1 %vm382_vm1, %v6363_v39  ;;  %v5236_v44 = vpop.f32.mrf.mxu0 }
 0x16d   :  { %v6371_v45 = vmax.f32 %v329_v41, 0.0  ;;  %5249 = vmatpush3.msra.mxu1 %v468_v24  ;;  %v344_v58 = vadd.f32 %v5236_v44, %v232_v54  ;;  %v4736_v54 = vld [vmem:[#allocation7 + $0x5] ss:$0 sm:$0xff] }
 0x16e   :  { %5250 = vmatprep.subr.mxu1 %v467_v42  ;;  %v338_v49 = vpop.f32.mrf.mxu0 }
 0x16f   :  { %5251 = vmatpush3.msra.mxu1 %v467_v42  ;;  %5289 = vmatprep.mubr.msk.f32.mxu0 %vm382_vm1, %v6371_v45  ;;  %v339_v53 = vadd.f32 %v338_v49, %v231_v50  ;;  %v6391_v62 = vmax.f32 %v344_v58, 0.0 }
 0x170   :  { %5252 = vmatprep.subr.mxu1 %v466_v46  ;;  %5290 = vmatmul.mubr.msk.f32.vlgmr.msra.gmra.mxu0 %vm382_vm1, %v6367_v43 }
 0x171   :  { %5253 = vmatpush3.msra.mxu1 %v466_v46  ;;  %5256 = vmatprep.mubr.msk.f32.mxu1 %vm382_vm1, %v6371_v45  ;;  %v6389_v60 = vmax.f32 %v339_v53, 0.0  ;;  %v4748_v46 = vld [vmem:[#allocation7 + $0x7] ss:$0 sm:$0xff] }
 0x172   :  { %5254 = vmatprep.subr.mxu1 %v465_v47  ;;  %5304 = vmatpush3.msra.mxu0 %v920_v27 }
 0x173   :  { %5255 = vmatpush3.msra.mxu1 %v465_v47  ;;  %5305 = vmatprep.subr.mxu0 %v919_v48 }
 0x174   :  { %5257 = vmatmul.mubr.msk.f32.vlgmr.msra.gmra.mxu1 %vm382_vm1, %v6367_v43  ;;  %5259 = vmatprep.subr.mxu1 %v562_v51 }
 0x175   :  { %5260 = vmatpush3.msra.mxu1 %v562_v51  ;;  %5267 = vmatprep.mubr.msk.f32.mxu1 %vm382_vm1, %v6371_v45  ;;  %v4742_v51 = vld [vmem:[#allocation7 + $0x6] ss:$0 sm:$0xff] }
 0x176   :  { %5261 = vmatprep.subr.mxu1 %v561_v52  ;;  %5306 = vmatpush3.msra.mxu0 %v919_v48 }
 0x177   :  { %5262 = vmatpush3.msra.mxu1 %v561_v52  ;;  %5307 = vmatprep.subr.mxu0 %v918_v55 }
 0x178   :  { %5263 = vmatprep.subr.mxu1 %v560_v56  ;;  %5308 = vmatpush3.msra.mxu0 %v918_v55 }
 0x179   :  { %5264 = vmatpush3.msra.mxu1 %v560_v56  ;;  %5309 = vmatprep.subr.mxu0 %v917_v57 }
 0x17a   :  { %5265 = vmatprep.subr.mxu1 %v559_v59  ;;  %5310 = vmatpush3.msra.mxu0 %v917_v57  ;;  %v4730_v57 = vld [vmem:[#allocation7 + $0x4] ss:$0 sm:$0xff] }
 0x17b   :  { %5266 = vmatpush3.msra.mxu1 %v559_v59  ;;  %5311 = vmatprep.mubr.msk.f32.mxu0 %vm382_vm1, %v6389_v60 }
 0x17c   :  { %5268 = vmatmul.mubr.msk.f32.vlgmr.msra.gmra.mxu1 %vm382_vm1, %v6367_v43  ;;  %5270 = vmatprep.subr.mxu1 %v650_v61 }
 0x17d   :  { %5271 = vmatpush3.msra.mxu1 %v650_v61  ;;  %5278 = vmatprep.mubr.msk.f32.mxu1 %vm382_vm1, %v6371_v45 }
 0x17e   :  { %5272 = vmatprep.subr.mxu1 %v649_v63  ;;  %5325 = vmatprep.subr.mxu0 %v1096_v0 }
 0x17f   :  { %5273 = vmatpush3.msra.mxu1 %v649_v63  ;;  %5312 = vmatmul.mubr.msk.f32.vlgmr.msra.gmra.mxu0 %vm382_vm1, %v6391_v62  ;;  %v353_v63 = vld [vmem:[#allocation13] sm:$0xff] }
 0x180   :  { %5274 = vmatprep.subr.mxu1 %v648_v1  ;;  %5326 = vmatpush3.msra.mxu0 %v1096_v0  ;;  %v354_v0 = vld [vmem:[#allocation13 + $0x8] sm:$0xff] }
 0x181   :  { %5275 = vmatpush3.msra.mxu1 %v648_v1  ;;  %5327 = vmatprep.subr.mxu0 %v1095_v2 }
 0x182   :  { %5276 = vmatprep.subr.mxu1 %v647_v3  ;;  %5328 = vmatpush3.msra.mxu0 %v1095_v2 }
 0x183   :  { %5277 = vmatpush3.msra.mxu1 %v647_v3  ;;  %5329 = vmatprep.subr.mxu0 %v1094_v4 }
 0x184   :  { %5279 = vmatmul.mubr.msk.f32.vlgmr.msra.gmra.mxu1 %vm382_vm1, %v6367_v43  ;;  %5292 = vmatprep.subr.mxu1 %v826_v5 }
 0x185   :  { %5293 = vmatpush3.msra.mxu1 %v826_v5  ;;  %5330 = vmatpush3.msra.mxu0 %v1094_v4 }
 0x186   :  { %5294 = vmatprep.subr.mxu1 %v825_v6  ;;  %5331 = vmatprep.subr.mxu0 %v1093_v7 }
 0x187   :  { %5295 = vmatpush3.msra.mxu1 %v825_v6  ;;  %5332 = vmatpush3.msra.mxu0 %v1093_v7 }
 0x188   :  { %5333 = vmatprep.mubr.msk.f32.mxu0 %vm382_vm1, %v6389_v60  ;;  %5296 = vmatprep.subr.mxu1 %v824_v8 }
 0x189   :  { %5334 = vmatmul.mubr.msk.f32.vlgmr.msra.gmra.mxu0 %vm382_vm1, %v6391_v62  ;;  %5297 = vmatpush3.msra.mxu1 %v824_v8 }
 0x18a   :  { %5298 = vmatprep.subr.mxu1 %v823_v9  ;;  %5300 = vmatprep.mubr.msk.f32.mxu1 %vm382_vm1, %v6389_v60 }
 0x18b   :  { %5299 = vmatpush3.msra.mxu1 %v823_v9  ;;  %5355 = vmatprep.subr.mxu0 %v366_v14 }
 0x18c   :  { %5301 = vmatmul.mubr.msk.f32.vlgmr.msra.gmra.mxu1 %vm382_vm1, %v6391_v62  ;;  %5314 = vmatprep.subr.mxu1 %v1008_v10 }
 0x18d   :  { %5315 = vmatpush3.msra.mxu1 %v1008_v10  ;;  %5322 = vmatprep.mubr.msk.f32.mxu1 %vm382_vm1, %v6389_v60 }
 0x18e   :  { %5316 = vmatprep.subr.mxu1 %v1007_v11  ;;  %5356 = vmatpush3.msra.mxu0 %v366_v14 }
 0x18f   :  { %5317 = vmatpush3.msra.mxu1 %v1007_v11  ;;  %5357 = vmatprep.subr.mxu0 %v365_v15 }
 0x190   :  { %5318 = vmatprep.subr.mxu1 %v1006_v12  ;;  %5358 = vmatpush3.msra.mxu0 %v365_v15 }
 0x191   :  { %5319 = vmatpush3.msra.mxu1 %v1006_v12  ;;  %5359 = vmatprep.subr.mxu0 %v364_v16 }
 0x192   :  { %5320 = vmatprep.subr.mxu1 %v1005_v13  ;;  %5360 = vmatpush3.msra.mxu0 %v364_v16 }
 0x193   :  { %5321 = vmatpush3.msra.mxu1 %v1005_v13  ;;  %5361 = vmatprep.subr.mxu0 %v363_v17 }
 0x194   :  { %5323 = vmatmul.mubr.msk.f32.vlgmr.msra.gmra.mxu1 %vm382_vm1, %v6391_v62  ;;  %5362 = vmatpush3.msra.mxu0 %v363_v17  ;;  %v4745_v17 = vld [vmem:[#allocation10 + $0x6] ss:$0 sm:$0xff] }
 0x195   :  { %5363 = vmatprep.subr.mxu0 %v362_v18 }
 0x196   :  { %5364 = vmatpush3.msra.mxu0 %v362_v18 }
 0x197   :  { %5365 = vmatprep.subr.mxu0 %v361_v19 }
 0x198   :  { %5366 = vmatpush3.msra.mxu0 %v361_v19 }
 0x199   :  { %5367 = vmatprep.subr.mxu0 %v360_v20 }
 0x19a   :  { %5368 = vmatpush3.msra.mxu0 %v360_v20  ;;  %v4739_v20 = vld [vmem:[#allocation10 + $0x5] ss:$0 sm:$0xff] }
 0x19b   :  { %5369 = vmatprep.subr.mxu0 %v359_v21 }
 0x19c   :  { %5370 = vmatpush3.msra.mxu0 %v359_v21 }
 0x22c   :  { %v5247_v23 = vpop.f32.mrf.mxu1 }
 0x22d   :  { %v461_v24 = vadd.f32 %v5247_v23, %v4727_v22  ;;  %v4733_v23 = vld [vmem:[#allocation10 + $0x4] ss:$0 sm:$0xff] }
 0x22e   :  { %v455_v25 = vpop.f32.mrf.mxu1 }
 0x22f   :  { %v456_v26 = vadd.f32 %v4727_v22, %v455_v25 }
 0x230   :  { %v6419_v27 = vpop.f32.mrf.mxu0 }
 0x231   :  { %5352 = vmatprep.mubr.msk.f32.mxu1 %vm382_vm1, %v456_v26  ;;  %v819_v22 = vadd.f32 %v6419_v27, %v4739_v20  ;;  %v4774_v27 = vld [vmem:[%s6828_s3 + $0x38] sm:$0xff] }
 0x232   :  { %v6421_v29 = vpop.f32.mrf.mxu0 }
 0x234   :  { %v5258_v28 = vpop.f32.mrf.mxu1 }
 0x235   :  { %v555_v58 = vadd.f32 %v5258_v28, %v4730_v57 }
 0x236   :  { %v549_v30 = vpop.f32.mrf.mxu1 }
 0x237   :  { %v550_v59 = vadd.f32 %v4730_v57, %v549_v30  ;;  %v1523_v57 = vld [vmem:[#allocation11 + $0x8] sm:$0xff] }
 0x23c   :  { %v6425_v32 = vpop.f32.mrf.mxu1 }
 0x23d   :  { %v643_v25 = vadd.f32 %v6425_v32, %v4733_v23 }
 0x23e   :  { %v6429_v34 = vpop.f32.mrf.mxu1 }
 0x23f   :  { %v6423_v31 = vpop.f32.mrf.mxu0  ;;  %v638_v26 = vadd.f32 %v4733_v23, %v6429_v34  ;;  %v4773_v34 = vld [vmem:[%s6828_s3 + $0x30] sm:$0xff] }
 0x240   :  { %v1001_v19 = vadd.f32 %v6423_v31, %v4745_v17 }
 0x241   :  { %v6427_v33 = vpop.f32.mrf.mxu0 }
 0x242   :  { %v996_v21 = vadd.f32 %v4745_v17, %v6427_v33 }
 0x244   :  { %v5280_v36 = vpop.f32.mrf.mxu1 }
 0x245   :  { %v731_v55 = vadd.f32 %v5280_v36, %v4736_v54 }
 0x246   :  { %v725_v41 = vpop.f32.mrf.mxu1 }
 0x247   :  { %v726_v56 = vadd.f32 %v4736_v54, %v725_v41  ;;  %v1797_v41 = vld [vmem:[#allocation8 + $0x18] sm:$0xff]  ;;  %v6516_v54 = vld [vmem:[%s6840_s15] sm:$0xff] }
 0x249   :  { %v5335_v38 = vpop.f32.mrf.mxu0 }
 0x24a   :  { %v6434_v40 = vadd.f32 %v5335_v38, %v6431_v35  ;;  %v4772_v38 = vld [vmem:[%s6828_s3 + $0x28] sm:$0xff] }
 0x24b   :  { %v1171_v15 = vpop.f32.mrf.mxu0 }
 0x24c   :  { %5374 = vmatprep.subr.mxu0 %v6434_v40  ;;  %v5302_v42 = vpop.f32.mrf.mxu1  ;;  %v1172_v18 = vadd.f32 %v6431_v35, %v1171_v15 }
 0x24d   :  { %v913_v52 = vadd.f32 %v5302_v42, %v4742_v51  ;;  %v1796_v42 = vld [vmem:[#allocation8 + $0x10] sm:$0xff] }
 0x24e   :  { %v907_v44 = vpop.f32.mrf.mxu1 }
 0x24f   :  { %v908_v53 = vadd.f32 %v4742_v51, %v907_v44  ;;  %v1795_v44 = vld [vmem:[#allocation8 + $0x8] sm:$0xff]  ;;  %v6495_v51 = vld [vmem:[%s6840_s15 + $0x18] sm:$0xff] }
 0x254   :  { %v5324_v47 = vpop.f32.mrf.mxu1 }
 0x255   :  { %v1089_v48 = vadd.f32 %v5324_v47, %v4748_v46  ;;  %v1972_v47 = vld [vmem:[#allocation8 + $0x38] sm:$0xff] }
 0x256   :  { %v1083_v49 = vpop.f32.mrf.mxu1 }
 0x257   :  { %v1084_v50 = vadd.f32 %v4748_v46, %v1083_v49  ;;  %5336 = vmatprep.subr.msk.mxu1 %vm382_vm1, %v1089_v48  ;;  %v1794_v46 = vld [vmem:[#allocation8] sm:$0xff]  ;;  %v1970_v49 = vld [vmem:[#allocation8 + $0x28] sm:$0xff] }
 0x258   :  { %5337 = vmatpush3.xpose.msk.msra.mxu1 %vm382_vm1, %v1089_v48  ;;  %v1971_v48 = vld [vmem:[#allocation8 + $0x30] sm:$0xff] }
 0x259   :  { %5338 = vmatprep.subr.msk.mxu1 %vm382_vm1, %v1084_v50 }
 0x25c   :  { %5339 = vmatpush3.xpose.msk.msra.mxu1 %vm382_vm1, %v1084_v50  ;;  %v1969_v50 = vld [vmem:[#allocation8 + $0x20] sm:$0xff] }
 0x25d   :  { %5340 = vmatprep.subr.msk.mxu1 %vm382_vm1, %v913_v52 }
 0x260   :  { %5341 = vmatpush3.xpose.msk.msra.mxu1 %vm382_vm1, %v913_v52  ;;  %v6502_v52 = vld [vmem:[%s6840_s15 + $0x10] sm:$0xff] }
 0x261   :  { %5342 = vmatprep.subr.msk.mxu1 %vm382_vm1, %v908_v53 }
 0x264   :  { %5343 = vmatpush3.xpose.msk.msra.mxu1 %vm382_vm1, %v908_v53  ;;  %v6509_v53 = vld [vmem:[%s6840_s15 + $0x8] sm:$0xff] }
 0x265   :  { %5344 = vmatprep.subr.msk.mxu1 %vm382_vm1, %v731_v55 }
 0x268   :  { %5345 = vmatpush3.xpose.msk.msra.mxu1 %vm382_vm1, %v731_v55  ;;  %v1525_v55 = vld [vmem:[#allocation11 + $0x18] sm:$0xff] }
 0x269   :  { %5346 = vmatprep.subr.msk.mxu1 %vm382_vm1, %v726_v56 }
 0x26c   :  { %5347 = vmatpush3.xpose.msk.msra.mxu1 %vm382_vm1, %v726_v56  ;;  %v1524_v56 = vld [vmem:[#allocation11 + $0x10] sm:$0xff] }
 0x26d   :  { %5348 = vmatprep.subr.msk.mxu1 %vm382_vm1, %v555_v58 }
 0x270   :  { %5349 = vmatpush3.xpose.msk.msra.mxu1 %vm382_vm1, %v555_v58  ;;  %v1522_v58 = vld [vmem:[#allocation11] sm:$0xff] }
 0x271   :  { %5350 = vmatprep.subr.msk.mxu1 %vm382_vm1, %v550_v59 }
 0x274   :  { %5351 = vmatpush3.xpose.msk.msra.mxu1 %vm382_vm1, %v550_v59  ;;  %v6520_v59 = vld [vmem:[#allocation5 + $0x18] sm:$0xff] }
 0x275   :  { %5393 = vmatprep.subr.mxu1 %v1525_v55 }
 0x277   :  { %5353 = vmatmul.mubr.msk.f32.vlgmr.msra.gmra.mxu1 %vm382_vm1, %v461_v24  ;;  %v814_v24 = vadd.f32 %v4739_v20, %v6421_v29 }
 0x278   :  { %5394 = vmatpush3.msra.mxu1 %v1525_v55 }
 0x279   :  { %5395 = vmatprep.subr.mxu1 %v1524_v56 }
 0x27a   :  { %5396 = vmatpush3.msra.mxu1 %v1524_v56 }
 0x27b   :  { %5397 = vmatprep.subr.mxu1 %v1523_v57 }
 0x27c   :  { %5398 = vmatpush3.msra.mxu1 %v1523_v57 }
 0x27d   :  { %5399 = vmatprep.subr.mxu1 %v1522_v58 }
 0x27e   :  { %5400 = vmatpush3.msra.mxu1 %v1522_v58 }
 0x27f   :  { %5415 = vmatprep.subr.mxu1 %v6520_v59 }
 0x337   :  { %v5354_v61 = vpop.f32.mrf.mxu1 }
 0x338   :  { %v1282_v3 = vadd.f32 %v5354_v61, %v354_v0 }
 0x339   :  { %v1276_v1 = vpop.f32.mrf.mxu1 }
 0x33a   :  { %v1277_v2 = vadd.f32 %v1276_v1, %v353_v63  ;;  %v1289_v5 = vsel %vm1285_vm2, %v1282_v3, -inf }
 0x33c   :  { %v1286_v4 = vsel %vm1285_vm2, %v1277_v2, -inf }
 0x33d   :  { %1287 = vmax.xlane.f32.xlu0 %v1286_v4 }
 0x341   :  { %1290 = vmax.xlane.f32.xlu0 %v1289_v5 }
 0x3c6   :  { %v1288_v6 = vpop.xlane.xlu0 %1287 }
 0x3c7   :  { %v1292_v7 = vmax.f32 %v1288_v6, -1e+20 }
 0x3c9   :  { %v1294_v8 = vsub.f32 %v1277_v2, %v1292_v7  ;;  %v6529_v7 = vld [vmem:[%s6829_s4 + $0x1] ss:$0 sm:$0xff] }
 0x3ca   :  { %v1291_v9 = vpop.xlane.xlu0 %1290 }
 0x3cb   :  { %v1296_v10 = vmul.f32 1.442695, %v1294_v8  ;;  %v1293_v11 = vmax.f32 %v1291_v9, -1e+20 }
 0x3cd   :  { %5796 = vpow2.f32 %v1296_v10  ;;  %v1295_v12 = vsub.f32 %v1282_v3, %v1293_v11 }
 0x3cf   :  { %v1298_v13 = vmul.f32 1.442695, %v1295_v12 }
 0x3d1   :  { %5798 = vpow2.f32 %v1298_v13 }
 0x3da   :  { %v5797_v14 = vpop.eup %5796 }
 0x3db   :  { %5371 = vmatprep.mubr.msk.f32.mxu0 %vm1285_vm2, %v5797_v14 }
 0x3de   :  { %v5799_v16 = vpop.eup %5798 }
 0x3df   :  { %5372 = vmatmul.mubr.msk.f32.vlgmr.msra.gmra.mxu0 %vm1285_vm2, %v5799_v16 }
 0x3e0   :  { %5375 = vmatpush3.msra.mxu0 %v6434_v40  ;;  %v4771_v40 = vld [vmem:[%s6828_s3 + $0x20] sm:$0xff] }
 0x3e1   :  { %5376 = vmatprep.subr.mxu0 %v1172_v18 }
 0x3e2   :  { %5377 = vmatpush3.msra.mxu0 %v1172_v18 }
 0x3e3   :  { %5378 = vmatprep.subr.mxu0 %v1001_v19 }
 0x3e4   :  { %5379 = vmatpush3.msra.mxu0 %v1001_v19  ;;  %v6540_v19 = vld [vmem:[#allocation10 + $0x1] ss:$0 sm:$0xff] }
 0x3e5   :  { %5380 = vmatprep.subr.mxu0 %v996_v21 }
 0x3e6   :  { %5381 = vmatpush3.msra.mxu0 %v996_v21 }
 0x3e7   :  { %5382 = vmatprep.subr.mxu0 %v819_v22 }
 0x3e8   :  { %5383 = vmatpush3.msra.mxu0 %v819_v22 }
 0x3e9   :  { %5384 = vmatprep.subr.mxu0 %v814_v24 }
 0x3ea   :  { %5385 = vmatpush3.msra.mxu0 %v814_v24 }
 0x3eb   :  { %5386 = vmatprep.subr.mxu0 %v643_v25 }
 0x3ec   :  { %5387 = vmatpush3.msra.mxu0 %v643_v25 }
 0x3ed   :  { %5388 = vmatprep.subr.mxu0 %v638_v26 }
 0x3ee   :  { %5389 = vmatpush3.msra.mxu0 %v638_v26 }
 0x3ef   :  { %5404 = vmatprep.subr.mxu0 %v4774_v27 }
 0x49f   :  { %v5373_v28 = vpop.f32.mrf.mxu0 }
 0x4a0   :  { %v1382_v30 = vmax.f32 %v5373_v28, 1e-30 }
 0x4a1   :  { %v1372_v29 = vpop.f32.mrf.mxu0 }
 0x4a2   :  { %v1381_v31 = vmax.f32 %v1372_v29, 1e-30  ;;  %5800 = vrcp.f32 %v1382_v30 }
 0x4a4   :  { %5802 = vrcp.f32 %v1381_v31 }
 0x4af   :  { %v5801_v32 = vpop.eup %5800 }
 0x4b0   :  { %v1386_v36 = vmul.f32 %v5801_v32, %v5799_v16 }
 0x4b1   :  { %v5803_v33 = vpop.eup %5802 }
 0x4b2   :  { %v1385_v35 = vmul.f32 %v5803_v33, %v5797_v14 }
 0x4b4   :  { %5390 = vmatprep.mubr.msk.f32.mxu0 %vm1285_vm2, %v1385_v35 }
 0x4b5   :  { %5391 = vmatmul.mubr.msk.f32.vlgmr.msra.gmra.mxu0 %vm1285_vm2, %v1386_v36 }
 0x4b6   :  { %5405 = vmatpush3.msra.mxu0 %v4774_v27  ;;  %5412 = vmatprep.mubr.msk.f32.mxu0 %vm382_vm1, %v6371_v45 }
 0x4b7   :  { %5406 = vmatprep.subr.mxu0 %v4773_v34 }
 0x4b8   :  { %5407 = vmatpush3.msra.mxu0 %v4773_v34 }
 0x4b9   :  { %5408 = vmatprep.subr.mxu0 %v4772_v38 }
 0x4ba   :  { %5409 = vmatpush3.msra.mxu0 %v4772_v38 }
 0x4bb   :  { %5410 = vmatprep.subr.mxu0 %v4771_v40 }
 0x4bc   :  { %5411 = vmatpush3.msra.mxu0 %v4771_v40 }
 0x4bd   :  { %5413 = vmatmul.mubr.msk.f32.vlgmr.msra.gmra.mxu0 %vm382_vm1, %v6367_v43  ;;  %5426 = vmatprep.subr.mxu0 %v1797_v41 }
 0x4be   :  { %5427 = vmatpush3.msra.mxu0 %v1797_v41  ;;  %5434 = vmatprep.mubr.msk.f32.mxu0 %vm382_vm1, %v6361_v37 }
 0x4bf   :  { %5428 = vmatprep.subr.mxu0 %v1796_v42 }
 0x4c0   :  { %5429 = vmatpush3.msra.mxu0 %v1796_v42 }
 0x4c1   :  { %5430 = vmatprep.subr.mxu0 %v1795_v44 }
 0x4c2   :  { %5431 = vmatpush3.msra.mxu0 %v1795_v44 }
 0x4c3   :  { %5432 = vmatprep.subr.mxu0 %v1794_v46 }
 0x4c4   :  { %5433 = vmatpush3.msra.mxu0 %v1794_v46 }
 0x4c5   :  { %5435 = vmatmul.mubr.msk.f32.vlgmr.msra.gmra.mxu0 %vm382_vm1, %v6363_v39  ;;  %5448 = vmatprep.subr.mxu0 %v1972_v47 }
 0x4c6   :  { %5449 = vmatpush3.msra.mxu0 %v1972_v47  ;;  %5456 = vmatprep.mubr.msk.f32.mxu0 %vm382_vm1, %v6361_v37 }
 0x4c7   :  { %5450 = vmatprep.subr.mxu0 %v1971_v48 }
 0x4c8   :  { %5451 = vmatpush3.msra.mxu0 %v1971_v48 }
 0x4c9   :  { %5452 = vmatprep.subr.mxu0 %v1970_v49 }
 0x4ca   :  { %5453 = vmatpush3.msra.mxu0 %v1970_v49 }
 0x4cb   :  { %5454 = vmatprep.subr.mxu0 %v1969_v50 }
 0x4cc   :  { %5455 = vmatpush3.msra.mxu0 %v1969_v50 }
 0x4cd   :  { %5457 = vmatmul.mubr.msk.f32.vlgmr.msra.gmra.mxu0 %vm382_vm1, %v6363_v39  ;;  %5470 = vmatprep.subr.mxu0 %v6495_v51 }
 0x4ce   :  { %5471 = vmatpush3.msra.mxu0 %v6495_v51 }
 0x4cf   :  { %5472 = vmatprep.subr.mxu0 %v6502_v52 }
 0x4d0   :  { %5473 = vmatpush3.msra.mxu0 %v6502_v52 }
 0x4d1   :  { %5474 = vmatprep.subr.mxu0 %v6509_v53 }
 0x4d2   :  { %5475 = vmatpush3.msra.mxu0 %v6509_v53 }
 0x4d3   :  { %5476 = vmatprep.subr.mxu0 %v6516_v54 }
 0x4d4   :  { %5477 = vmatpush3.msra.mxu0 %v6516_v54 }
 0x575   :  { %v6523_v61 = vpop.f32.mrf.mxu0 }
 0x576   :  { %v1471_v63 = vmul.f32 0.70710677, %v6523_v61 }
 0x577   :  { %v1459_v0 = vpop.f32.mrf.mxu0 }
 0x578   :  { %v1473_v1 = vand.u32 2147483647, %v1471_v63  ;;  %v1470_v2 = vmul.f32 0.70710677, %v1459_v0  ;;  %vm1513_vm3 = vcmp.ge.f32.partialorder %v1471_v63, 0.0  ;;  %v1709_v63 = vld [vmem:[#allocation5 + $0x8] sm:$0xff] }
 0x57a   :  { %v1475_v3 = vmul.f32 0.3275911, %v1473_v1  ;;  %v1472_v4 = vand.u32 2147483647, %v1470_v2  ;;  %v1501_v11 = vsub.f32 0.0, %v1473_v1  ;;  %vm1512_vm4 = vcmp.ge.f32.partialorder %v1470_v2, 0.0 }
 0x57b   :  { %v1708_v2 = vld [vmem:[#allocation5] sm:$0xff] }
 0x57c   :  { %v1477_v5 = vadd.f32 1.0, %v1475_v3  ;;  %v1474_v6 = vmul.f32 0.3275911, %v1472_v4  ;;  %v1500_v13 = vsub.f32 0.0, %v1472_v4  ;;  %v1503_v15 = vmul.f32 %v1501_v11, %v1473_v1 }
 0x57d   :  { %v5414_v8 = vpop.f32.mrf.mxu0 }
 0x57e   :  { %5804 = vrcp.f32 %v1477_v5  ;;  %v1476_v9 = vadd.f32 1.0, %v1474_v6  ;;  %v6532_v10 = vadd.f32 %v5414_v8, %v6529_v7  ;;  %v1502_v17 = vmul.f32 %v1500_v13, %v1472_v4  ;;  %v1710_v13 = vld [vmem:[#allocation5 + $0x10] sm:$0xff] }
 0x57f   :  { %v6534_v12 = vpop.f32.mrf.mxu0  ;;  %v1506_v21 = vmul.f32 1.442695, %v1503_v15  ;;  %v1468_v5 = vmul.f32 0.5, %v1459_v0  ;;  %v1469_v8 = vmul.f32 0.5, %v6523_v61  ;;  %v1884_v0 = vld [vmem:[#allocation5 + $0x38] sm:$0xff]  ;;  %v1883_v61 = vld [vmem:[#allocation5 + $0x30] sm:$0xff] }
 0x580   :  { %5806 = vrcp.f32 %v1476_v9  ;;  %v1504_v27 = vmul.f32 1.442695, %v1502_v17  ;;  %v1881_v15 = vld [vmem:[#allocation5 + $0x20] sm:$0xff] }
 0x581   :  { %5808 = vpow2.f32 %v1506_v21 }
 0x582   :  { %5810 = vpow2.f32 %v1504_v27 }
 0x585   :  { %v6536_v14 = vpop.f32.mrf.mxu0 }
 0x587   :  { %v6538_v18 = vpop.f32.mrf.mxu0 }
 0x58b   :  { %v5805_v16 = vpop.eup %5804 }
 0x58c   :  { %v1483_v20 = vmul.f32 1.0614054, %v5805_v16 }
 0x58d   :  { %v5458_v22 = vpop.f32.mrf.mxu0  ;;  %v5807_v23 = vpop.eup %5806 }
 0x58e   :  { %v1485_v24 = vadd.f32 -1.4531521, %v1483_v20  ;;  %v6543_v25 = vadd.f32 %v5458_v22, %v6540_v19  ;;  %v1482_v26 = vmul.f32 1.0614054, %v5807_v23  ;;  %v5809_v44 = vpop.eup %5808 }
 0x58f   :  { %v5811_v49 = vpop.eup %5810 }
 0x590   :  { %v1487_v28 = vmul.f32 %v5805_v16, %v1485_v24  ;;  %5481 = vmatprep.subr.mxu0 %v6543_v25  ;;  %v1484_v30 = vadd.f32 -1.4531521, %v1482_v26 }
 0x592   :  { %v1489_v29 = vadd.f32 1.4214138, %v1487_v28  ;;  %v1486_v31 = vmul.f32 %v5807_v23, %v1484_v30 }
 0x594   :  { %v1491_v32 = vmul.f32 %v5805_v16, %v1489_v29  ;;  %v1488_v33 = vadd.f32 1.4214138, %v1486_v31  ;;  %v355_v31 = vld [vmem:[#allocation14] sm:$0xff] }
 0x596   :  { %v1493_v35 = vadd.f32 -0.28449672, %v1491_v32  ;;  %v1490_v36 = vmul.f32 %v5807_v23, %v1488_v33  ;;  %v356_v32 = vld [vmem:[#allocation14 + $0x8] sm:$0xff] }
 0x598   :  { %v1495_v34 = vmul.f32 %v5805_v16, %v1493_v35  ;;  %v1492_v38 = vadd.f32 -0.28449672, %v1490_v36 }
 0x59a   :  { %v1497_v40 = vadd.f32 0.2548296, %v1495_v34  ;;  %v1494_v41 = vmul.f32 %v5807_v23, %v1492_v38 }
 0x59c   :  { %v1499_v42 = vmul.f32 %v5805_v16, %v1497_v40  ;;  %v1496_v46 = vadd.f32 0.2548296, %v1494_v41  ;;  %v1700_v16 = vadd.f32 %v6529_v7, %v6534_v12  ;;  %v4779_v7 = vld [vmem:[#allocation7] ss:$0 sm:$0xff] }
 0x59e   :  { %v1509_v47 = vmul.f32 %v5809_v44, %v1499_v42  ;;  %v1498_v48 = vmul.f32 %v5807_v23, %v1496_v46  ;;  %v4785_v23 = vld [vmem:[#allocation7 + $0x1] ss:$0 sm:$0xff] }
 0x5a0   :  { %v1511_v50 = vsub.f32 1.0, %v1509_v47  ;;  %v1508_v55 = vmul.f32 %v5811_v49, %v1498_v48 }
 0x5a2   :  { %v1515_v56 = vsub.f32 0.0, %v1511_v50  ;;  %v1510_v57 = vsub.f32 1.0, %v1508_v55 }
 0x5a4   :  { %v1517_v58 = vsel %vm1513_vm3, %v1511_v50, %v1515_v56  ;;  %v1514_v1 = vsub.f32 0.0, %v1510_v57  ;;  %v2047_v50 = vpop.f32.mrf.mxu0  ;;  %v4782_v56 = vld [vmem:[#allocation10] ss:$0 sm:$0xff] }
 0x5a5   :  { %v1519_v3 = vadd.f32 1.0, %v1517_v58  ;;  %v1877_v58 = vadd.f32 %v6536_v14, %v4782_v56 }
 0x5a6   :  { %v1516_v4 = vsel %vm1512_vm4, %v1510_v57, %v1514_v1  ;;  %v2048_v57 = vadd.f32 %v6540_v19, %v2047_v50  ;;  %v1872_v1 = vadd.f32 %v4782_v56, %v6538_v18  ;;  %v4807_v18 = vld [vmem:[%s6828_s3 + $0x50] sm:$0xff] }
 0x5a7   :  { %v1518_v6 = vadd.f32 1.0, %v1516_v4  ;;  %v1521_v11 = vmul.f32 %v1519_v3, %v1469_v8  ;;  %v4808_v3 = vld [vmem:[%s6828_s3 + $0x58] sm:$0xff] }
 0x5a9   :  { %v1520_v9 = vmul.f32 %v1518_v6, %v1468_v5 }
 0x5ab   :  { %5401 = vmatprep.mubr.msk.f32.mxu1 %vm382_vm1, %v1520_v9 }
 0x5ac   :  { %5402 = vmatmul.mubr.msk.f32.vlgmr.msra.gmra.mxu1 %vm382_vm1, %v1521_v11  ;;  %v4806_v11 = vld [vmem:[%s6828_s3 + $0x48] sm:$0xff] }
 0x5ad   :  { %5416 = vmatpush3.msra.mxu1 %v6520_v59  ;;  %5423 = vmatprep.mubr.msk.f32.mxu1 %vm382_vm1, %v6361_v37  ;;  %v1882_v59 = vld [vmem:[#allocation5 + $0x28] sm:$0xff] }
 0x5ae   :  { %5417 = vmatprep.subr.mxu1 %v1710_v13 }
 0x5af   :  { %5418 = vmatpush3.msra.mxu1 %v1710_v13  ;;  %v4805_v13 = vld [vmem:[%s6828_s3 + $0x40] sm:$0xff] }
 0x5b0   :  { %5419 = vmatprep.subr.mxu1 %v1709_v63 }
 0x5b1   :  { %5420 = vmatpush3.msra.mxu1 %v1709_v63  ;;  %v2665_v63 = vld [vmem:[#allocation8 + $0x58] sm:$0xff] }
 0x5b2   :  { %5421 = vmatprep.subr.mxu1 %v1708_v2 }
 0x5b3   :  { %5422 = vmatpush3.msra.mxu1 %v1708_v2  ;;  %v2664_v2 = vld [vmem:[#allocation8 + $0x50] sm:$0xff] }
 0x5b4   :  { %5424 = vmatmul.mubr.msk.f32.vlgmr.msra.gmra.mxu1 %vm382_vm1, %v6363_v39  ;;  %5437 = vmatprep.subr.mxu1 %v1884_v0 }
 0x5b5   :  { %5438 = vmatpush3.msra.mxu1 %v1884_v0  ;;  %5445 = vmatprep.mubr.msk.f32.mxu1 %vm382_vm1, %v6361_v37  ;;  %v2663_v0 = vld [vmem:[#allocation8 + $0x48] sm:$0xff] }
 0x5b6   :  { %5439 = vmatprep.subr.mxu1 %v1883_v61 }
 0x5b7   :  { %5440 = vmatpush3.msra.mxu1 %v1883_v61  ;;  %v2662_v61 = vld [vmem:[#allocation8 + $0x40] sm:$0xff] }
 0x5b8   :  { %5441 = vmatprep.subr.mxu1 %v1882_v59 }
 0x5b9   :  { %5442 = vmatpush3.msra.mxu1 %v1882_v59  ;;  %v2841_v59 = vld [vmem:[#allocation8 + $0x78] sm:$0xff] }
 0x5ba   :  { %5443 = vmatprep.subr.mxu1 %v1881_v15 }
 0x5bb   :  { %5444 = vmatpush3.msra.mxu1 %v1881_v15  ;;  %v2840_v15 = vld [vmem:[#allocation8 + $0x70] sm:$0xff] }
 0x5bc   :  { %5446 = vmatmul.mubr.msk.f32.vlgmr.msra.gmra.mxu1 %vm382_vm1, %v6363_v39 }
 0x5bd   :  { %5467 = vmatprep.mubr.msk.f32.mxu1 %vm382_vm1, %v1700_v16  ;;  %v2839_v16 = vld [vmem:[#allocation8 + $0x68] sm:$0xff] }
 0x66c   :  { %v6561_v17 = vpop.f32.mrf.mxu1 }
 0x66e   :  { %v6563_v20 = vpop.f32.mrf.mxu1 }
 0x674   :  { %v5425_v21 = vpop.f32.mrf.mxu1 }
 0x675   :  { %v1791_v12 = vadd.f32 %v5425_v21, %v4779_v7  ;;  %v2838_v21 = vld [vmem:[#allocation8 + $0x60] sm:$0xff] }
 0x676   :  { %v1785_v22 = vpop.f32.mrf.mxu1 }
 0x677   :  { %v1786_v30 = vadd.f32 %v4779_v7, %v1785_v22  ;;  %v2389_v22 = vld [vmem:[#allocation11 + $0x38] sm:$0xff] }
 0x67c   :  { %v5447_v24 = vpop.f32.mrf.mxu1 }
 0x67d   :  { %v1965_v26 = vadd.f32 %v5447_v24, %v4785_v23  ;;  %v2387_v24 = vld [vmem:[#allocation11 + $0x28] sm:$0xff] }
 0x67e   :  { %v1959_v27 = vpop.f32.mrf.mxu1 }
 0x67f   :  { %v1960_v28 = vadd.f32 %v4785_v23, %v1959_v27  ;;  %5459 = vmatprep.subr.msk.mxu1 %vm382_vm1, %v1965_v26  ;;  %v2388_v23 = vld [vmem:[#allocation11 + $0x30] sm:$0xff] }
 0x680   :  { %5460 = vmatpush3.xpose.msk.msra.mxu1 %vm382_vm1, %v1965_v26 }
 0x681   :  { %5461 = vmatprep.subr.msk.mxu1 %vm382_vm1, %v1960_v28 }
 0x684   :  { %5462 = vmatpush3.xpose.msk.msra.mxu1 %vm382_vm1, %v1960_v28 }
 0x685   :  { %5463 = vmatprep.subr.msk.mxu1 %vm382_vm1, %v1791_v12 }
 0x688   :  { %5464 = vmatpush3.xpose.msk.msra.mxu1 %vm382_vm1, %v1791_v12 }
 0x689   :  { %5465 = vmatprep.subr.msk.mxu1 %vm382_vm1, %v1786_v30 }
 0x68c   :  { %5466 = vmatpush3.xpose.msk.msra.mxu1 %vm382_vm1, %v1786_v30 }
 0x68d   :  { %5492 = vmatprep.subr.mxu1 %v2389_v22 }
 0x68f   :  { %5468 = vmatmul.mubr.msk.f32.vlgmr.msra.gmra.mxu1 %vm382_vm1, %v6532_v10 }
 0x690   :  { %5493 = vmatpush3.msra.mxu1 %v2389_v22 }
 0x691   :  { %5494 = vmatprep.subr.mxu1 %v2388_v23 }
 0x692   :  { %5495 = vmatpush3.msra.mxu1 %v2388_v23 }
 0x693   :  { %5496 = vmatprep.subr.mxu1 %v2387_v24 }
 0x694   :  { %5497 = vmatpush3.msra.mxu1 %v2387_v24 }
 0x74f   :  { %v5469_v29 = vpop.f32.mrf.mxu1 }
 0x750   :  { %v2146_v36 = vadd.f32 %v5469_v29, %v356_v32 }
 0x751   :  { %v2140_v33 = vpop.f32.mrf.mxu1 }
 0x752   :  { %v2141_v35 = vadd.f32 %v2140_v33, %v355_v31  ;;  %v2152_v38 = vsel %vm382_vm1, %v2146_v36, -inf  ;;  %v6626_v31 = vld [vmem:[%s6829_s4 + $0x2] ss:$0 sm:$0xff] }
 0x754   :  { %v2149_v34 = vsel %vm382_vm1, %v2141_v35, -inf }
 0x755   :  { %2150 = vmax.xlane.f32.xlu1 %v2149_v34 }
 0x759   :  { %2153 = vmax.xlane.f32.xlu1 %v2152_v38 }
 0x7de   :  { %v2151_v40 = vpop.xlane.xlu1 %2150 }
 0x7df   :  { %v2155_v41 = vmax.f32 %v2151_v40, -1e+20 }
 0x7e1   :  { %v2157_v42 = vsub.f32 %v2141_v35, %v2155_v41 }
 0x7e2   :  { %v2154_v44 = vpop.xlane.xlu1 %2153 }
 0x7e3   :  { %v2159_v46 = vmul.f32 1.442695, %v2157_v42  ;;  %v2156_v47 = vmax.f32 %v2154_v44, -1e+20 }
 0x7e5   :  { %5812 = vpow2.f32 %v2159_v46  ;;  %v2158_v10 = vsub.f32 %v2146_v36, %v2156_v47  ;;  %v6637_v47 = vld [vmem:[#allocation10 + $0x3] ss:$0 sm:$0xff] }
 0x7e7   :  { %v2161_v48 = vmul.f32 1.442695, %v2158_v10 }
 0x7e9   :  { %5814 = vpow2.f32 %v2161_v48 }
 0x7f2   :  { %v5813_v49 = vpop.eup %5812 }
 0x7f3   :  { %5478 = vmatprep.mubr.msk.f32.mxu0 %vm382_vm1, %v5813_v49 }
 0x7f6   :  { %v5815_v55 = vpop.eup %5814 }
 0x7f7   :  { %5479 = vmatmul.mubr.msk.f32.vlgmr.msra.gmra.mxu0 %vm382_vm1, %v5815_v55 }
 0x7f8   :  { %5482 = vmatpush3.msra.mxu0 %v6543_v25 }
 0x7f9   :  { %5483 = vmatprep.subr.mxu0 %v2048_v57 }
 0x7fa   :  { %5484 = vmatpush3.msra.mxu0 %v2048_v57 }
 0x7fb   :  { %5485 = vmatprep.subr.mxu0 %v1877_v58 }
 0x7fc   :  { %5486 = vmatpush3.msra.mxu0 %v1877_v58 }
 0x7fd   :  { %5487 = vmatprep.subr.mxu0 %v1872_v1 }
 0x7fe   :  { %5488 = vmatpush3.msra.mxu0 %v1872_v1 }
 0x7ff   :  { %5503 = vmatprep.subr.mxu0 %v4808_v3 }
 0x8b7   :  { %v5480_v19 = vpop.f32.mrf.mxu0 }
 0x8b8   :  { %v2245_v4 = vmax.f32 %v5480_v19, 1e-30 }
 0x8b9   :  { %v2235_v5 = vpop.f32.mrf.mxu0 }
 0x8ba   :  { %v2244_v6 = vmax.f32 %v2235_v5, 1e-30  ;;  %5816 = vrcp.f32 %v2245_v4 }
 0x8bc   :  { %5818 = vrcp.f32 %v2244_v6 }
 0x8c7   :  { %v5817_v14 = vpop.eup %5816 }
 0x8c8   :  { %v2249_v9 = vmul.f32 %v5817_v14, %v5815_v55 }
 0x8c9   :  { %v5819_v25 = vpop.eup %5818 }
 0x8ca   :  { %v2248_v8 = vmul.f32 %v5819_v25, %v5813_v49 }
 0x8cc   :  { %5489 = vmatprep.mubr.msk.f32.mxu0 %vm382_vm1, %v2248_v8 }
 0x8cd   :  { %5490 = vmatmul.mubr.msk.f32.vlgmr.msra.gmra.mxu0 %vm382_vm1, %v2249_v9 }
 0x8ce   :  { %5504 = vmatpush3.msra.mxu0 %v4808_v3  ;;  %5511 = vmatprep.mubr.msk.f32.mxu0 %vm382_vm1, %v6389_v60 }
 0x8cf   :  { %5505 = vmatprep.subr.mxu0 %v4807_v18 }
 0x8d0   :  { %5506 = vmatpush3.msra.mxu0 %v4807_v18 }
 0x8d1   :  { %5507 = vmatprep.subr.mxu0 %v4806_v11 }
 0x8d2   :  { %5508 = vmatpush3.msra.mxu0 %v4806_v11 }
 0x8d3   :  { %5509 = vmatprep.subr.mxu0 %v4805_v13 }
 0x8d4   :  { %5510 = vmatpush3.msra.mxu0 %v4805_v13 }
 0x8d5   :  { %5512 = vmatmul.mubr.msk.f32.vlgmr.msra.gmra.mxu0 %vm382_vm1, %v6391_v62  ;;  %5525 = vmatprep.subr.mxu0 %v2665_v63 }
 0x8d6   :  { %5526 = vmatpush3.msra.mxu0 %v2665_v63  ;;  %5533 = vmatprep.mubr.msk.f32.mxu0 %vm382_vm1, %v6361_v37 }
 0x8d7   :  { %5527 = vmatprep.subr.mxu0 %v2664_v2 }
 0x8d8   :  { %5528 = vmatpush3.msra.mxu0 %v2664_v2 }
 0x8d9   :  { %5529 = vmatprep.subr.mxu0 %v2663_v0 }
 0x8da   :  { %5530 = vmatpush3.msra.mxu0 %v2663_v0 }
 0x8db   :  { %5531 = vmatprep.subr.mxu0 %v2662_v61 }
 0x8dc   :  { %5532 = vmatpush3.msra.mxu0 %v2662_v61 }
 0x8dd   :  { %5534 = vmatmul.mubr.msk.f32.vlgmr.msra.gmra.mxu0 %vm382_vm1, %v6363_v39  ;;  %5547 = vmatprep.subr.mxu0 %v2841_v59 }
 0x8de   :  { %5548 = vmatpush3.msra.mxu0 %v2841_v59  ;;  %5555 = vmatprep.mubr.msk.f32.mxu0 %vm382_vm1, %v6361_v37 }
 0x8df   :  { %5549 = vmatprep.subr.mxu0 %v2840_v15 }
 0x8e0   :  { %5550 = vmatpush3.msra.mxu0 %v2840_v15 }
 0x8e1   :  { %5551 = vmatprep.subr.mxu0 %v2839_v16 }
 0x8e2   :  { %5552 = vmatpush3.msra.mxu0 %v2839_v16 }
 0x8e3   :  { %5553 = vmatprep.subr.mxu0 %v2838_v21 }
 0x8e4   :  { %5554 = vmatpush3.msra.mxu0 %v2838_v21 }
 0x8e5   :  { %5556 = vmatmul.mubr.msk.f32.vlgmr.msra.gmra.mxu0 %vm382_vm1, %v6363_v39  ;;  %5569 = vmatprep.subr.mxu0 %v6495_v51 }
 0x8e6   :  { %5570 = vmatpush3.msra.mxu0 %v6495_v51  ;;  %v2386_v51 = vld [vmem:[#allocation11 + $0x20] sm:$0xff] }
 0x8e7   :  { %5571 = vmatprep.subr.mxu0 %v6502_v52  ;;  %5498 = vmatprep.subr.mxu1 %v2386_v51 }
 0x8e8   :  { %5572 = vmatpush3.msra.mxu0 %v6502_v52  ;;  %5499 = vmatpush3.msra.mxu1 %v2386_v51  ;;  %v6617_v52 = vld [vmem:[#allocation5 + $0x58] sm:$0xff] }
 0x8e9   :  { %5573 = vmatprep.subr.mxu0 %v6509_v53  ;;  %5514 = vmatprep.subr.mxu1 %v6617_v52 }
 0x8ea   :  { %5574 = vmatpush3.msra.mxu0 %v6509_v53 }
 0x8eb   :  { %5575 = vmatprep.subr.mxu0 %v6516_v54 }
 0x8ec   :  { %5576 = vmatpush3.msra.mxu0 %v6516_v54 }
 0x98d   :  { %v6620_v53 = vpop.f32.mrf.mxu0 }
 0x98e   :  { %v2334_v54 = vmul.f32 0.70710677, %v6620_v53 }
 0x98f   :  { %v2322_v26 = vpop.f32.mrf.mxu0 }
 0x990   :  { %v2336_v27 = vand.u32 2147483647, %v2334_v54  ;;  %v2333_v28 = vmul.f32 0.70710677, %v2322_v26  ;;  %vm2376_vm5 = vcmp.ge.f32.partialorder %v2334_v54, 0.0  ;;  %v2575_v54 = vld [vmem:[#allocation5 + $0x48] sm:$0xff] }
 0x992   :  { %v2338_v7 = vmul.f32 0.3275911, %v2336_v27  ;;  %v2335_v12 = vand.u32 2147483647, %v2333_v28  ;;  %v2364_v36 = vsub.f32 0.0, %v2336_v27  ;;  %vm2375_vm6 = vcmp.ge.f32.partialorder %v2333_v28, 0.0 }
 0x993   :  { %v2574_v28 = vld [vmem:[#allocation5 + $0x40] sm:$0xff] }
 0x994   :  { %v2340_v30 = vadd.f32 1.0, %v2338_v7  ;;  %v2337_v29 = vmul.f32 0.3275911, %v2335_v12  ;;  %v2363_v38 = vsub.f32 0.0, %v2335_v12  ;;  %v2366_v41 = vmul.f32 %v2364_v36, %v2336_v27  ;;  %v2750_v36 = vld [vmem:[#allocation5 + $0x60] sm:$0xff] }
 0x995   :  { %v5513_v32 = vpop.f32.mrf.mxu0  ;;  %v2331_v7 = vmul.f32 0.5, %v2322_v26  ;;  %v2753_v26 = vld [vmem:[#allocation5 + $0x78] sm:$0xff] }
 0x996   :  { %5820 = vrcp.f32 %v2340_v30  ;;  %v2339_v33 = vadd.f32 1.0, %v2337_v29  ;;  %v6629_v35 = vadd.f32 %v5513_v32, %v6626_v31  ;;  %v2365_v44 = vmul.f32 %v2363_v38, %v2335_v12 }
 0x997   :  { %v6631_v34 = vpop.f32.mrf.mxu0  ;;  %v2369_v48 = vmul.f32 1.442695, %v2366_v41  ;;  %v2332_v30 = vmul.f32 0.5, %v6620_v53  ;;  %v2752_v53 = vld [vmem:[#allocation5 + $0x70] sm:$0xff] }
 0x998   :  { %5822 = vrcp.f32 %v2339_v33  ;;  %v2367_v58 = vmul.f32 1.442695, %v2365_v44  ;;  %v2576_v33 = vld [vmem:[#allocation5 + $0x50] sm:$0xff]  ;;  %v2565_v38 = vadd.f32 %v6626_v31, %v6631_v34  ;;  %v4813_v31 = vld [vmem:[#allocation7 + $0x2] ss:$0 sm:$0xff] }
 0x999   :  { %5824 = vpow2.f32 %v2369_v48  ;;  %v4819_v48 = vld [vmem:[#allocation7 + $0x3] ss:$0 sm:$0xff] }
 0x99a   :  { %5826 = vpow2.f32 %v2367_v58 }
 0x99d   :  { %v6633_v40 = vpop.f32.mrf.mxu0 }
 0x99f   :  { %v6635_v46 = vpop.f32.mrf.mxu0 }
 0x9a3   :  { %v5821_v42 = vpop.eup %5820 }
 0x9a4   :  { %v2346_v10 = vmul.f32 1.0614054, %v5821_v42 }
 0x9a5   :  { %v5557_v49 = vpop.f32.mrf.mxu0  ;;  %v5823_v50 = vpop.eup %5822 }
 0x9a6   :  { %v2348_v55 = vadd.f32 -1.4531521, %v2346_v10  ;;  %v6640_v56 = vadd.f32 %v5557_v49, %v6637_v47  ;;  %v2345_v57 = vmul.f32 1.0614054, %v5823_v50  ;;  %v5825_v63 = vpop.eup %5824 }
 0x9a7   :  { %v5827_v59 = vpop.eup %5826 }
 0x9a8   :  { %v2350_v1 = vmul.f32 %v5821_v42, %v2348_v55  ;;  %5580 = vmatprep.subr.mxu0 %v6640_v56  ;;  %v2347_v3 = vadd.f32 -1.4531521, %v2345_v57 }
 0x9aa   :  { %v2352_v19 = vadd.f32 1.4214138, %v2350_v1  ;;  %v2349_v4 = vmul.f32 %v5823_v50, %v2347_v3  ;;  %v358_v1 = vld [vmem:[#allocation16 + $0x8] sm:$0xff] }
 0x9ac   :  { %v2354_v5 = vmul.f32 %v5821_v42, %v2352_v19  ;;  %v2351_v6 = vadd.f32 1.4214138, %v2349_v4  ;;  %v357_v19 = vld [vmem:[#allocation16] sm:$0xff] }
 0x9ae   :  { %v2356_v14 = vadd.f32 -0.28449672, %v2354_v5  ;;  %v2353_v25 = vmul.f32 %v5823_v50, %v2351_v6 }
 0x9b0   :  { %v2358_v8 = vmul.f32 %v5821_v42, %v2356_v14  ;;  %v2355_v9 = vadd.f32 -0.28449672, %v2353_v25 }
 0x9b2   :  { %v2360_v18 = vadd.f32 0.2548296, %v2358_v8  ;;  %v2357_v11 = vmul.f32 %v5823_v50, %v2355_v9 }
 0x9b4   :  { %v2362_v13 = vmul.f32 %v5821_v42, %v2360_v18  ;;  %v2359_v2 = vadd.f32 0.2548296, %v2357_v11 }
 0x9b6   :  { %v2372_v0 = vmul.f32 %v5825_v63, %v2362_v13  ;;  %v2361_v61 = vmul.f32 %v5823_v50, %v2359_v2 }
 0x9b8   :  { %v2374_v15 = vsub.f32 1.0, %v2372_v0  ;;  %v2371_v16 = vmul.f32 %v5827_v59, %v2361_v61  ;;  %v2916_v0 = vpop.f32.mrf.mxu0 }
 0x9ba   :  { %v2378_v21 = vsub.f32 0.0, %v2374_v15  ;;  %v2373_v22 = vsub.f32 1.0, %v2371_v16  ;;  %v2917_v16 = vadd.f32 %v6637_v47, %v2916_v0 }
 0x9bc   :  { %v2380_v23 = vsel %vm2376_vm5, %v2374_v15, %v2378_v21  ;;  %v2377_v24 = vsub.f32 0.0, %v2373_v22  ;;  %v4816_v15 = vld [vmem:[#allocation10 + $0x2] ss:$0 sm:$0xff] }
 0x9bd   :  { %v2382_v51 = vadd.f32 1.0, %v2380_v23  ;;  %v2746_v21 = vadd.f32 %v6633_v40, %v4816_v15  ;;  %v4842_v23 = vld [vmem:[%s6828_s3 + $0x78] sm:$0xff]  ;;  %v4768_v40 = vld [vmem:[%s6835_s10] ss:$0 sm:$0xff] }
 0x9be   :  { %v2379_v27 = vsel %vm2375_vm6, %v2373_v22, %v2377_v24  ;;  %v2741_v22 = vadd.f32 %v4816_v15, %v6635_v46  ;;  %v1606_v46 = vadd.f32 %v4768_v40, %v6563_v20  ;;  %v4841_v20 = vld [vmem:[%s6828_s3 + $0x70] sm:$0xff] }
 0x9bf   :  { %v2381_v12 = vadd.f32 1.0, %v2379_v27  ;;  %v2384_v32 = vmul.f32 %v2382_v51, %v2332_v30  ;;  %v1616_v30 = vmul.f32 0.26894143, %v6361_v37 }
 0x9c1   :  { %v2383_v29 = vmul.f32 %v2381_v12, %v2331_v7  ;;  %v1614_v7 = vmul.f32 0.7310586, %v1606_v46 }
 0x9c3   :  { %5500 = vmatprep.mubr.msk.f32.mxu1 %vm382_vm1, %v2383_v29 }
 0x9c4   :  { %5501 = vmatmul.mubr.msk.f32.vlgmr.msra.gmra.mxu1 %vm382_vm1, %v2384_v32  ;;  %v1611_v32 = vadd.f32 %v6561_v17, %v4768_v40 }
 0x9c5   :  { %5515 = vmatpush3.msra.mxu1 %v6617_v52  ;;  %5522 = vmatprep.mubr.msk.f32.mxu1 %vm382_vm1, %v6361_v37  ;;  %v2751_v52 = vld [vmem:[#allocation5 + $0x68] sm:$0xff] }
 0x9c6   :  { %5516 = vmatprep.subr.mxu1 %v2576_v33  ;;  %v1615_v17 = vmul.f32 0.7310586, %v1611_v32 }
 0x9c7   :  { %5517 = vmatpush3.msra.mxu1 %v2576_v33  ;;  %v4802_v33 = vld [vmem:[%s6835_s10 + $0x1] ss:$0 sm:$0xff] }
 0x9c8   :  { %5518 = vmatprep.subr.mxu1 %v2575_v54 }
 0x9c9   :  { %5519 = vmatpush3.msra.mxu1 %v2575_v54 }
 0x9ca   :  { %5520 = vmatprep.subr.mxu1 %v2574_v28 }
 0x9cb   :  { %5521 = vmatpush3.msra.mxu1 %v2574_v28  ;;  %v6692_v28 = vadd.f32 %v1616_v30, %v1614_v7 }
 0x9cc   :  { %5523 = vmatmul.mubr.msk.f32.vlgmr.msra.gmra.mxu1 %vm382_vm1, %v6363_v39  ;;  %5536 = vmatprep.subr.mxu1 %v2753_v26 }
 0x9cd   :  { %5537 = vmatpush3.msra.mxu1 %v2753_v26  ;;  %5544 = vmatprep.mubr.msk.f32.mxu1 %vm382_vm1, %v6361_v37  ;;  %v4840_v37 = vld [vmem:[%s6828_s3 + $0x68] sm:$0xff] }
 0x9ce   :  { %5538 = vmatprep.subr.mxu1 %v2752_v53 }
 0x9cf   :  { %5539 = vmatpush3.msra.mxu1 %v2752_v53 }
 0x9d0   :  { %5540 = vmatprep.subr.mxu1 %v2751_v52 }
 0x9d1   :  { %5541 = vmatpush3.msra.mxu1 %v2751_v52  ;;  %v4839_v52 = vld [vmem:[%s6828_s3 + $0x60] sm:$0xff] }
 0x9d2   :  { %5542 = vmatprep.subr.mxu1 %v2750_v36 }
 0x9d3   :  { %5543 = vmatpush3.msra.mxu1 %v2750_v36  ;;  %v1617_v36 = vmul.f32 0.26894143, %v6363_v39 }
 0x9d4   :  { %5545 = vmatmul.mubr.msk.f32.vlgmr.msra.gmra.mxu1 %vm382_vm1, %v6363_v39  ;;  %v3544_v39 = vld [vmem:[#allocation8 + $0x188] sm:$0xff] }
 0x9d5   :  { %5566 = vmatprep.mubr.msk.f32.mxu1 %vm382_vm1, %v2565_v38  ;;  %v2481_v38 = vmul.f32 0.26894143, %v6371_v45 }
 0xa84   :  { %v6658_v41 = vpop.f32.mrf.mxu1 }
 0xa86   :  { %v6660_v42 = vpop.f32.mrf.mxu1 }
 0xa87   :  { %v2471_v26 = vadd.f32 %v4802_v33, %v6660_v42  ;;  %v3546_v42 = vld [vmem:[#allocation8 + $0x198] sm:$0xff] }
 0xa89   :  { %v2479_v53 = vmul.f32 0.7310586, %v2471_v26 }
 0xa8c   :  { %v5524_v44 = vpop.f32.mrf.mxu1 }
 0xa8d   :  { %v2658_v34 = vadd.f32 %v5524_v44, %v4813_v31  ;;  %v6710_v44 = vadd.f32 %v1617_v36, %v1615_v17 }
 0xa8e   :  { %v2652_v10 = vpop.f32.mrf.mxu1 }
 0xa8f   :  { %v2653_v58 = vadd.f32 %v4813_v31, %v2652_v10  ;;  %v2476_v10 = vadd.f32 %v6658_v41, %v4802_v33  ;;  %v2482_v41 = vmul.f32 0.26894143, %v6367_v43  ;;  %v3721_v31 = vld [vmem:[#allocation8 + $0x1b0] sm:$0xff]  ;;  %v3719_v43 = vld [vmem:[#allocation8 + $0x1a0] sm:$0xff] }
 0xa91   :  { %v2480_v45 = vmul.f32 0.7310586, %v2476_v10 }
 0xa94   :  { %v5546_v49 = vpop.f32.mrf.mxu1 }
 0xa95   :  { %v2834_v50 = vadd.f32 %v5546_v49, %v4819_v48  ;;  %v3545_v49 = vld [vmem:[#allocation8 + $0x190] sm:$0xff] }
 0xa96   :  { %v2828_v55 = vpop.f32.mrf.mxu1 }
 0xa97   :  { %v2829_v57 = vadd.f32 %v4819_v48, %v2828_v55  ;;  %5558 = vmatprep.subr.msk.mxu1 %vm382_vm1, %v2834_v50  ;;  %v6713_v48 = vadd.f32 %v2481_v38, %v2479_v53  ;;  %v3722_v55 = vld [vmem:[#allocation8 + $0x1b8] sm:$0xff] }
 0xa98   :  { %5559 = vmatpush3.xpose.msk.msra.mxu1 %vm382_vm1, %v2834_v50  ;;  %v3543_v50 = vld [vmem:[#allocation8 + $0x180] sm:$0xff] }
 0xa99   :  { %5560 = vmatprep.subr.msk.mxu1 %vm382_vm1, %v2829_v57 }
 0xa9c   :  { %5561 = vmatpush3.xpose.msk.msra.mxu1 %vm382_vm1, %v2829_v57  ;;  %v6720_v57 = vadd.f32 %v2482_v41, %v2480_v45 }
 0xa9d   :  { %5562 = vmatprep.subr.msk.mxu1 %vm382_vm1, %v2658_v34 }
 0xaa0   :  { %5563 = vmatpush3.xpose.msk.msra.mxu1 %vm382_vm1, %v2658_v34  ;;  %v3720_v34 = vld [vmem:[#allocation8 + $0x1a8] sm:$0xff] }
 0xaa1   :  { %5564 = vmatprep.subr.msk.mxu1 %vm382_vm1, %v2653_v58 }
 0xaa4   :  { %5565 = vmatpush3.xpose.msk.msra.mxu1 %vm382_vm1, %v2653_v58  ;;  %v3258_v58 = vld [vmem:[#allocation11 + $0x58] sm:$0xff] }
 0xaa5   :  { %5591 = vmatprep.subr.mxu1 %v3258_v58 }
 0xaa7   :  { %5567 = vmatmul.mubr.msk.f32.vlgmr.msra.gmra.mxu1 %vm382_vm1, %v6629_v35 }
 0xaa8   :  { %5592 = vmatpush3.msra.mxu1 %v3258_v58 }
 0xb67   :  { %v5568_v3 = vpop.f32.mrf.mxu1 }
 0xb68   :  { %v3015_v4 = vadd.f32 %v5568_v3, %v358_v1  ;;  %v3257_v1 = vld [vmem:[#allocation11 + $0x50] sm:$0xff]  ;;  %v3256_v3 = vld [vmem:[#allocation11 + $0x48] sm:$0xff] }
 0xb69   :  { %v3009_v5 = vpop.f32.mrf.mxu1  ;;  %5593 = vmatprep.subr.mxu1 %v3257_v1 }
 0xb6a   :  { %v3010_v6 = vadd.f32 %v3009_v5, %v357_v19  ;;  %v3021_v14 = vsel %vm382_vm1, %v3015_v4, -inf  ;;  %5594 = vmatpush3.msra.mxu1 %v3257_v1  ;;  %v3255_v19 = vld [vmem:[#allocation11 + $0x40] sm:$0xff] }
 0xb6b   :  { %3022 = vmax.xlane.f32.xlu1 %v3021_v14  ;;  %5595 = vmatprep.subr.mxu1 %v3256_v3 }
 0xb6c   :  { %v3018_v25 = vsel %vm382_vm1, %v3010_v6, -inf  ;;  %5596 = vmatpush3.msra.mxu1 %v3256_v3  ;;  %v3451_v3 = vld [vmem:[#allocation5 + $0x190] sm:$0xff] }
 0xb6d   :  { %3019 = vmax.xlane.f32.xlu0 %v3018_v25  ;;  %5597 = vmatprep.subr.mxu1 %v3255_v19 }
 0xb6e   :  { %5598 = vmatpush3.msra.mxu1 %v3255_v19  ;;  %v3450_v19 = vld [vmem:[#allocation5 + $0x188] sm:$0xff] }
 0xbf4   :  { %v3023_v8 = vpop.xlane.xlu1 %3022 }
 0xbf5   :  { %v3025_v9 = vmax.f32 %v3023_v8, -1e+20 }
 0xbf6   :  { %v3020_v18 = vpop.xlane.xlu0 %3019 }
 0xbf7   :  { %v3027_v11 = vsub.f32 %v3015_v4, %v3025_v9  ;;  %v3024_v13 = vmax.f32 %v3020_v18, -1e+20  ;;  %v6728_v4 = vld [vmem:[#allocation5 + $0x198] sm:$0xff] }
 0xbf8   :  { %5613 = vmatprep.subr.mxu1 %v6728_v4 }
 0xbf9   :  { %v3026_v63 = vsub.f32 %v3010_v6, %v3024_v13  ;;  %v3030_v2 = vmul.f32 1.442695, %v3027_v11 }
 0xbfb   :  { %v3028_v35 = vmul.f32 1.442695, %v3026_v63  ;;  %v6734_v63 = vld [vmem:[%s6829_s4 + $0x3] ss:$0 sm:$0xff] }
 0xbfd   :  { %5828 = vpow2.f32 %v3028_v35 }
 0xbfe   :  { %5830 = vpow2.f32 %v3030_v2 }
 0xc0a   :  { %v5829_v61 = vpop.eup %5828 }
 0xc0b   :  { %v5831_v59 = vpop.eup %5830  ;;  %5577 = vmatprep.mubr.msk.f32.mxu0 %vm382_vm1, %v5829_v61 }
 0xc0c   :  { %5578 = vmatmul.mubr.msk.f32.vlgmr.msra.gmra.mxu0 %vm382_vm1, %v5831_v59 }
 0xc0d   :  { %5581 = vmatpush3.msra.mxu0 %v6640_v56 }
 0xc0e   :  { %5582 = vmatprep.subr.mxu0 %v2917_v16 }
 0xc0f   :  { %5583 = vmatpush3.msra.mxu0 %v2917_v16 }
 0xc10   :  { %5584 = vmatprep.subr.mxu0 %v2746_v21 }
 0xc11   :  { %5585 = vmatpush3.msra.mxu0 %v2746_v21 }
 0xc12   :  { %5586 = vmatprep.subr.mxu0 %v2741_v22 }
 0xc13   :  { %5587 = vmatpush3.msra.mxu0 %v2741_v22 }
 0xc14   :  { %5602 = vmatprep.subr.mxu0 %v4842_v23 }
 0xccc   :  { %v5579_v47 = vpop.f32.mrf.mxu0 }
 0xccd   :  { %v3114_v24 = vmax.f32 %v5579_v47, 1e-30 }
 0xcce   :  { %v3104_v51 = vpop.f32.mrf.mxu0 }
 0xccf   :  { %v3113_v27 = vmax.f32 %v3104_v51, 1e-30  ;;  %5832 = vrcp.f32 %v3114_v24 }
 0xcd1   :  { %5834 = vrcp.f32 %v3113_v27 }
 0xcdc   :  { %v5833_v56 = vpop.eup %5832 }
 0xcdd   :  { %v3118_v54 = vmul.f32 %v5833_v56, %v5831_v59 }
 0xcde   :  { %v5835_v12 = vpop.eup %5834 }
 0xcdf   :  { %v3117_v29 = vmul.f32 %v5835_v12, %v5829_v61 }
 0xce1   :  { %5588 = vmatprep.mubr.msk.f32.mxu0 %vm382_vm1, %v3117_v29 }
 0xce2   :  { %5589 = vmatmul.mubr.msk.f32.vlgmr.msra.gmra.mxu0 %vm382_vm1, %v3118_v54 }
 0xce3   :  { %5603 = vmatpush3.msra.mxu0 %v4842_v23  ;;  %5610 = vmatprep.mubr.msk.f32.mxu0 %vm382_vm1, %v6692_v28 }
 0xce4   :  { %5604 = vmatprep.subr.mxu0 %v4841_v20 }
 0xce5   :  { %5605 = vmatpush3.msra.mxu0 %v4841_v20 }
 0xce6   :  { %5606 = vmatprep.subr.mxu0 %v4840_v37 }
 0xce7   :  { %5607 = vmatpush3.msra.mxu0 %v4840_v37 }
 0xce8   :  { %5608 = vmatprep.subr.mxu0 %v4839_v52 }
 0xce9   :  { %5609 = vmatpush3.msra.mxu0 %v4839_v52 }
 0xcea   :  { %5611 = vmatmul.mubr.msk.f32.vlgmr.msra.gmra.mxu0 %vm382_vm1, %v6710_v44  ;;  %5624 = vmatprep.subr.mxu0 %v3546_v42 }
 0xceb   :  { %5625 = vmatpush3.msra.mxu0 %v3546_v42  ;;  %5632 = vmatprep.mubr.msk.f32.mxu0 %vm382_vm1, %v6713_v48 }
 0xcec   :  { %5626 = vmatprep.subr.mxu0 %v3545_v49 }
 0xced   :  { %5627 = vmatpush3.msra.mxu0 %v3545_v49 }
 0xcee   :  { %5628 = vmatprep.subr.mxu0 %v3544_v39 }
 0xcef   :  { %5629 = vmatpush3.msra.mxu0 %v3544_v39 }
 0xcf0   :  { %5630 = vmatprep.subr.mxu0 %v3543_v50 }
 0xcf1   :  { %5631 = vmatpush3.msra.mxu0 %v3543_v50 }
 0xcf2   :  { %5633 = vmatmul.mubr.msk.f32.vlgmr.msra.gmra.mxu0 %vm382_vm1, %v6720_v57  ;;  %5646 = vmatprep.subr.mxu0 %v3722_v55 }
 0xcf3   :  { %5647 = vmatpush3.msra.mxu0 %v3722_v55  ;;  %5654 = vmatprep.mubr.msk.f32.mxu0 %vm382_vm1, %v6713_v48 }
 0xcf4   :  { %5648 = vmatprep.subr.mxu0 %v3721_v31 }
 0xcf5   :  { %5649 = vmatpush3.msra.mxu0 %v3721_v31 }
 0xcf6   :  { %5650 = vmatprep.subr.mxu0 %v3720_v34 }
 0xcf7   :  { %5651 = vmatpush3.msra.mxu0 %v3720_v34 }
 0xcf8   :  { %5652 = vmatprep.subr.mxu0 %v3719_v43 }
 0xcf9   :  { %5653 = vmatpush3.msra.mxu0 %v3719_v43 }
 0xcfa   :  { %5655 = vmatmul.mubr.msk.f32.vlgmr.msra.gmra.mxu0 %vm382_vm1, %v6720_v57 }
 0xda2   :  { %v5590_v5 = vpop.f32.mrf.mxu0 }
 0xda3   :  { %v3203_v6 = vmul.f32 0.70710677, %v5590_v5  ;;  %v3201_v43 = vmul.f32 0.5, %v5590_v5  ;;  %v3633_v5 = vld [vmem:[#allocation5 + $0x1b0] sm:$0xff] }
 0xda4   :  { %v3191_v14 = vpop.f32.mrf.mxu0 }
 0xda5   :  { %v3205_v25 = vand.u32 2147483647, %v3203_v6  ;;  %v3202_v8 = vmul.f32 0.70710677, %v3191_v14  ;;  %vm3245_vm7 = vcmp.ge.f32.partialorder %v3203_v6, 0.0  ;;  %v3200_v31 = vmul.f32 0.5, %v3191_v14 }
 0xda6   :  { %v3449_v6 = vld [vmem:[#allocation5 + $0x180] sm:$0xff]  ;;  %v3634_v14 = vld [vmem:[#allocation5 + $0x1b8] sm:$0xff] }
 0xda7   :  { %v3207_v9 = vmul.f32 0.3275911, %v3205_v25  ;;  %v3204_v18 = vand.u32 2147483647, %v3202_v8  ;;  %v3233_v61 = vsub.f32 0.0, %v3205_v25  ;;  %vm3244_vm8 = vcmp.ge.f32.partialorder %v3202_v8, 0.0 }
 0xda8   :  { %v3810_v8 = vld [vmem:[#allocation5 + $0x1d8] sm:$0xff] }
 0xda9   :  { %v3209_v11 = vadd.f32 1.0, %v3207_v9  ;;  %v3206_v13 = vmul.f32 0.3275911, %v3204_v18  ;;  %v3232_v59 = vsub.f32 0.0, %v3204_v18  ;;  %v3235_v15 = vmul.f32 %v3233_v61, %v3205_v25  ;;  %v3631_v25 = vld [vmem:[#allocation5 + $0x1a0] sm:$0xff]  ;;  %v3904_v9 = vld [vmem:[#allocation8 + $0x1d8] sm:$0xff] }
 0xdaa   :  { %v5612_v2 = vpop.f32.mrf.mxu0  ;;  %5668 = vmatprep.subr.mxu0 %v3904_v9  ;;  %v4080_v61 = vld [vmem:[#allocation8 + $0x1f8] sm:$0xff] }
 0xdab   :  { %5836 = vrcp.f32 %v3209_v11  ;;  %v3208_v35 = vadd.f32 1.0, %v3206_v13  ;;  %v6737_v0 = vadd.f32 %v5612_v2, %v6734_v63  ;;  %v3234_v21 = vmul.f32 %v3232_v59, %v3204_v18  ;;  %5669 = vmatpush3.msra.mxu0 %v3904_v9  ;;  %v3809_v18 = vld [vmem:[#allocation5 + $0x1d0] sm:$0xff]  ;;  %v3903_v11 = vld [vmem:[#allocation8 + $0x1d0] sm:$0xff]  ;;  %v3902_v13 = vld [vmem:[#allocation8 + $0x1c8] sm:$0xff] }
 0xdac   :  { %v3238_v23 = vmul.f32 1.442695, %v3235_v15  ;;  %5670 = vmatprep.subr.mxu0 %v3903_v11  ;;  %v3807_v2 = vld [vmem:[#allocation5 + $0x1c0] sm:$0xff]  ;;  %v4836_v59 = vld [vmem:[%s6835_s10 + $0x2] ss:$0 sm:$0xff] }
 0xdad   :  { %5838 = vrcp.f32 %v3208_v35  ;;  %v3236_v27 = vmul.f32 1.442695, %v3234_v21  ;;  %5671 = vmatpush3.msra.mxu0 %v3903_v11  ;;  %v3992_v35 = vld [vmem:[#allocation5 + $0x1f8] sm:$0xff] }
 0xdae   :  { %5840 = vpow2.f32 %v3238_v23  ;;  %5672 = vmatprep.subr.mxu0 %v3902_v13 }
 0xdaf   :  { %5842 = vpow2.f32 %v3236_v27  ;;  %5673 = vmatpush3.msra.mxu0 %v3902_v13 }
 0xdb8   :  { %v5837_v16 = vpop.eup %5836 }
 0xdb9   :  { %v3215_v22 = vmul.f32 1.0614054, %v5837_v16 }
 0xdba   :  { %v5839_v47 = vpop.eup %5838 }
 0xdbb   :  { %v3217_v24 = vadd.f32 -1.4531521, %v3215_v22  ;;  %v3214_v51 = vmul.f32 1.0614054, %v5839_v47  ;;  %v5841_v17 = vpop.eup %5840 }
 0xdbc   :  { %v5843_v38 = vpop.eup %5842 }
 0xdbd   :  { %v3219_v40 = vmul.f32 %v5837_v16, %v3217_v24  ;;  %v3216_v46 = vadd.f32 -1.4531521, %v3214_v51  ;;  %v3350_v24 = vmul.f32 0.26894143, %v6389_v60  ;;  %v3351_v51 = vmul.f32 0.26894143, %v6391_v62 }
 0xdbe   :  { %v3990_v60 = vld [vmem:[#allocation5 + $0x1e8] sm:$0xff]  ;;  %v3989_v62 = vld [vmem:[#allocation5 + $0x1e0] sm:$0xff] }
 0xdbf   :  { %v3221_v56 = vadd.f32 1.4214138, %v3219_v40  ;;  %v3218_v7 = vmul.f32 %v5839_v47, %v3216_v46  ;;  %v3991_v46 = vld [vmem:[#allocation5 + $0x1f0] sm:$0xff] }
 0xdc1   :  { %v3223_v12 = vmul.f32 %v5837_v16, %v3221_v56  ;;  %v3220_v30 = vadd.f32 1.4214138, %v3218_v7  ;;  %v4079_v56 = vld [vmem:[#allocation8 + $0x1f0] sm:$0xff]  ;;  %v4078_v7 = vld [vmem:[#allocation8 + $0x1e8] sm:$0xff] }
 0xdc3   :  { %v3225_v29 = vadd.f32 -0.28449672, %v3223_v12  ;;  %v3222_v32 = vmul.f32 %v5839_v47, %v3220_v30  ;;  %v4077_v12 = vld [vmem:[#allocation8 + $0x1e0] sm:$0xff]  ;;  %v3439_v30 = vpop.f32.mrf.mxu0 }
 0xdc5   :  { %v3227_v33 = vmul.f32 %v5837_v16, %v3225_v29  ;;  %v3224_v54 = vadd.f32 -0.28449672, %v3222_v32  ;;  %v3440_v29 = vadd.f32 %v6734_v63, %v3439_v30  ;;  %v5860_v32 = vld [vmem:[#allocation17 + $0x38] sm:$0xff] }
 0xdc6   :  { %v5864_v63 = vld [vmem:[#allocation17 + $0x18] sm:$0xff] }
 0xdc7   :  { %v3229_v26 = vadd.f32 0.2548296, %v3227_v33  ;;  %v3226_v20 = vmul.f32 %v5839_v47, %v3224_v54  ;;  %v5861_v33 = vld [vmem:[#allocation17 + $0x30] sm:$0xff]  ;;  %v5862_v54 = vld [vmem:[#allocation17 + $0x28] sm:$0xff] }
 0xdc9   :  { %v3231_v37 = vmul.f32 %v5837_v16, %v3229_v26  ;;  %v3228_v53 = vadd.f32 0.2548296, %v3226_v20  ;;  %v5863_v26 = vld [vmem:[#allocation17 + $0x20] sm:$0xff]  ;;  %v5865_v20 = vld [vmem:[#allocation17 + $0x10] sm:$0xff] }
 0xdcb   :  { %v3241_v52 = vmul.f32 %v5841_v17, %v3231_v37  ;;  %v3230_v36 = vmul.f32 %v5839_v47, %v3228_v53  ;;  %v5866_v37 = vld [vmem:[#allocation17 + $0x8] sm:$0xff]  ;;  %v5867_v17 = vld [vmem:[#allocation17] sm:$0xff]  ;;  %v6765_v53 = vpop.f32.mrf.mxu0 }
 0xdcd   :  { %v3243_v42 = vsub.f32 1.0, %v3241_v52  ;;  %v3240_v10 = vmul.f32 %v5843_v38, %v3230_v36  ;;  %v6767_v36 = vpop.f32.mrf.mxu0 }
 0xdcf   :  { %v3247_v49 = vsub.f32 0.0, %v3243_v42  ;;  %v3242_v39 = vsub.f32 1.0, %v3240_v10 }
 0xdd1   :  { %v3249_v45 = vsel %vm3245_vm7, %v3243_v42, %v3247_v49  ;;  %v3246_v50 = vsub.f32 0.0, %v3242_v39  ;;  %v6769_v42 = vpop.f32.mrf.mxu0 }
 0xdd2   :  { %v3251_v41 = vadd.f32 1.0, %v3249_v45 }
 0xdd3   :  { %v3248_v55 = vsel %vm3244_vm8, %v3242_v39, %v3246_v50  ;;  %v6771_v49 = vpop.f32.mrf.mxu0 }
 0xdd4   :  { %v3250_v34 = vadd.f32 1.0, %v3248_v55  ;;  %v3253_v1 = vmul.f32 %v3251_v41, %v3201_v43 }
 0xdd6   :  { %v3252_v58 = vmul.f32 %v3250_v34, %v3200_v31  ;;  %v4865_v31 = vld [vmem:[#allocation7 + $0xf] ss:$0 sm:$0xff]  ;;  %v4868_v34 = vld [vmem:[#allocation10 + $0xf] ss:$0 sm:$0xff] }
 0xdd8   :  { %5599 = vmatprep.mubr.msk.f32.mxu1 %vm382_vm1, %v3252_v58 }
 0xdd9   :  { %5600 = vmatmul.mubr.msk.f32.vlgmr.msra.gmra.mxu1 %vm382_vm1, %v3253_v1 }
 0xdda   :  { %5614 = vmatpush3.msra.mxu1 %v6728_v4  ;;  %5621 = vmatprep.mubr.msk.f32.mxu1 %vm382_vm1, %v6713_v48  ;;  %v3632_v4 = vld [vmem:[#allocation5 + $0x1a8] sm:$0xff] }
 0xddb   :  { %5615 = vmatprep.subr.mxu1 %v3451_v3 }
 0xddc   :  { %5616 = vmatpush3.msra.mxu1 %v3451_v3 }
 0xddd   :  { %5617 = vmatprep.subr.mxu1 %v3450_v19 }
 0xdde   :  { %5618 = vmatpush3.msra.mxu1 %v3450_v19 }
 0xddf   :  { %5619 = vmatprep.subr.mxu1 %v3449_v6 }
 0xde0   :  { %5620 = vmatpush3.msra.mxu1 %v3449_v6 }
 0xde1   :  { %5622 = vmatmul.mubr.msk.f32.vlgmr.msra.gmra.mxu1 %vm382_vm1, %v6720_v57  ;;  %5635 = vmatprep.subr.mxu1 %v3634_v14 }
 0xde2   :  { %5636 = vmatpush3.msra.mxu1 %v3634_v14  ;;  %5643 = vmatprep.mubr.msk.f32.mxu1 %vm382_vm1, %v6713_v48  ;;  %v3808_v48 = vld [vmem:[#allocation5 + $0x1c8] sm:$0xff] }
 0xde3   :  { %5637 = vmatprep.subr.mxu1 %v3633_v5  ;;  %v4859_v14 = vld [vmem:[#allocation7 + $0xe] ss:$0 sm:$0xff] }
 0xde4   :  { %5638 = vmatpush3.msra.mxu1 %v3633_v5 }
 0xde5   :  { %5639 = vmatprep.subr.mxu1 %v3632_v4 }
 0xde6   :  { %5640 = vmatpush3.msra.mxu1 %v3632_v4 }
 0xde7   :  { %5641 = vmatprep.subr.mxu1 %v3631_v25 }
 0xde8   :  { %5642 = vmatpush3.msra.mxu1 %v3631_v25  ;;  %v4853_v25 = vld [vmem:[#allocation7 + $0xd] ss:$0 sm:$0xff] }
 0xde9   :  { %5644 = vmatmul.mubr.msk.f32.vlgmr.msra.gmra.mxu1 %vm382_vm1, %v6720_v57  ;;  %5657 = vmatprep.subr.mxu1 %v3810_v8  ;;  %v3901_v57 = vld [vmem:[#allocation8 + $0x1c0] sm:$0xff] }
 0xdea   :  { %5658 = vmatpush3.msra.mxu1 %v3810_v8  ;;  %5674 = vmatprep.subr.mxu0 %v3901_v57 }
 0xdeb   :  { %5659 = vmatprep.subr.mxu1 %v3809_v18  ;;  %5675 = vmatpush3.msra.mxu0 %v3901_v57 }
 0xdec   :  { %5660 = vmatpush3.msra.mxu1 %v3809_v18  ;;  %5690 = vmatprep.subr.mxu0 %v4080_v61  ;;  %v4847_v18 = vld [vmem:[#allocation7 + $0xc] ss:$0 sm:$0xff] }
 0xded   :  { %5661 = vmatprep.subr.mxu1 %v3808_v48 }
 0xdee   :  { %5662 = vmatpush3.msra.mxu1 %v3808_v48 }
 0xdef   :  { %5663 = vmatprep.subr.mxu1 %v3807_v2 }
 0xdf0   :  { %5664 = vmatpush3.msra.mxu1 %v3807_v2  ;;  %v5868_v2 = vld [vmem:[#allocation13 + $0x8] sm:$0xff] }
 0xdf1   :  { %5679 = vmatprep.subr.mxu1 %v3992_v35 }
 0xe99   :  { %v5601_v15 = vpop.f32.mrf.mxu1 }
 0xe9a   :  { %v3345_v16 = vadd.f32 %v5601_v15, %v4836_v59 }
 0xe9b   :  { %v3339_v21 = vpop.f32.mrf.mxu1 }
 0xe9c   :  { %v3340_v22 = vadd.f32 %v4836_v59, %v3339_v21  ;;  %v3349_v23 = vmul.f32 0.7310586, %v3345_v16 }
 0xe9e   :  { %v3348_v47 = vmul.f32 0.7310586, %v3340_v22  ;;  %v3353_v40 = vadd.f32 %v3351_v51, %v3349_v23 }
 0xea0   :  { %v3352_v27 = vadd.f32 %v3350_v24, %v3348_v47 }
 0xea1   :  { %v5623_v52 = vpop.f32.mrf.mxu1 }
 0xea2   :  { %5665 = vmatprep.mubr.msk.f32.mxu1 %vm382_vm1, %v3352_v27  ;;  %5676 = vmatprep.mubr.msk.f32.mxu0 %vm382_vm1, %v3352_v27  ;;  %v3539_v11 = vadd.f32 %v5623_v52, %v4847_v18 }
 0xea3   :  { %5666 = vmatmul.mubr.msk.f32.vlgmr.msra.gmra.mxu1 %vm382_vm1, %v3353_v40  ;;  %5677 = vmatmul.mubr.msk.f32.vlgmr.msra.gmra.mxu0 %vm382_vm1, %v3353_v40  ;;  %v3533_v38 = vpop.f32.mrf.mxu1 }
 0xea4   :  { %5680 = vmatpush3.msra.mxu1 %v3992_v35  ;;  %5691 = vmatpush3.msra.mxu0 %v4080_v61  ;;  %v3534_v48 = vadd.f32 %v4847_v18, %v3533_v38  ;;  %v5869_v61 = vld [vmem:[#allocation13] sm:$0xff] }
 0xea5   :  { %5681 = vmatprep.subr.mxu1 %v3991_v46  ;;  %5687 = vmatprep.mubr.msk.f32.mxu1 %vm382_vm1, %v3352_v27 }
 0xea6   :  { %5692 = vmatprep.subr.mxu0 %v4079_v56  ;;  %5698 = vmatprep.mubr.msk.f32.mxu0 %vm382_vm1, %v3352_v27 }
 0xea7   :  { %5682 = vmatpush3.msra.mxu1 %v3991_v46  ;;  %5693 = vmatpush3.msra.mxu0 %v4079_v56 }
 0xea8   :  { %5683 = vmatprep.subr.mxu1 %v3990_v60  ;;  %5694 = vmatprep.subr.mxu0 %v4078_v7 }
 0xea9   :  { %5684 = vmatpush3.msra.mxu1 %v3990_v60  ;;  %5695 = vmatpush3.msra.mxu0 %v4078_v7  ;;  %v5645_v10 = vpop.f32.mrf.mxu1  ;;  %v4862_v60 = vld [vmem:[#allocation10 + $0xe] ss:$0 sm:$0xff] }
 0xeaa   :  { %5685 = vmatprep.subr.mxu1 %v3989_v62  ;;  %5696 = vmatprep.subr.mxu0 %v4077_v12  ;;  %v3715_v8 = vadd.f32 %v5645_v10, %v4853_v25 }
 0xeab   :  { %5686 = vmatpush3.msra.mxu1 %v3989_v62  ;;  %5697 = vmatpush3.msra.mxu0 %v4077_v12  ;;  %v3709_v39 = vpop.f32.mrf.mxu1  ;;  %v4856_v12 = vld [vmem:[#allocation10 + $0xd] ss:$0 sm:$0xff] }
 0xeac   :  { %5688 = vmatmul.mubr.msk.f32.vlgmr.msra.gmra.mxu1 %vm382_vm1, %v3353_v40  ;;  %5699 = vmatmul.mubr.msk.f32.vlgmr.msra.gmra.mxu0 %vm382_vm1, %v3353_v40  ;;  %v3710_v9 = vadd.f32 %v4853_v25, %v3709_v39  ;;  %v4506_v39 = vld [vmem:[#allocation11 + $0x60] sm:$0xff] }
 0xead   :  { %5717 = vmatprep.mubr.msk.f32.mxu1 %vm382_vm1, %v3440_v29  ;;  %5720 = vmatprep.subr.mxu0 %v5860_v32  ;;  %v3803_v29 = vadd.f32 %v6769_v42, %v4856_v12 }
 0xeae   :  { %5721 = vmatpush3.msra.mxu0 %v5860_v32  ;;  %v4850_v32 = vld [vmem:[#allocation10 + $0xc] ss:$0 sm:$0xff] }
 0xeaf   :  { %5722 = vmatprep.subr.mxu0 %v5861_v33 }
 0xeb0   :  { %5723 = vmatpush3.msra.mxu0 %v5861_v33  ;;  %v3798_v33 = vadd.f32 %v4856_v12, %v6771_v49  ;;  %v4507_v49 = vld [vmem:[#allocation11 + $0x68] sm:$0xff] }
 0xeb1   :  { %5724 = vmatprep.subr.mxu0 %v5862_v54 }
 0xeb2   :  { %5725 = vmatpush3.msra.mxu0 %v5862_v54  ;;  %v3627_v54 = vadd.f32 %v6765_v53, %v4850_v32  ;;  %v4509_v53 = vld [vmem:[#allocation11 + $0x78] sm:$0xff] }
 0xeb3   :  { %5726 = vmatprep.subr.mxu0 %v5863_v26 }
 0xeb4   :  { %5727 = vmatpush3.msra.mxu0 %v5863_v26  ;;  %v3622_v26 = vadd.f32 %v4850_v32, %v6767_v36  ;;  %v4508_v36 = vld [vmem:[#allocation11 + $0x70] sm:$0xff] }
 0xeb5   :  { %5728 = vmatprep.subr.mxu0 %v5864_v63 }
 0xeb6   :  { %5729 = vmatpush3.msra.mxu0 %v5864_v63 }
 0xeb7   :  { %5730 = vmatprep.subr.mxu0 %v5865_v20 }
 0xeb8   :  { %5731 = vmatpush3.msra.mxu0 %v5865_v20 }
 0xeb9   :  { %5732 = vmatprep.subr.mxu0 %v5866_v37 }
 0xeba   :  { %5733 = vmatpush3.msra.mxu0 %v5866_v37 }
 0xebb   :  { %5734 = vmatprep.subr.mxu0 %v5867_v17 }
 0xebc   :  { %5735 = vmatpush3.msra.mxu0 %v5867_v17 }
 0xf63   :  { %v5667_v45 = vpop.f32.mrf.mxu1  ;;  %v6773_v50 = vpop.f32.mrf.mxu0 }
 0xf64   :  { %v3897_v5 = vadd.f32 %v5667_v45, %v4859_v14  ;;  %v3985_v62 = vadd.f32 %v6773_v50, %v4862_v60 }
 0xf65   :  { %v3891_v41 = vpop.f32.mrf.mxu1  ;;  %v6775_v55 = vpop.f32.mrf.mxu0 }
 0xf66   :  { %v3892_v4 = vadd.f32 %v4859_v14, %v3891_v41  ;;  %v3980_v30 = vadd.f32 %v4862_v60, %v6775_v55 }
 0xf6c   :  { %v5689_v43 = vpop.f32.mrf.mxu1  ;;  %v5700_v58 = vpop.f32.mrf.mxu0 }
 0xf6d   :  { %v4073_v1 = vadd.f32 %v5689_v43, %v4865_v31  ;;  %v4161_v3 = vadd.f32 %v5700_v58, %v4868_v34 }
 0xf6e   :  { %v4067_v19 = vpop.f32.mrf.mxu1  ;;  %v4155_v40 = vpop.f32.mrf.mxu0 }
 0xf6f   :  { %v4068_v6 = vadd.f32 %v4865_v31, %v4067_v19  ;;  %5701 = vmatprep.subr.msk.mxu1 %vm382_vm1, %v4073_v1  ;;  %5739 = vmatprep.subr.mxu0 %v4161_v3  ;;  %v4156_v7 = vadd.f32 %v4868_v34, %v4155_v40 }
 0xf70   :  { %5702 = vmatpush3.xpose.msk.msra.mxu1 %vm382_vm1, %v4073_v1 }
 0xf71   :  { %5703 = vmatprep.subr.msk.mxu1 %vm382_vm1, %v4068_v6 }
 0xf74   :  { %5704 = vmatpush3.xpose.msk.msra.mxu1 %vm382_vm1, %v4068_v6 }
 0xf75   :  { %5705 = vmatprep.subr.msk.mxu1 %vm382_vm1, %v3897_v5 }
 0xf78   :  { %5706 = vmatpush3.xpose.msk.msra.mxu1 %vm382_vm1, %v3897_v5 }
 0xf79   :  { %5707 = vmatprep.subr.msk.mxu1 %vm382_vm1, %v3892_v4 }
 0xf7c   :  { %5708 = vmatpush3.xpose.msk.msra.mxu1 %vm382_vm1, %v3892_v4 }
 0xf7d   :  { %5709 = vmatprep.subr.msk.mxu1 %vm382_vm1, %v3715_v8 }
 0xf80   :  { %5710 = vmatpush3.xpose.msk.msra.mxu1 %vm382_vm1, %v3715_v8 }
 0xf81   :  { %5711 = vmatprep.subr.msk.mxu1 %vm382_vm1, %v3710_v9 }
 0xf84   :  { %5712 = vmatpush3.xpose.msk.msra.mxu1 %vm382_vm1, %v3710_v9 }
 0xf85   :  { %5713 = vmatprep.subr.msk.mxu1 %vm382_vm1, %v3539_v11 }
 0xf88   :  { %5714 = vmatpush3.xpose.msk.msra.mxu1 %vm382_vm1, %v3539_v11 }
 0xf89   :  { %5715 = vmatprep.subr.msk.mxu1 %vm382_vm1, %v3534_v48 }
 0xf8c   :  { %5716 = vmatpush3.xpose.msk.msra.mxu1 %vm382_vm1, %v3534_v48 }
 0xf8d   :  { %5758 = vmatprep.subr.mxu1 %v4509_v53 }
 0xf8f   :  { %5718 = vmatmul.mubr.msk.f32.vlgmr.msra.gmra.mxu1 %vm382_vm1, %v6737_v0 }
 0xf90   :  { %5759 = vmatpush3.msra.mxu1 %v4509_v53 }
 0xf91   :  { %5760 = vmatprep.subr.mxu1 %v4508_v36 }
 0xf92   :  { %5761 = vmatpush3.msra.mxu1 %v4508_v36 }
 0xf93   :  { %5762 = vmatprep.subr.mxu1 %v4507_v49 }
 0xf94   :  { %5763 = vmatpush3.msra.mxu1 %v4507_v49 }
 0xf95   :  { %5764 = vmatprep.subr.mxu1 %v4506_v39 }
 0xf96   :  { %5765 = vmatpush3.msra.mxu1 %v4506_v39 }
0x104f   :  { %v5719_v13 = vpop.f32.mrf.mxu1 }
0x1050   :  { %v4266_v57 = vadd.f32 %v5868_v2, %v5719_v13 }
0x1051   :  { %v4260_v35 = vpop.f32.mrf.mxu1 }
0x1052   :  { %v4261_v59 = vadd.f32 %v5869_v61, %v4260_v35  ;;  %v4272_v15 = vsel %vm1285_vm2, %v4266_v57, -inf }
0x1053   :  { %4273 = vmax.xlane.f32.xlu1 %v4272_v15 }
0x1054   :  { %v4269_v16 = vsel %vm1285_vm2, %v4261_v59, -inf }
0x1055   :  { %4270 = vmax.xlane.f32.xlu0 %v4269_v16 }
0x10dc   :  { %v4274_v21 = vpop.xlane.xlu1 %4273 }
0x10dd   :  { %v4276_v22 = vmax.f32 %v4274_v21, -1e+20 }
0x10de   :  { %v4271_v23 = vpop.xlane.xlu0 %4270 }
0x10df   :  { %v4278_v47 = vsub.f32 %v4266_v57, %v4276_v22  ;;  %v4275_v24 = vmax.f32 %v4271_v23, -1e+20 }
0x10e1   :  { %v4277_v51 = vsub.f32 %v4261_v59, %v4275_v24  ;;  %v4281_v27 = vmul.f32 1.442695, %v4278_v47 }
0x10e3   :  { %v4279_v0 = vmul.f32 1.442695, %v4277_v51 }
0x10e5   :  { %5844 = vpow2.f32 %v4279_v0 }
0x10e6   :  { %5846 = vpow2.f32 %v4281_v27 }
0x10f2   :  { %v5845_v46 = vpop.eup %5844 }
0x10f3   :  { %v5847_v56 = vpop.eup %5846  ;;  %5736 = vmatprep.mubr.msk.f32.mxu0 %vm1285_vm2, %v5845_v46 }
0x10f4   :  { %5737 = vmatmul.mubr.msk.f32.vlgmr.msra.gmra.mxu0 %vm1285_vm2, %v5847_v56 }
0x10f5   :  { %5740 = vmatpush3.msra.mxu0 %v4161_v3 }
0x10f6   :  { %5741 = vmatprep.subr.mxu0 %v4156_v7 }
0x10f7   :  { %5742 = vmatpush3.msra.mxu0 %v4156_v7 }
0x10f8   :  { %5743 = vmatprep.subr.mxu0 %v3985_v62 }
0x10f9   :  { %5744 = vmatpush3.msra.mxu0 %v3985_v62 }
0x10fa   :  { %5745 = vmatprep.subr.mxu0 %v3980_v30 }
0x10fb   :  { %5746 = vmatpush3.msra.mxu0 %v3980_v30 }
0x10fc   :  { %5747 = vmatprep.subr.mxu0 %v3803_v29 }
0x10fd   :  { %5748 = vmatpush3.msra.mxu0 %v3803_v29 }
0x10fe   :  { %5749 = vmatprep.subr.mxu0 %v3798_v33 }
0x10ff   :  { %5750 = vmatpush3.msra.mxu0 %v3798_v33 }
0x1100   :  { %5751 = vmatprep.subr.mxu0 %v3627_v54 }
0x1101   :  { %5752 = vmatpush3.msra.mxu0 %v3627_v54 }
0x1102   :  { %5753 = vmatprep.subr.mxu0 %v3622_v26 }
0x1103   :  { %5754 = vmatpush3.msra.mxu0 %v3622_v26 }
0x11b4   :  { %v5738_v63 = vpop.f32.mrf.mxu0 }
0x11b5   :  { %v4365_v20 = vmax.f32 %v5738_v63, 1e-30 }
0x11b6   :  { %v4355_v37 = vpop.f32.mrf.mxu0 }
0x11b7   :  { %v4364_v17 = vmax.f32 %v4355_v37, 1e-30  ;;  %5848 = vrcp.f32 %v4365_v20  ;;  %v4608_v37 = vld [vmem:[#allocation19 + $0x18] sm:$0xff] }
0x11b8   :  { %5769 = vmatprep.subr.mxu0 %v4608_v37 }
0x11b9   :  { %5850 = vrcp.f32 %v4364_v17  ;;  %v4607_v17 = vld [vmem:[#allocation19 + $0x10] sm:$0xff] }
0x11c4   :  { %v5849_v52 = vpop.eup %5848 }
0x11c5   :  { %v4369_v10 = vmul.f32 %v5849_v52, %v5847_v56  ;;  %v4606_v52 = vld [vmem:[#allocation19 + $0x8] sm:$0xff] }
0x11c6   :  { %v5851_v38 = vpop.eup %5850 }
0x11c7   :  { %v4368_v42 = vmul.f32 %v5851_v38, %v5845_v46  ;;  %v4605_v38 = vld [vmem:[#allocation19] sm:$0xff] }
0x11c9   :  { %5755 = vmatprep.mubr.msk.f32.mxu0 %vm1285_vm2, %v4368_v42  ;;  %v4886_v42 = vld [vmem:[%s6835_s10 + $0x3] ss:$0 sm:$0xff]  ;;  %s6139_s10 = smov [#allocation20]  }
0x11ca   :  { %5756 = vmatmul.mubr.msk.f32.vlgmr.msra.gmra.mxu0 %vm1285_vm2, %v4369_v10  ;;  %s4704_s13 = sshll.u32 %s6139_s10, 4  ;;  %s4705_s13 = int_to_ptr.vmem [resolvable:$true] %s4704_s13 }
0x11cb   :  { %5770 = vmatpush3.msra.mxu0 %v4608_v37  ;;  %s6090_s0 = scalar_lea.vmem %s4705_s13, 256  ;;  %p6095_p0 = scmp.lt.s32.totalorder %s4705_s13, %s4705_s13 }
0x11cc   :  { %5771 = vmatprep.subr.mxu0 %v4607_v17  ;;  %p6091_p13 = scmp.ne.s32.totalorder %s4705_s13, %s6090_s0  ;;  %p6096_p1 = scmp.lt.s32.totalorder %s6090_s0, %s6090_s0 }
0x11cd   :  { %5772 = vmatpush3.msra.mxu0 %v4607_v17 }
0x11ce   :  { %5773 = vmatprep.subr.mxu0 %v4606_v52  ;;  %p6097_p2 = por %p6096_p1, %p6095_p0 }
0x11cf   :  { %5774 = vmatpush3.msra.mxu0 %v4606_v52 }
0x11d0   :  { %5775 = vmatprep.subr.mxu0 %v4605_v38  ;;  %p6098_p3 = pnand %p6097_p2, %p6091_p13 }
0x11d1   :  { %5776 = vmatpush3.msra.mxu0 %v4605_v38 }
0x128a   :  { %v5757_v45 = vpop.f32.mrf.mxu0 }
0x128b   :  { %v4454_v50 = vmul.f32 0.70710677, %v5757_v45  ;;  %v4452_v26 = vmul.f32 0.5, %v5757_v45 }
0x128c   :  { %v4442_v41 = vpop.f32.mrf.mxu0 }
0x128d   :  { %v4456_v55 = vand.u32 2147483647, %v4454_v50  ;;  %v4453_v31 = vmul.f32 0.70710677, %v4442_v41  ;;  %vm4496_vm9 = vcmp.ge.f32.partialorder %v4454_v50, 0.0  ;;  %v4451_v33 = vmul.f32 0.5, %v4442_v41 }
0x128e   :  { %v4601_v50 = vmul.f32 0.26894143, %v6692_v28  ;;  %v4602_v41 = vmul.f32 0.26894143, %v6710_v44 }
0x128f   :  { %v4458_v34 = vmul.f32 0.3275911, %v4456_v55  ;;  %v4455_v43 = vand.u32 2147483647, %v4453_v31  ;;  %v4484_v19 = vsub.f32 0.0, %v4456_v55  ;;  %vm4495_vm10 = vcmp.ge.f32.partialorder %v4453_v31, 0.0 }
0x1291   :  { %v4460_v58 = vadd.f32 1.0, %v4458_v34  ;;  %v4457_v1 = vmul.f32 0.3275911, %v4455_v43  ;;  %v4483_v6 = vsub.f32 0.0, %v4455_v43  ;;  %v4486_v14 = vmul.f32 %v4484_v19, %v4456_v55  ;;  %v4889_v34 = vld [vmem:[%s6842_s17] ss:$0 sm:$0xff] }
0x1293   :  { %5852 = vrcp.f32 %v4460_v58  ;;  %v4459_v3 = vadd.f32 1.0, %v4457_v1  ;;  %v4485_v4 = vmul.f32 %v4483_v6, %v4455_v43  ;;  %v4489_v8 = vmul.f32 1.442695, %v4486_v14 }
0x1295   :  { %5854 = vrcp.f32 %v4459_v3  ;;  %v4487_v48 = vmul.f32 1.442695, %v4485_v4 }
0x1296   :  { %5856 = vpow2.f32 %v4489_v8 }
0x1297   :  { %5858 = vpow2.f32 %v4487_v48 }
0x12a0   :  { %v5853_v5 = vpop.eup %5852 }
0x12a1   :  { %v4466_v25 = vmul.f32 1.0614054, %v5853_v5 }
0x12a2   :  { %v5855_v9 = vpop.eup %5854 }
0x12a3   :  { %v4468_v18 = vadd.f32 -1.4531521, %v4466_v25  ;;  %v4465_v11 = vmul.f32 1.0614054, %v5855_v9  ;;  %v5857_v51 = vpop.eup %5856 }
0x12a4   :  { %v5859_v46 = vpop.eup %5858 }
0x12a5   :  { %v4470_v13 = vmul.f32 %v5853_v5, %v4468_v18  ;;  %v4467_v2 = vadd.f32 -1.4531521, %v4465_v11 }
0x12a7   :  { %v4472_v57 = vadd.f32 1.4214138, %v4470_v13  ;;  %v4469_v35 = vmul.f32 %v5855_v9, %v4467_v2 }
0x12a9   :  { %v4474_v61 = vmul.f32 %v5853_v5, %v4472_v57  ;;  %v4471_v59 = vadd.f32 1.4214138, %v4469_v35 }
0x12ab   :  { %v4476_v15 = vadd.f32 -0.28449672, %v4474_v61  ;;  %v4473_v16 = vmul.f32 %v5855_v9, %v4471_v59 }
0x12ad   :  { %v4478_v21 = vmul.f32 %v5853_v5, %v4476_v15  ;;  %v4475_v22 = vadd.f32 -0.28449672, %v4473_v16 }
0x12af   :  { %v4480_v23 = vadd.f32 0.2548296, %v4478_v21  ;;  %v4477_v47 = vmul.f32 %v5855_v9, %v4475_v22 }
0x12b1   :  { %v4482_v24 = vmul.f32 %v5853_v5, %v4480_v23  ;;  %v4479_v27 = vadd.f32 0.2548296, %v4477_v47 }
0x12b3   :  { %v4492_v0 = vmul.f32 %v5857_v51, %v4482_v24  ;;  %v4481_v40 = vmul.f32 %v5855_v9, %v4479_v27 }
0x12b5   :  { %v4494_v56 = vsub.f32 1.0, %v4492_v0  ;;  %v4491_v60 = vmul.f32 %v5859_v46, %v4481_v40 }
0x12b7   :  { %v4498_v7 = vsub.f32 0.0, %v4494_v56  ;;  %v4493_v62 = vsub.f32 1.0, %v4491_v60 }
0x12b9   :  { %v4500_v12 = vsel %vm4496_vm9, %v4494_v56, %v4498_v7  ;;  %v4497_v30 = vsub.f32 0.0, %v4493_v62 }
0x12ba   :  { %v4502_v29 = vadd.f32 1.0, %v4500_v12 }
0x12bb   :  { %v4499_v32 = vsel %vm4495_vm10, %v4493_v62, %v4497_v30 }
0x12bc   :  { %v4501_v54 = vadd.f32 1.0, %v4499_v32  ;;  %v4504_v20 = vmul.f32 %v4502_v29, %v4452_v26 }
0x12be   :  { %v4503_v63 = vmul.f32 %v4501_v54, %v4451_v33 }
0x12c0   :  { %5766 = vmatprep.mubr.msk.f32.mxu1 %vm382_vm1, %v4503_v63 }
0x12c1   :  { %5767 = vmatmul.mubr.msk.f32.vlgmr.msra.gmra.mxu1 %vm382_vm1, %v4504_v20 }
0x1381   :  { %v5768_v10 = vpop.f32.mrf.mxu1 }
0x1382   :  { %v4596_v53 = vadd.f32 %v5768_v10, %v4886_v42 }
0x1383   :  { %v4590_v36 = vpop.f32.mrf.mxu1 }
0x1384   :  { %v4591_v49 = vadd.f32 %v4886_v42, %v4590_v36  ;;  %v4600_v39 = vmul.f32 0.7310586, %v4596_v53 }
0x1386   :  { %v4599_v45 = vmul.f32 0.7310586, %v4591_v49  ;;  %v4604_v31 = vadd.f32 %v4602_v41, %v4600_v39 }
0x1388   :  { %v4603_v55 = vadd.f32 %v4601_v50, %v4599_v45 }
0x138a   :  { %5777 = vmatprep.mubr.msk.f32.mxu0 %vm382_vm1, %v4603_v55 }
0x138b   :  { %5778 = vmatmul.mubr.msk.f32.vlgmr.msra.gmra.mxu0 %vm382_vm1, %v4604_v31 }
0x144b   :  { %v5779_v43 = vpop.f32.mrf.mxu0 }
0x144c   :  { %v4694_v58 = vadd.f32 %v5779_v43, %v4889_v34 }
0x144d   :  { %v4688_v1 = vpop.f32.mrf.mxu0 }
0x144e   :  { %4698 = vst [vmem:[#allocation20 + $0x8] sm:$0xff] %v4694_v58  ;;  %v4689_v3 = vadd.f32 %v4889_v34, %v4688_v1 }
0x1450   :  { %4697 = vst [vmem:[#allocation20] sm:$0xff] %v4689_v3 }
0x1451   :  { %6101 = shalt.err (!%p6098_p3)
}
0x1452   :  { %4710 = dma.vmem_to_hbm [thread:$0]  %s4705_s13, 256, %s6843_s18, [#allocation4], %s6126_s19, %s6126_s19, %s6127_s1  }
0x1453   :  { %6122 = dma.done.wait [#allocation4], 256  }
0x1454   :  { %6123 = vsyncadd [#allocation4], 4294967040 }
0x1455   :  { %4714 = vsyncpa [#allocation3], 1 }
0x1456   :  { %4715 = vsyncpa [#allocation6], 1 }
0x1457   :  { %4716 = vsyncpa [#allocation9], 1 }
0x1458   :  { %4717 = vsyncpa [#allocation12], 1 }
0x1459   :  { %4718 = vsyncpa [#allocation15], 1 }
0x145a   :  { %4719 = vsyncpa [#allocation18], 1 }
0x145b   :  { %4720 = vsyncpa [#allocation4], 1 }

</bundles_post_ra>
